<compile_context>
chip_gen: v6e
topology: v6e:2x2x1
jax: 0.10.0
libtpu: 0.0.40
codegen_flags: <defaults>
</compile_context>

<pallas_src>
import numpy as np
import jax
import jax.numpy as jnp
from jax.experimental import pallas as pl
from jax.experimental.pallas import tpu as pltpu


# ----------------------------------------------------------------------------
# Fused Pallas kernel: (conv3x3 + folded-BN + LeakyReLU) x 2
# ----------------------------------------------------------------------------
def _make_kernel(neg_slope):
    """Ref shapes (batch dim squeezed by BlockSpec):
      x_ref   : (H, W, Cin)       bf16  full image of the current batch element
      w1_ref  : (9*Cin, Cf)       bf16  conv1 weights (BN folded, im2col row order)
      b1_ref  : (1, Cf)           f32
      w2_ref  : (9*Cf, Cf)        bf16
      b2_ref  : (1, Cf)           f32
      o_ref   : (TH, W, Cf)       f32   current output row tile
      xpad_ref: (H+4, W+2, Cin)   bf16  double-halo padded input (persists over row tiles)
      yloc_ref: (TH+2, W+2, Cf)   bf16  padded conv1 tile (+1 halo row each side for conv2)
      im1_ref : ((TH+2)*W, 9*Cin) bf16  im2col staging, conv1
      im2_ref : (TH*W, 9*Cf)      bf16  im2col staging, conv2
    """

    def kernel(x_ref, w1_ref, b1_ref, w2_ref, b2_ref, o_ref,
               xpad_ref, yloc_ref, im1_ref, im2_ref):
        H, W, Cin = x_ref.shape
        TH, _, Cf = o_ref.shape
        i = pl.program_id(1)                       # row-tile index (innermost grid axis)
        n_rows = pl.num_programs(1)
        r0 = pl.multiple_of(i * TH, TH)            # first output row of this tile

        # ---- once per image: zero the halo buffers, stage the padded input ----------
        # Scratch persists across the row-tile axis; only interiors are rewritten below,
        # so the zero halo border is written exactly once per image.
        @pl.when(i == 0)
        def _init():
            xpad_ref[...] = jnp.zeros(xpad_ref.shape, xpad_ref.dtype)
            yloc_ref[...] = jnp.zeros(yloc_ref.shape, yloc_ref.dtype)
            xpad_ref[2:H + 2, 1:W + 1, :] = x_ref[...]

        # ---- conv1 + folded BN + LeakyReLU over TH+2 rows (1-row halo for conv2) ----
        # im2col staging -> ONE fat MXU contraction with K = 9*Cin.
        for kh in range(3):
            for kw in range(3):
                tap = kh * 3 + kw
                patch = xpad_ref[pl.ds(r0 + kh, TH + 2), kw:kw + W, :]
                im1_ref[:, tap * Cin:(tap + 1) * Cin] = patch.reshape((TH + 2) * W, Cin)
        y1 = jnp.dot(im1_ref[...], w1_ref[...], preferred_element_type=jnp.float32)
        y1 = y1 + b1_ref[...]
        y1 = jnp.where(y1 >= 0.0, y1, neg_slope * y1)
        yloc_ref[:, 1:W + 1, :] = y1.reshape(TH + 2, W, Cf).astype(yloc_ref.dtype)

        # Halo rows that fall on the image's zero padding must stay zero.
        @pl.when(i == 0)
        def _fix_top():
            yloc_ref[0:1, 1:W + 1, :] = jnp.zeros((1, W, Cf), yloc_ref.dtype)

        @pl.when(i == n_rows - 1)
        def _fix_bottom():
            yloc_ref[TH + 1:TH + 2, 1:W + 1, :] = jnp.zeros((1, W, Cf), yloc_ref.dtype)

        # ---- conv2 + folded BN + LeakyReLU: ONE fat contraction with K = 9*Cf -------
        for kh in range(3):
            for kw in range(3):
                tap = kh * 3 + kw
                patch = yloc_ref[kh:kh + TH, kw:kw + W, :]
                im2_ref[:, tap * Cf:(tap + 1) * Cf] = patch.reshape(TH * W, Cf)
        y2 = jnp.dot(im2_ref[...], w2_ref[...], preferred_element_type=jnp.float32)
        y2 = y2 + b2_ref[...]
        y2 = jnp.where(y2 >= 0.0, y2, neg_slope * y2)

        # Dropout2d(spatial_dropout=0) == Identity in the reference module.
        o_ref[...] = y2.reshape(TH, W, Cf).astype(o_ref.dtype)

    return kernel


def _vmem_limit_bytes():
    """Generation-aware VMEM ceiling (v7x has 64 MiB/TC vs 128 MiB on v5e/v6e)."""
    cap = 128 * 1024 * 1024
    try:
        info = pltpu.get_tpu_info()
        cap = int(getattr(info, "vmem_capacity_bytes", cap) or cap)
    except Exception:
        pass
    return int(min(96 * 1024 * 1024, max(32 * 1024 * 1024, cap // 2)))


def conv_bn_act_x2_nhwc(x_nhwc, w1_mat, b1, w2_mat, b2, neg_slope=0.01, row_tile=8):
    """Fused (conv3x3 + folded-BN + LeakyReLU) x 2, channels-last (NHWC)."""
    B, H, W, Cin = x_nhwc.shape
    Cf = w1_mat.shape[-1]
    TH = row_tile if (H % row_tile == 0 and H > row_tile) else H
    n_row_tiles = H // TH

    x_bf = x_nhwc.astype(jnp.bfloat16)
    w1_bf = w1_mat.astype(jnp.bfloat16)
    w2_bf = w2_mat.astype(jnp.bfloat16)
    b1_f = b1.astype(jnp.float32).reshape(1, Cf)
    b2_f = b2.astype(jnp.float32).reshape(1, Cf)

    return pl.pallas_call(
        _make_kernel(neg_slope),
        grid=(B, n_row_tiles),
        in_specs=[
            # Full image per batch element; block index is constant along the row-tile
            # axis, so Pallas only DMAs it once per image.
            pl.BlockSpec((None, H, W, Cin), lambda b, i: (b, 0, 0, 0)),
            pl.BlockSpec((9 * Cin, Cf), lambda b, i: (0, 0)),
            pl.BlockSpec((1, Cf), lambda b, i: (0, 0)),
            pl.BlockSpec((9 * Cf, Cf), lambda b, i: (0, 0)),
            pl.BlockSpec((1, Cf), lambda b, i: (0, 0)),
        ],
        out_specs=pl.BlockSpec((None, TH, W, Cf), lambda b, i: (b, i, 0, 0)),
        out_shape=jax.ShapeDtypeStruct((B, H, W, Cf), jnp.float32),
        scratch_shapes=[
            pltpu.VMEM((H + 4, W + 2, Cin), jnp.bfloat16),        # padded input
            pltpu.VMEM((TH + 2, W + 2, Cf), jnp.bfloat16),        # padded conv1 row tile
            pltpu.VMEM(((TH + 2) * W, 9 * Cin), jnp.bfloat16),    # im2col staging, conv1
            pltpu.VMEM((TH * W, 9 * Cf), jnp.bfloat16),           # im2col staging, conv2
        ],
        compiler_params=pltpu.CompilerParams(
            dimension_semantics=("parallel", "arbitrary"),
            vmem_limit_bytes=_vmem_limit_bytes(),
        ),
    )(x_bf, w1_bf, b1_f, w2_bf, b2_f)


def conv_batch_norm_act_x2(x_nchw, params, neg_slope=0.01):
    """PyTorch-module interface (NCHW in/out); the kernel runs channels-last.
    When this block is embedded in a larger NHWC network, call conv_bn_act_x2_nhwc
    directly and skip these two HBM transpose passes."""
    x_nhwc = jnp.transpose(x_nchw, (0, 2, 3, 1))
    y = conv_bn_act_x2_nhwc(x_nhwc, params["w1_mat"], params["b1"],
                            params["w2_mat"], params["b2"], neg_slope)
    return jnp.transpose(y, (0, 3, 1, 2))


# ----------------------------------------------------------------------------
# Parameter init (PyTorch-like) + eval-mode BatchNorm folding + pure-JAX reference
# ----------------------------------------------------------------------------
def fold_bn_into_conv(w_hwio, b, gamma, beta, mean, var, eps=1e-5):
    """Fold eval-mode BatchNorm into the preceding conv. w_hwio: (3,3,Cin,Cout)."""
    scale = gamma / jnp.sqrt(var + eps)
    w_eff = (w_hwio * scale).astype(jnp.float32)
    b_eff = ((b - mean) * scale + beta).astype(jnp.float32)
    return w_eff, b_eff


def init_params(key, in_ch, n_filters):
    k1, k2, k3, k4 = jax.random.split(key, 4)
    fan1, fan2 = in_ch * 9, n_filters * 9
    w1 = jax.random.uniform(k1, (3, 3, in_ch, n_filters), jnp.float32,
                            -1.0 / np.sqrt(fan1), 1.0 / np.sqrt(fan1))
    b1 = jax.random.uniform(k2, (n_filters,), jnp.float32,
                            -1.0 / np.sqrt(fan1), 1.0 / np.sqrt(fan1))
    w2 = jax.random.uniform(k3, (3, 3, n_filters, n_filters), jnp.float32,
                            -1.0 / np.sqrt(fan2), 1.0 / np.sqrt(fan2))
    b2 = jax.random.uniform(k4, (n_filters,), jnp.float32,
                            -1.0 / np.sqrt(fan2), 1.0 / np.sqrt(fan2))
    # BatchNorm at PyTorch init, eval mode: gamma=1, beta=0, running_mean=0, running_var=1
    ones = jnp.ones((n_filters,), jnp.float32)
    zeros = jnp.zeros((n_filters,), jnp.float32)
    w1e, b1e = fold_bn_into_conv(w1, b1, ones, zeros, zeros, ones)
    w2e, b2e = fold_bn_into_conv(w2, b2, ones, zeros, zeros, ones)
    return dict(
        # im2col-ordered weight matrices: row index = (kh*3 + kw)*Cin + ci
        w1_mat=w1e.reshape(9 * in_ch, n_filters),
        w2_mat=w2e.reshape(9 * n_filters, n_filters),
        b1=b1e.reshape(1, n_filters),
        b2=b2e.reshape(1, n_filters),
        # folded HWIO weights kept for the pure-JAX reference check
        w1_hwio=w1e, w2_hwio=w2e,
    )


def _reference_nhwc(x, w1_hwio, b1, w2_hwio, b2, neg_slope=0.01):
    def conv(z, w, b):
        y = jax.lax.conv_general_dilated(
            z, w, window_strides=(1, 1), padding="SAME",
            dimension_numbers=("NHWC", "HWIO", "NHWC"))
        return y + b.reshape(1, 1, 1, -1)
    y = conv(x, w1_hwio, b1)
    y = jnp.where(y >= 0.0, y, neg_slope * y)
    y = conv(y, w2_hwio, b2)
    y = jnp.where(y >= 0.0, y, neg_slope * y)
    return y


if __name__ == "__main__":
    B, in_ch, n_filters, H, W = 2, 4, 32, 16, 16

    key = jax.random.PRNGKey(0)
    kx, kp = jax.random.split(key)
    x = jax.random.normal(kx, (B, in_ch, H, W), jnp.float32)
    params = init_params(kp, in_ch, n_filters)

    out = conv_batch_norm_act_x2(x, params)          # leaky_relu default slope 0.01
    out = jax.block_until_ready(out)

    assert out.shape == (B, n_filters, H, W), out.shape
    assert bool(jnp.isfinite(out).all())

    # Correctness vs a pure-JAX reference (bf16 MXU operands -> loose tolerance).
    x_nhwc = jnp.transpose(x, (0, 2, 3, 1))
    ref = _reference_nhwc(x_nhwc, params["w1_hwio"], params["b1"],
                          params["w2_hwio"], params["b2"])
    ref = jnp.transpose(ref, (0, 3, 1, 2))
    max_err = float(jnp.max(jnp.abs(out - ref)))
    assert max_err < 5e-2, f"max abs error {max_err}"

    print("KERNEL_OK")
</pallas_src>

<mosaic_0001>
module attributes {stable_mosaic.version = 11 : i64} {
  func.func @kernel(%arg0: i32, %arg1: i32, %arg2: memref<1x16x16x4xbf16, #tpu.memory_space<vmem>>, %arg3: memref<36x32xbf16, #tpu.memory_space<vmem>>, %arg4: memref<1x32xf32, #tpu.memory_space<vmem>>, %arg5: memref<288x32xbf16, #tpu.memory_space<vmem>>, %arg6: memref<1x32xf32, #tpu.memory_space<vmem>>, %arg7: memref<1x8x16x32xf32, #tpu.memory_space<vmem>>, %arg8: memref<20x18x4xbf16, #tpu.memory_space<vmem>>, %arg9: memref<10x18x32xbf16, #tpu.memory_space<vmem>>, %arg10: memref<160x36xbf16, #tpu.memory_space<vmem>>, %arg11: memref<128x288xbf16, #tpu.memory_space<vmem>>) attributes {dimension_semantics = [#tpu.dimension_semantics<parallel>, #tpu.dimension_semantics<arbitrary>], iteration_bounds = array<i64: 2, 2>, scalar_prefetch = 0 : i64, scratch_operands = 4 : i64, tpu.core_type = #tpu.core_type<tc>, window_params = [{transform_indices = @transform_0, window_bounds = array<i64: 1, 16, 16, 4>}, {pipeline_mode = #tpu.pipeline_mode<synchronous>, transform_indices = @transform_1, window_bounds = array<i64: 36, 32>}, {pipeline_mode = #tpu.pipeline_mode<synchronous>, transform_indices = @transform_2, window_bounds = array<i64: 1, 32>}, {pipeline_mode = #tpu.pipeline_mode<synchronous>, transform_indices = @transform_3, window_bounds = array<i64: 288, 32>}, {pipeline_mode = #tpu.pipeline_mode<synchronous>, transform_indices = @transform_4, window_bounds = array<i64: 1, 32>}, {transform_indices = @transform_5, window_bounds = array<i64: 1, 8, 16, 32>}]} {
    %c8_i32 = arith.constant 8 : i32
    %0 = arith.muli %arg1, %c8_i32 : i32
    %1 = tpu.assume_multiple %0, 8 : i32
    %c0_i32 = arith.constant 0 : i32
    %2 = arith.cmpi eq, %arg1, %c0_i32 : i32
    %3 = arith.extui %2 : i1 to i32
    %c0_i32_0 = arith.constant 0 : i32
    %4 = arith.cmpi ne, %3, %c0_i32_0 : i32
    scf.if %4 {
      %cst_99 = arith.constant 0.000000e+00 : bf16
      %112 = vector.broadcast %cst_99 : bf16 to vector<20x18x4xbf16>
      %c0_100 = arith.constant 0 : index
      %c0_101 = arith.constant 0 : index
      %c0_102 = arith.constant 0 : index
      %113 = vector.load %arg8[%c0_100, %c0_101, %c0_102] : memref<20x18x4xbf16, #tpu.memory_space<vmem>>, vector<20x18x4xbf16>
      tpu.vector_store %arg8[%c0_100, %c0_101, %c0_102], %112 {strides = array<i32>} : memref<20x18x4xbf16, #tpu.memory_space<vmem>>, vector<20x18x4xbf16>,
      %cst_103 = arith.constant 0.000000e+00 : bf16
      %114 = vector.broadcast %cst_103 : bf16 to vector<10x18x32xbf16>
      %c0_104 = arith.constant 0 : index
      %c0_105 = arith.constant 0 : index
      %c0_106 = arith.constant 0 : index
      %115 = vector.load %arg9[%c0_104, %c0_105, %c0_106] : memref<10x18x32xbf16, #tpu.memory_space<vmem>>, vector<10x18x32xbf16>
      tpu.vector_store %arg9[%c0_104, %c0_105, %c0_106], %114 {strides = array<i32>} : memref<10x18x32xbf16, #tpu.memory_space<vmem>>, vector<10x18x32xbf16>,
      %c0_107 = arith.constant 0 : index
      %c0_108 = arith.constant 0 : index
      %c0_109 = arith.constant 0 : index
      %c0_110 = arith.constant 0 : index
      %116 = vector.load %arg2[%c0_107, %c0_108, %c0_109, %c0_110] : memref<1x16x16x4xbf16, #tpu.memory_space<vmem>>, vector<1x16x16x4xbf16>
      %117 = vector.shape_cast %116 : vector<1x16x16x4xbf16> to vector<16x16x4xbf16>
      %c2_111 = arith.constant 2 : index
      %c1_112 = arith.constant 1 : index
      %c0_113 = arith.constant 0 : index
      %118 = vector.load %arg8[%c2_111, %c1_112, %c0_113] : memref<20x18x4xbf16, #tpu.memory_space<vmem>>, vector<16x16x4xbf16>
      tpu.vector_store %arg8[%c2_111, %c1_112, %c0_113], %117 {strides = array<i32>} : memref<20x18x4xbf16, #tpu.memory_space<vmem>>, vector<16x16x4xbf16>,
    } else {
    }
    %c0_i32_1 = arith.constant 0 : i32
    %5 = arith.addi %1, %c0_i32_1 : i32
    %6 = arith.index_cast %5 : i32 to index
    %c0 = arith.constant 0 : index
    %c0_2 = arith.constant 0 : index
    %7 = vector.load %arg8[%6, %c0, %c0_2] : memref<20x18x4xbf16, #tpu.memory_space<vmem>>, vector<10x16x4xbf16>
    %8 = vector.shape_cast %7 : vector<10x16x4xbf16> to vector<160x4xbf16>
    %c0_3 = arith.constant 0 : index
    %c0_4 = arith.constant 0 : index
    %9 = vector.load %arg10[%c0_3, %c0_4] : memref<160x36xbf16, #tpu.memory_space<vmem>>, vector<160x4xbf16>
    tpu.vector_store %arg10[%c0_3, %c0_4], %8 {strides = array<i32>} : memref<160x36xbf16, #tpu.memory_space<vmem>>, vector<160x4xbf16>,
    %c0_i32_5 = arith.constant 0 : i32
    %10 = arith.addi %1, %c0_i32_5 : i32
    %11 = arith.index_cast %10 : i32 to index
    %c1 = arith.constant 1 : index
    %c0_6 = arith.constant 0 : index
    %12 = vector.load %arg8[%11, %c1, %c0_6] : memref<20x18x4xbf16, #tpu.memory_space<vmem>>, vector<10x16x4xbf16>
    %13 = vector.shape_cast %12 : vector<10x16x4xbf16> to vector<160x4xbf16>
    %c0_7 = arith.constant 0 : index
    %c4 = arith.constant 4 : index
    %14 = vector.load %arg10[%c0_7, %c4] : memref<160x36xbf16, #tpu.memory_space<vmem>>, vector<160x4xbf16>
    tpu.vector_store %arg10[%c0_7, %c4], %13 {strides = array<i32>} : memref<160x36xbf16, #tpu.memory_space<vmem>>, vector<160x4xbf16>,
    %c0_i32_8 = arith.constant 0 : i32
    %15 = arith.addi %1, %c0_i32_8 : i32
    %16 = arith.index_cast %15 : i32 to index
    %c2 = arith.constant 2 : index
    %c0_9 = arith.constant 0 : index
    %17 = vector.load %arg8[%16, %c2, %c0_9] : memref<20x18x4xbf16, #tpu.memory_space<vmem>>, vector<10x16x4xbf16>
    %18 = vector.shape_cast %17 : vector<10x16x4xbf16> to vector<160x4xbf16>
    %c0_10 = arith.constant 0 : index
    %c8 = arith.constant 8 : index
    %19 = vector.load %arg10[%c0_10, %c8] : memref<160x36xbf16, #tpu.memory_space<vmem>>, vector<160x4xbf16>
    tpu.vector_store %arg10[%c0_10, %c8], %18 {strides = array<i32>} : memref<160x36xbf16, #tpu.memory_space<vmem>>, vector<160x4xbf16>,
    %c1_i32 = arith.constant 1 : i32
    %20 = arith.addi %1, %c1_i32 : i32
    %21 = arith.index_cast %20 : i32 to index
    %c0_11 = arith.constant 0 : index
    %c0_12 = arith.constant 0 : index
    %22 = vector.load %arg8[%21, %c0_11, %c0_12] : memref<20x18x4xbf16, #tpu.memory_space<vmem>>, vector<10x16x4xbf16>
    %23 = vector.shape_cast %22 : vector<10x16x4xbf16> to vector<160x4xbf16>
    %c0_13 = arith.constant 0 : index
    %c12 = arith.constant 12 : index
    %24 = vector.load %arg10[%c0_13, %c12] : memref<160x36xbf16, #tpu.memory_space<vmem>>, vector<160x4xbf16>
    tpu.vector_store %arg10[%c0_13, %c12], %23 {strides = array<i32>} : memref<160x36xbf16, #tpu.memory_space<vmem>>, vector<160x4xbf16>,
    %c1_i32_14 = arith.constant 1 : i32
    %25 = arith.addi %1, %c1_i32_14 : i32
    %26 = arith.index_cast %25 : i32 to index
    %c1_15 = arith.constant 1 : index
    %c0_16 = arith.constant 0 : index
    %27 = vector.load %arg8[%26, %c1_15, %c0_16] : memref<20x18x4xbf16, #tpu.memory_space<vmem>>, vector<10x16x4xbf16>
    %28 = vector.shape_cast %27 : vector<10x16x4xbf16> to vector<160x4xbf16>
    %c0_17 = arith.constant 0 : index
    %c16 = arith.constant 16 : index
    %29 = vector.load %arg10[%c0_17, %c16] : memref<160x36xbf16, #tpu.memory_space<vmem>>, vector<160x4xbf16>
    tpu.vector_store %arg10[%c0_17, %c16], %28 {strides = array<i32>} : memref<160x36xbf16, #tpu.memory_space<vmem>>, vector<160x4xbf16>,
    %c1_i32_18 = arith.constant 1 : i32
    %30 = arith.addi %1, %c1_i32_18 : i32
    %31 = arith.index_cast %30 : i32 to index
    %c2_19 = arith.constant 2 : index
    %c0_20 = arith.constant 0 : index
    %32 = vector.load %arg8[%31, %c2_19, %c0_20] : memref<20x18x4xbf16, #tpu.memory_space<vmem>>, vector<10x16x4xbf16>
    %33 = vector.shape_cast %32 : vector<10x16x4xbf16> to vector<160x4xbf16>
    %c0_21 = arith.constant 0 : index
    %c20 = arith.constant 20 : index
    %34 = vector.load %arg10[%c0_21, %c20] : memref<160x36xbf16, #tpu.memory_space<vmem>>, vector<160x4xbf16>
    tpu.vector_store %arg10[%c0_21, %c20], %33 {strides = array<i32>} : memref<160x36xbf16, #tpu.memory_space<vmem>>, vector<160x4xbf16>,
    %c2_i32 = arith.constant 2 : i32
    %35 = arith.addi %1, %c2_i32 : i32
    %36 = arith.index_cast %35 : i32 to index
    %c0_22 = arith.constant 0 : index
    %c0_23 = arith.constant 0 : index
    %37 = vector.load %arg8[%36, %c0_22, %c0_23] : memref<20x18x4xbf16, #tpu.memory_space<vmem>>, vector<10x16x4xbf16>
    %38 = vector.shape_cast %37 : vector<10x16x4xbf16> to vector<160x4xbf16>
    %c0_24 = arith.constant 0 : index
    %c24 = arith.constant 24 : index
    %39 = vector.load %arg10[%c0_24, %c24] : memref<160x36xbf16, #tpu.memory_space<vmem>>, vector<160x4xbf16>
    tpu.vector_store %arg10[%c0_24, %c24], %38 {strides = array<i32>} : memref<160x36xbf16, #tpu.memory_space<vmem>>, vector<160x4xbf16>,
    %c2_i32_25 = arith.constant 2 : i32
    %40 = arith.addi %1, %c2_i32_25 : i32
    %41 = arith.index_cast %40 : i32 to index
    %c1_26 = arith.constant 1 : index
    %c0_27 = arith.constant 0 : index
    %42 = vector.load %arg8[%41, %c1_26, %c0_27] : memref<20x18x4xbf16, #tpu.memory_space<vmem>>, vector<10x16x4xbf16>
    %43 = vector.shape_cast %42 : vector<10x16x4xbf16> to vector<160x4xbf16>
    %c0_28 = arith.constant 0 : index
    %c28 = arith.constant 28 : index
    %44 = vector.load %arg10[%c0_28, %c28] : memref<160x36xbf16, #tpu.memory_space<vmem>>, vector<160x4xbf16>
    tpu.vector_store %arg10[%c0_28, %c28], %43 {strides = array<i32>} : memref<160x36xbf16, #tpu.memory_space<vmem>>, vector<160x4xbf16>,
    %c2_i32_29 = arith.constant 2 : i32
    %45 = arith.addi %1, %c2_i32_29 : i32
    %46 = arith.index_cast %45 : i32 to index
    %c2_30 = arith.constant 2 : index
    %c0_31 = arith.constant 0 : index
    %47 = vector.load %arg8[%46, %c2_30, %c0_31] : memref<20x18x4xbf16, #tpu.memory_space<vmem>>, vector<10x16x4xbf16>
    %48 = vector.shape_cast %47 : vector<10x16x4xbf16> to vector<160x4xbf16>
    %c0_32 = arith.constant 0 : index
    %c32 = arith.constant 32 : index
    %49 = vector.load %arg10[%c0_32, %c32] : memref<160x36xbf16, #tpu.memory_space<vmem>>, vector<160x4xbf16>
    tpu.vector_store %arg10[%c0_32, %c32], %48 {strides = array<i32>} : memref<160x36xbf16, #tpu.memory_space<vmem>>, vector<160x4xbf16>,
    %c0_33 = arith.constant 0 : index
    %c0_34 = arith.constant 0 : index
    %50 = vector.load %arg10[%c0_33, %c0_34] : memref<160x36xbf16, #tpu.memory_space<vmem>>, vector<160x36xbf16>
    %c0_35 = arith.constant 0 : index
    %c0_36 = arith.constant 0 : index
    %51 = vector.load %arg3[%c0_35, %c0_36] : memref<36x32xbf16, #tpu.memory_space<vmem>>, vector<36x32xbf16>
    %cst = arith.constant dense<0.000000e+00> : vector<160x32xf32>
    %52 = tpu.matmul %50, %51, %cst {dimension_numbers = #tpu.dot_dimension_numbers<[1], [0], [0], [1], [0, 0, 1, 1], [], []>} : vector<160x36xbf16>, vector<36x32xbf16>, vector<160x32xf32> -> vector<160x32xf32>
    %c0_37 = arith.constant 0 : index
    %c0_38 = arith.constant 0 : index
    %53 = vector.load %arg4[%c0_37, %c0_38] : memref<1x32xf32, #tpu.memory_space<vmem>>, vector<1x32xf32>
    %54 = vector.broadcast %53 : vector<1x32xf32> to vector<160x32xf32>
    %55 = arith.addf %52, %54 : vector<160x32xf32>
    %cst_39 = arith.constant 0.000000e+00 : f32
    %56 = vector.broadcast %cst_39 : f32 to vector<160x32xf32>
    %57 = arith.cmpf oge, %55, %56 : vector<160x32xf32>
    %cst_40 = arith.constant 0.00999999977 : f32
    %58 = vector.broadcast %cst_40 : f32 to vector<160x32xf32>
    %59 = arith.mulf %58, %55 : vector<160x32xf32>
    %60 = arith.select %57, %55, %59 : vector<160x32xi1>, vector<160x32xf32>
    %61 = vector.shape_cast %60 : vector<160x32xf32> to vector<10x16x32xf32>
    %62 = arith.truncf %61 : vector<10x16x32xf32> to vector<10x16x32xbf16>
    %c0_41 = arith.constant 0 : index
    %c1_42 = arith.constant 1 : index
    %c0_43 = arith.constant 0 : index
    %63 = vector.load %arg9[%c0_41, %c1_42, %c0_43] : memref<10x18x32xbf16, #tpu.memory_space<vmem>>, vector<10x16x32xbf16>
    tpu.vector_store %arg9[%c0_41, %c1_42, %c0_43], %62 {strides = array<i32>} : memref<10x18x32xbf16, #tpu.memory_space<vmem>>, vector<10x16x32xbf16>,
    %c0_i32_44 = arith.constant 0 : i32
    %64 = arith.cmpi eq, %arg1, %c0_i32_44 : i32
    %65 = arith.extui %64 : i1 to i32
    %c0_i32_45 = arith.constant 0 : i32
    %66 = arith.cmpi ne, %65, %c0_i32_45 : i32
    scf.if %66 {
      %cst_99 = arith.constant 0.000000e+00 : bf16
      %112 = vector.broadcast %cst_99 : bf16 to vector<1x16x32xbf16>
      %c0_100 = arith.constant 0 : index
      %c1_101 = arith.constant 1 : index
      %c0_102 = arith.constant 0 : index
      %113 = vector.load %arg9[%c0_100, %c1_101, %c0_102] : memref<10x18x32xbf16, #tpu.memory_space<vmem>>, vector<1x16x32xbf16>
      tpu.vector_store %arg9[%c0_100, %c1_101, %c0_102], %112 {strides = array<i32>} : memref<10x18x32xbf16, #tpu.memory_space<vmem>>, vector<1x16x32xbf16>,
    } else {
    }
    %c1_i32_46 = arith.constant 1 : i32
    %67 = arith.cmpi eq, %arg1, %c1_i32_46 : i32
    %68 = arith.extui %67 : i1 to i32
    %c0_i32_47 = arith.constant 0 : i32
    %69 = arith.cmpi ne, %68, %c0_i32_47 : i32
    scf.if %69 {
      %cst_99 = arith.constant 0.000000e+00 : bf16
      %112 = vector.broadcast %cst_99 : bf16 to vector<1x16x32xbf16>
      %c9 = arith.constant 9 : index
      %c1_100 = arith.constant 1 : index
      %c0_101 = arith.constant 0 : index
      %113 = vector.load %arg9[%c9, %c1_100, %c0_101] : memref<10x18x32xbf16, #tpu.memory_space<vmem>>, vector<1x16x32xbf16>
      tpu.vector_store %arg9[%c9, %c1_100, %c0_101], %112 {strides = array<i32>} : memref<10x18x32xbf16, #tpu.memory_space<vmem>>, vector<1x16x32xbf16>,
    } else {
    }
    %c0_48 = arith.constant 0 : index
    %c0_49 = arith.constant 0 : index
    %c0_50 = arith.constant 0 : index
    %70 = vector.load %arg9[%c0_48, %c0_49, %c0_50] : memref<10x18x32xbf16, #tpu.memory_space<vmem>>, vector<8x16x32xbf16>
    %71 = vector.shape_cast %70 : vector<8x16x32xbf16> to vector<128x32xbf16>
    %c0_51 = arith.constant 0 : index
    %c0_52 = arith.constant 0 : index
    %72 = vector.load %arg11[%c0_51, %c0_52] : memref<128x288xbf16, #tpu.memory_space<vmem>>, vector<128x32xbf16>
    tpu.vector_store %arg11[%c0_51, %c0_52], %71 {strides = array<i32>} : memref<128x288xbf16, #tpu.memory_space<vmem>>, vector<128x32xbf16>,
    %c0_53 = arith.constant 0 : index
    %c1_54 = arith.constant 1 : index
    %c0_55 = arith.constant 0 : index
    %73 = vector.load %arg9[%c0_53, %c1_54, %c0_55] : memref<10x18x32xbf16, #tpu.memory_space<vmem>>, vector<8x16x32xbf16>
    %74 = vector.shape_cast %73 : vector<8x16x32xbf16> to vector<128x32xbf16>
    %c0_56 = arith.constant 0 : index
    %c32_57 = arith.constant 32 : index
    %75 = vector.load %arg11[%c0_56, %c32_57] : memref<128x288xbf16, #tpu.memory_space<vmem>>, vector<128x32xbf16>
    tpu.vector_store %arg11[%c0_56, %c32_57], %74 {strides = array<i32>} : memref<128x288xbf16, #tpu.memory_space<vmem>>, vector<128x32xbf16>,
    %c0_58 = arith.constant 0 : index
    %c2_59 = arith.constant 2 : index
    %c0_60 = arith.constant 0 : index
    %76 = vector.load %arg9[%c0_58, %c2_59, %c0_60] : memref<10x18x32xbf16, #tpu.memory_space<vmem>>, vector<8x16x32xbf16>
    %77 = vector.shape_cast %76 : vector<8x16x32xbf16> to vector<128x32xbf16>
    %c0_61 = arith.constant 0 : index
    %c64 = arith.constant 64 : index
    %78 = vector.load %arg11[%c0_61, %c64] : memref<128x288xbf16, #tpu.memory_space<vmem>>, vector<128x32xbf16>
    tpu.vector_store %arg11[%c0_61, %c64], %77 {strides = array<i32>} : memref<128x288xbf16, #tpu.memory_space<vmem>>, vector<128x32xbf16>,
    %c1_62 = arith.constant 1 : index
    %c0_63 = arith.constant 0 : index
    %c0_64 = arith.constant 0 : index
    %79 = vector.load %arg9[%c1_62, %c0_63, %c0_64] : memref<10x18x32xbf16, #tpu.memory_space<vmem>>, vector<8x16x32xbf16>
    %80 = vector.shape_cast %79 : vector<8x16x32xbf16> to vector<128x32xbf16>
    %c0_65 = arith.constant 0 : index
    %c96 = arith.constant 96 : index
    %81 = vector.load %arg11[%c0_65, %c96] : memref<128x288xbf16, #tpu.memory_space<vmem>>, vector<128x32xbf16>
    tpu.vector_store %arg11[%c0_65, %c96], %80 {strides = array<i32>} : memref<128x288xbf16, #tpu.memory_space<vmem>>, vector<128x32xbf16>,
    %c1_66 = arith.constant 1 : index
    %c1_67 = arith.constant 1 : index
    %c0_68 = arith.constant 0 : index
    %82 = vector.load %arg9[%c1_66, %c1_67, %c0_68] : memref<10x18x32xbf16, #tpu.memory_space<vmem>>, vector<8x16x32xbf16>
    %83 = vector.shape_cast %82 : vector<8x16x32xbf16> to vector<128x32xbf16>
    %c0_69 = arith.constant 0 : index
    %c128 = arith.constant 128 : index
    %84 = vector.load %arg11[%c0_69, %c128] : memref<128x288xbf16, #tpu.memory_space<vmem>>, vector<128x32xbf16>
    tpu.vector_store %arg11[%c0_69, %c128], %83 {strides = array<i32>} : memref<128x288xbf16, #tpu.memory_space<vmem>>, vector<128x32xbf16>,
    %c1_70 = arith.constant 1 : index
    %c2_71 = arith.constant 2 : index
    %c0_72 = arith.constant 0 : index
    %85 = vector.load %arg9[%c1_70, %c2_71, %c0_72] : memref<10x18x32xbf16, #tpu.memory_space<vmem>>, vector<8x16x32xbf16>
    %86 = vector.shape_cast %85 : vector<8x16x32xbf16> to vector<128x32xbf16>
    %c0_73 = arith.constant 0 : index
    %c160 = arith.constant 160 : index
    %87 = vector.load %arg11[%c0_73, %c160] : memref<128x288xbf16, #tpu.memory_space<vmem>>, vector<128x32xbf16>
    tpu.vector_store %arg11[%c0_73, %c160], %86 {strides = array<i32>} : memref<128x288xbf16, #tpu.memory_space<vmem>>, vector<128x32xbf16>,
    %c2_74 = arith.constant 2 : index
    %c0_75 = arith.constant 0 : index
    %c0_76 = arith.constant 0 : index
    %88 = vector.load %arg9[%c2_74, %c0_75, %c0_76] : memref<10x18x32xbf16, #tpu.memory_space<vmem>>, vector<8x16x32xbf16>
    %89 = vector.shape_cast %88 : vector<8x16x32xbf16> to vector<128x32xbf16>
    %c0_77 = arith.constant 0 : index
    %c192 = arith.constant 192 : index
    %90 = vector.load %arg11[%c0_77, %c192] : memref<128x288xbf16, #tpu.memory_space<vmem>>, vector<128x32xbf16>
    tpu.vector_store %arg11[%c0_77, %c192], %89 {strides = array<i32>} : memref<128x288xbf16, #tpu.memory_space<vmem>>, vector<128x32xbf16>,
    %c2_78 = arith.constant 2 : index
    %c1_79 = arith.constant 1 : index
    %c0_80 = arith.constant 0 : index
    %91 = vector.load %arg9[%c2_78, %c1_79, %c0_80] : memref<10x18x32xbf16, #tpu.memory_space<vmem>>, vector<8x16x32xbf16>
    %92 = vector.shape_cast %91 : vector<8x16x32xbf16> to vector<128x32xbf16>
    %c0_81 = arith.constant 0 : index
    %c224 = arith.constant 224 : index
    %93 = vector.load %arg11[%c0_81, %c224] : memref<128x288xbf16, #tpu.memory_space<vmem>>, vector<128x32xbf16>
    tpu.vector_store %arg11[%c0_81, %c224], %92 {strides = array<i32>} : memref<128x288xbf16, #tpu.memory_space<vmem>>, vector<128x32xbf16>,
    %c2_82 = arith.constant 2 : index
    %c2_83 = arith.constant 2 : index
    %c0_84 = arith.constant 0 : index
    %94 = vector.load %arg9[%c2_82, %c2_83, %c0_84] : memref<10x18x32xbf16, #tpu.memory_space<vmem>>, vector<8x16x32xbf16>
    %95 = vector.shape_cast %94 : vector<8x16x32xbf16> to vector<128x32xbf16>
    %c0_85 = arith.constant 0 : index
    %c256 = arith.constant 256 : index
    %96 = vector.load %arg11[%c0_85, %c256] : memref<128x288xbf16, #tpu.memory_space<vmem>>, vector<128x32xbf16>
    tpu.vector_store %arg11[%c0_85, %c256], %95 {strides = array<i32>} : memref<128x288xbf16, #tpu.memory_space<vmem>>, vector<128x32xbf16>,
    %c0_86 = arith.constant 0 : index
    %c0_87 = arith.constant 0 : index
    %97 = vector.load %arg11[%c0_86, %c0_87] : memref<128x288xbf16, #tpu.memory_space<vmem>>, vector<128x288xbf16>
    %c0_88 = arith.constant 0 : index
    %c0_89 = arith.constant 0 : index
    %98 = vector.load %arg5[%c0_88, %c0_89] : memref<288x32xbf16, #tpu.memory_space<vmem>>, vector<288x32xbf16>
    %cst_90 = arith.constant dense<0.000000e+00> : vector<128x32xf32>
    %99 = tpu.matmul %97, %98, %cst_90 {dimension_numbers = #tpu.dot_dimension_numbers<[1], [0], [0], [1], [0, 0, 1, 1], [], []>} : vector<128x288xbf16>, vector<288x32xbf16>, vector<128x32xf32> -> vector<128x32xf32>
    %c0_91 = arith.constant 0 : index
    %c0_92 = arith.constant 0 : index
    %100 = vector.load %arg6[%c0_91, %c0_92] : memref<1x32xf32, #tpu.memory_space<vmem>>, vector<1x32xf32>
    %101 = vector.broadcast %100 : vector<1x32xf32> to vector<128x32xf32>
    %102 = arith.addf %99, %101 : vector<128x32xf32>
    %cst_93 = arith.constant 0.000000e+00 : f32
    %103 = vector.broadcast %cst_93 : f32 to vector<128x32xf32>
    %104 = arith.cmpf oge, %102, %103 : vector<128x32xf32>
    %cst_94 = arith.constant 0.00999999977 : f32
    %105 = vector.broadcast %cst_94 : f32 to vector<128x32xf32>
    %106 = arith.mulf %105, %102 : vector<128x32xf32>
    %107 = arith.select %104, %102, %106 : vector<128x32xi1>, vector<128x32xf32>
    %108 = vector.shape_cast %107 : vector<128x32xf32> to vector<8x16x32xf32>
    %c0_95 = arith.constant 0 : index
    %c0_96 = arith.constant 0 : index
    %c0_97 = arith.constant 0 : index
    %c0_98 = arith.constant 0 : index
    %109 = vector.load %arg7[%c0_95, %c0_96, %c0_97, %c0_98] : memref<1x8x16x32xf32, #tpu.memory_space<vmem>>, vector<1x8x16x32xf32>
    %110 = vector.shape_cast %109 : vector<1x8x16x32xf32> to vector<8x16x32xf32>
    %111 = vector.shape_cast %108 : vector<8x16x32xf32> to vector<1x8x16x32xf32>
    tpu.vector_store %arg7[%c0_95, %c0_96, %c0_97, %c0_98], %111 {strides = array<i32>} : memref<1x8x16x32xf32, #tpu.memory_space<vmem>>, vector<1x8x16x32xf32>,
    return
  }
  func.func @transform_0(%arg0: i32, %arg1: i32) -> (i32, i32, i32, i32) {
    %c0_i32 = arith.constant 0 : i32
    %c0_i32_0 = arith.constant 0 : i32
    %c0_i32_1 = arith.constant 0 : i32
    %c0_i32_2 = arith.constant 0 : i32
    return %arg0, %c0_i32, %c0_i32_0, %c0_i32_1 : i32, i32, i32, i32
  }
  func.func @transform_1(%arg0: i32, %arg1: i32) -> (i32, i32) {
    %c0_i32 = arith.constant 0 : i32
    %c0_i32_0 = arith.constant 0 : i32
    %c0_i32_1 = arith.constant 0 : i32
    return %c0_i32, %c0_i32_0 : i32, i32
  }
  func.func @transform_2(%arg0: i32, %arg1: i32) -> (i32, i32) {
    %c0_i32 = arith.constant 0 : i32
    %c0_i32_0 = arith.constant 0 : i32
    %c0_i32_1 = arith.constant 0 : i32
    return %c0_i32, %c0_i32_0 : i32, i32
  }
  func.func @transform_3(%arg0: i32, %arg1: i32) -> (i32, i32) {
    %c0_i32 = arith.constant 0 : i32
    %c0_i32_0 = arith.constant 0 : i32
    %c0_i32_1 = arith.constant 0 : i32
    return %c0_i32, %c0_i32_0 : i32, i32
  }
  func.func @transform_4(%arg0: i32, %arg1: i32) -> (i32, i32) {
    %c0_i32 = arith.constant 0 : i32
    %c0_i32_0 = arith.constant 0 : i32
    %c0_i32_1 = arith.constant 0 : i32
    return %c0_i32, %c0_i32_0 : i32, i32
  }
  func.func @transform_5(%arg0: i32, %arg1: i32) -> (i32, i32, i32, i32) {
    %c0_i32 = arith.constant 0 : i32
    %c0_i32_0 = arith.constant 0 : i32
    %c0_i32_1 = arith.constant 0 : i32
    return %arg0, %arg1, %c0_i32, %c0_i32_0 : i32, i32, i32, i32
  }
}

</mosaic_0001>

<bundles_post_ra>
// kernel: tpu_custom_call.1
= control target key start
LH: loop header
LB: loop body
LE: loop exit
PB: predicated region body
PF: predicated region fallthrough
CT: control target
= control target key end

     0   :  { %10 = vsyncpa [#allocation7], 0  ;;  %s8760_s0 = inlined_call_operand.vmem [shape: bf16[2,16,16,4], index: 0, kind: input, shape index: {}]   ;;  %s8761_s1 = inlined_call_operand.vmem [shape: bf16[36,32], index: 1, kind: input, shape index: {}]   ;;  %s8762_s2 = inlined_call_operand.vmem [shape: f32[1,32], index: 2, kind: input, shape index: {}]   ;;  %s8763_s3 = inlined_call_operand.vmem [shape: bf16[288,32], index: 3, kind: input, shape index: {}]   ;;  %s8764_s4 = inlined_call_operand.vmem [shape: f32[1,32], index: 4, kind: input, shape index: {}]   ;;  %s8765_s5 = inlined_call_operand.hbm [shape: f32[2,16,16,32], index: 5, kind: output, shape index: {}]  }
   0x1   :  { %12 = vsyncpa [#allocation7 + $0x1], 0  ;;  %s6433_s18 = smov 0   ;;  %s6435_s19 = smov 0  }
   0x2   :  { %s6437_s20 = smov 0   ;;  %s6439_s21 = smov 0  }
   0x3   :  { %s6441_s22 = smov 0   ;;  %s6443_s23 = smov 0  }
   0x4   :  { %s6445_s24 = smov 0   ;;  %s6447_s25 = smov 0  }
   0x5 LB: > { %s5661_s26 = sadd.s32 4294967295, %s6386_s25   ;;  %s5662_s27 = sadd.s32 4294967294, %s6386_s25   ;;  %s6386_s25 = sphi %s6447_s25, %s18_s25   ;;  %s6382_s24 = sphi %s6445_s24, %s8802_s24   ;;  %s6378_s23 = sphi %s6443_s23, %s8801_s23   ;;  %s6374_s22 = sphi %s6441_s22, %s8800_s22   ;;  %s6370_s21 = sphi %s6439_s21, %s8799_s21   ;;  %s6366_s20 = sphi %s6437_s20, %s8798_s20   ;;  %s6362_s19 = sphi %s6435_s19, %s8797_s19   ;;  %s6358_s18 = sphi %s6433_s18, %s8796_s18  }
   0x6   : > { %s27_s28 = sadd.s32 1, %s6378_s23  ;;  %s30_s29 = sadd.s32 1, %s6382_s24 }
   0x7   : > { %p28_p0 = scmp.ge.s32.totalorder %s27_s28, 2  ;;  %p159_p1 = scmp.ne.s32.totalorder %s6366_s20, %s6362_s19 }
   0x8   : > { %p160_p2 = scmp.eq.s32.totalorder %s5661_s26, 3  ;;  %p165_p5 = scmp.ne.s32.totalorder %s6362_s19, %s6358_s18 }
   0x9   : > { %s8804_s28 = smov (%p28_p0, %s27_s28), 0  ;;  %s8806_s29 = smov (!%p28_p0, %s30_s29), %s6382_s24 }
   0xa   : > { %s145_s30 = ssub.s32 %s6378_s23, %s8804_s28  ;;  %p6484_p3 = por %p160_p2, %p159_p1 }
   0xb   : > { %p32_p4 = scmp.ge.s32.totalorder %s8806_s29, 2  ;;  %p166_p6 = scmp.eq.s32.totalorder %s5662_s27, 3 }
   0xc   : > { %p5665_p7 = scmp.ge.s32.totalorder %s6386_s25, 1  ;;  %p204_p9 = scmp.lt.s32.totalorder %s6386_s25, 5 }
   0xd   : > { %s8808_s29 = smov (%p32_p4, %s8806_s29), 0  ;;  %p6493_p8 = por %p166_p6, %p165_p5 }
   0xe   : > { %s144_s8 = ssub.s32 %s6382_s24, %s8808_s29  ;;  %s149_s9 = sadd.s32 1, %s6366_s20 }
   0xf   : > { %s146_s10 = sor.u32 %s145_s30, %s144_s8  ;;  %p205_p10 = pnand %p5665_p7, %p204_p9 }
  0x10   : > { %p147_p11 = scmp.eq.s32.totalorder %s146_s10, 0  ;;  %s8766_s12 = sand.u32 (!%p205_p10), 1, %s6362_s19  }
  0x11   : > { %208 = sbr.rel (%p205_p10) target bundleno = 1348 (0x544), region = 40  ;;  %p232_p12 = scmp.lt.s32.totalorder (!%p205_p10), %s6374_s22, 1 }
  0x12   : > { %s6502_s11 = scalar_select %p147_p11, %s6366_s20, %s149_s9  }
  0x13   : > { %s5666_s13 = sshll.u32 (!%p205_p10), %s8766_s12, 7  ;;  %p5670_p13 = scmp.ne.s32.totalorder (!%p205_p10), %s6370_s21, 0 }
  0x14   : > { %s6514_s27 = scalar_lea.vmem (!%p205_p10), [#allocation6], %s5666_s13 }
  0x16   : > { %s233_s14 = scalar_select %p232_p12, %s6374_s22, 1 }
  0x17   : > { %243 = sbr.rel (%p5670_p13) target bundleno = 125 (0x7d), region = 44 }
  0x18   : > { %s5995_s15 = sshll.u32 %s233_s14, 7 }
  0x19   : > { %s6512_s26 = scalar_lea.vmem %s8760_s0, %s5995_s15 }
  0x1c   : > { %vm244_vm0 = vcmask 27648   ;;  %vm247_vm1 = vcmask 24576   ;;  %vm306_vm2 = vcmask 257024   ;;  %v6520_v0 = vld [vmem:[%s6512_s26] sm:$0xf]  ;;  %v6388_v1 = vmov 0  }
  0x1d   : > { %252 = vst.msk [vmem:[#allocation2 + $0x18] sm:$0xf] %vm244_vm0, %v6388_v1  ;;  %245 = vst.msk [vmem:[#allocation2] sm:$0xf] %vm244_vm0, %v6388_v1  ;;  %vm309_vm3 = vcmask 253952   ;;  %v374_v2 = vshrl.u32 %v6520_v0, 16 }
  0x1e   : > { %246 = vst.msk [vmem:[#allocation2 + $0x4] sm:$0xf] %vm244_vm0, %v6388_v1  ;;  %249 = vst.msk [vmem:[#allocation2 + $0xc] sm:$0xf] %vm244_vm0, %v6388_v1  ;;  %v377_v3 = vshll.u32 %v6520_v0, 16 }
  0x1f   : > { %250 = vst.msk [vmem:[#allocation2 + $0x10] sm:$0xf] %vm244_vm0, %v6388_v1  ;;  %253 = vst.msk [vmem:[#allocation2 + $0x1c] sm:$0xf] %vm244_vm0, %v6388_v1  ;;  %vm695_vm4 = vsmask.f32 7938 }
  0x20   : > { %255 = vst.msk [vmem:[#allocation2 + $0x24] sm:$0xf] %vm244_vm0, %v6388_v1  ;;  %256 = vst.msk [vmem:[#allocation2 + $0x28] sm:$0xf] %vm244_vm0, %v6388_v1  ;;  %v339_v4 = vld [vmem:[%s6512_s26 + $0x4] sm:$0xf] }
  0x21   : > { %258 = vst.msk [vmem:[#allocation2 + $0x30] sm:$0xf] %vm244_vm0, %v6388_v1  ;;  %259 = vst.msk [vmem:[#allocation2 + $0x34] sm:$0xf] %vm244_vm0, %v6388_v1  ;;  %vm370_vm5 = vsmask.f32 256 }
  0x22   : > { %261 = vst.msk [vmem:[#allocation2 + $0x3c] sm:$0xf] %vm244_vm0, %v6388_v1  ;;  %262 = vst.msk [vmem:[#allocation2 + $0x40] sm:$0xf] %vm244_vm0, %v6388_v1  ;;  %vm371_vm6 = vsmask.f32 4368 }
  0x23   : > { %264 = vst.msk [vmem:[#allocation2 + $0x48] sm:$0xf] %vm244_vm0, %v6388_v1  ;;  %265 = vst.msk [vmem:[#allocation2 + $0x4c] sm:$0xf] %vm244_vm0, %v6388_v1  ;;  %v376_v5 = vrot.slane %v374_v2, 7  ;;  %v382_v6 = vshrl.u32 %v339_v4, 16 }
  0x24   : > { %267 = vst.msk [vmem:[#allocation2 + $0x54] sm:$0xf] %vm244_vm0, %v6388_v1  ;;  %268 = vst.msk [vmem:[#allocation2 + $0x58] sm:$0xf] %vm244_vm0, %v6388_v1  ;;  %v385_v7 = vshll.u32 %v339_v4, 16 }
  0x25   : > { %270 = vst.msk [vmem:[#allocation2 + $0x60] sm:$0xf] %vm244_vm0, %v6388_v1  ;;  %271 = vst.msk [vmem:[#allocation2 + $0x64] sm:$0xf] %vm244_vm0, %v6388_v1  ;;  %v340_v8 = vld [vmem:[%s6512_s26 + $0x8] sm:$0xf]  ;;  %v379_v14 = vor.u32 %v377_v3, %v376_v5 }
  0x26   : > { %273 = vst.msk [vmem:[#allocation2 + $0x6c] sm:$0xf] %vm244_vm0, %v6388_v1  ;;  %274 = vst.msk [vmem:[#allocation2 + $0x70] sm:$0xf] %vm244_vm0, %v6388_v1  ;;  %v391_v10 = vshrl.u32 %v340_v8, 16  ;;  %v394_v11 = vshll.u32 %v340_v8, 16 }
  0x27   : > { %276 = vst.msk [vmem:[#allocation2 + $0x78] sm:$0xf] %vm244_vm0, %v6388_v1  ;;  %277 = vst.msk [vmem:[#allocation2 + $0x7c] sm:$0xf] %vm244_vm0, %v6388_v1  ;;  %v341_v12 = vld [vmem:[%s6512_s26 + $0xc] sm:$0xf] }
  0x28   : > { %279 = vst.msk [vmem:[#allocation2 + $0x84] sm:$0xf] %vm244_vm0, %v6388_v1  ;;  %280 = vst.msk [vmem:[#allocation2 + $0x88] sm:$0xf] %vm244_vm0, %v6388_v1  ;;  %v342_v13 = vld [vmem:[%s6512_s26 + $0x10] sm:$0xf] }
  0x29   : > { %282 = vst.msk [vmem:[#allocation2 + $0x90] sm:$0xf] %vm244_vm0, %v6388_v1  ;;  %283 = vst.msk [vmem:[#allocation2 + $0x94] sm:$0xf] %vm244_vm0, %v6388_v1  ;;  %v380_v16 = vrot.slane %v376_v5, 4  ;;  %v384_v17 = vrot.slane %v382_v6, 7 }
  0x2a   : > { %285 = vst.msk [vmem:[#allocation2 + $0x9c] sm:$0xf] %vm244_vm0, %v6388_v1  ;;  %286 = vst.msk [vmem:[#allocation2 + $0xa0] sm:$0xf] %vm244_vm0, %v6388_v1  ;;  %v399_v18 = vshrl.u32 %v341_v12, 16  ;;  %v393_v21 = vrot.slane %v391_v10, 7 }
  0x2b   : > { %288 = vst.msk [vmem:[#allocation2 + $0xa8] sm:$0xf] %vm244_vm0, %v6388_v1  ;;  %289 = vst.msk [vmem:[#allocation2 + $0xac] sm:$0xf] %vm244_vm0, %v6388_v1  ;;  %v343_v19 = vld [vmem:[%s6512_s26 + $0x14] sm:$0xf]  ;;  %v387_v25 = vor.u32 %v385_v7, %v384_v17 }
  0x2c   : > { %291 = vst.msk [vmem:[#allocation2 + $0xb4] sm:$0xf] %vm244_vm0, %v6388_v1  ;;  %292 = vst.msk [vmem:[#allocation2 + $0xb8] sm:$0xf] %vm244_vm0, %v6388_v1  ;;  %v402_v22 = vshll.u32 %v341_v12, 16  ;;  %v408_v23 = vshrl.u32 %v342_v13, 16  ;;  %v396_v32 = vor.u32 %v394_v11, %v393_v21 }
  0x2d   : > { %294 = vst.msk [vmem:[#allocation2 + $0xc0] sm:$0xf] %vm244_vm0, %v6388_v1  ;;  %295 = vst.msk [vmem:[#allocation2 + $0xc4] sm:$0xf] %vm244_vm0, %v6388_v1  ;;  %v411_v24 = vshll.u32 %v342_v13, 16  ;;  %v389_v26 = vrot.slane %v384_v17, 4 }
  0x2e   : > { %297 = vst.msk [vmem:[#allocation2 + $0xcc] sm:$0xf] %vm244_vm0, %v6388_v1  ;;  %298 = vst.msk [vmem:[#allocation2 + $0xd0] sm:$0xf] %vm244_vm0, %v6388_v1  ;;  %v401_v27 = vrot.slane %v399_v18, 7  ;;  %v416_v28 = vshrl.u32 %v343_v19, 16 }
  0x2f   : > { %300 = vst.msk [vmem:[#allocation2 + $0xd8] sm:$0xf] %vm244_vm0, %v6388_v1  ;;  %301 = vst.msk [vmem:[#allocation2 + $0xdc] sm:$0xf] %vm244_vm0, %v6388_v1  ;;  %v344_v29 = vld [vmem:[%s6512_s26 + $0x18] sm:$0xf] }
  0x30   : > { %303 = vst.msk [vmem:[#allocation2 + $0xe4] sm:$0xf] %vm244_vm0, %v6388_v1  ;;  %304 = vst.msk [vmem:[#allocation2 + $0xe8] sm:$0xf] %vm244_vm0, %v6388_v1  ;;  %v697_v30 = vld [vmem:[#allocation2 + $0x18] sm:$0xf]  ;;  %v404_v40 = vor.u32 %v402_v22, %v401_v27 }
  0x31   : > { %254 = vst.msk [vmem:[#allocation2 + $0x20] sm:$0x1] %vm247_vm1, %v6388_v1  ;;  %248 = vst.msk [vmem:[#allocation2 + $0x8] sm:$0x1] %vm247_vm1, %v6388_v1  ;;  %v706_v33 = vld [vmem:[#allocation2 + $0x24] sm:$0xf] }
  0x32   : > { %251 = vst.msk [vmem:[#allocation2 + $0x14] sm:$0x1] %vm247_vm1, %v6388_v1  ;;  %257 = vst.msk [vmem:[#allocation2 + $0x2c] sm:$0x1] %vm247_vm1, %v6388_v1  ;;  %v397_v37 = vrot.slane %v393_v21, 4  ;;  %v406_v41 = vrot.slane %v401_v27, 4 }
  0x33   : > { %260 = vst.msk [vmem:[#allocation2 + $0x38] sm:$0x1] %vm247_vm1, %v6388_v1  ;;  %263 = vst.msk [vmem:[#allocation2 + $0x44] sm:$0x1] %vm247_vm1, %v6388_v1  ;;  %v410_v42 = vrot.slane %v408_v23, 7  ;;  %v418_v45 = vrot.slane %v416_v28, 7 }
  0x34   : > { %266 = vst.msk [vmem:[#allocation2 + $0x50] sm:$0x1] %vm247_vm1, %v6388_v1  ;;  %269 = vst.msk [vmem:[#allocation2 + $0x5c] sm:$0x1] %vm247_vm1, %v6388_v1  ;;  %v345_v43 = vld [vmem:[%s6512_s26 + $0x1c] sm:$0xf] }
  0x35   : > { %272 = vst.msk [vmem:[#allocation2 + $0x68] sm:$0x1] %vm247_vm1, %v6388_v1  ;;  %275 = vst.msk [vmem:[#allocation2 + $0x74] sm:$0x1] %vm247_vm1, %v6388_v1  ;;  %v713_v44 = vld [vmem:[#allocation2 + $0x30] sm:$0xf]  ;;  %v413_v51 = vor.u32 %v411_v24, %v410_v42 }
  0x36   : > { %278 = vst.msk [vmem:[#allocation2 + $0x80] sm:$0x1] %vm247_vm1, %v6388_v1  ;;  %281 = vst.msk [vmem:[#allocation2 + $0x8c] sm:$0x1] %vm247_vm1, %v6388_v1  ;;  %v419_v46 = vshll.u32 %v343_v19, 16  ;;  %v425_v47 = vshrl.u32 %v344_v29, 16 }
  0x37   : > { %284 = vst.msk [vmem:[#allocation2 + $0x98] sm:$0x1] %vm247_vm1, %v6388_v1  ;;  %287 = vst.msk [vmem:[#allocation2 + $0xa4] sm:$0x1] %vm247_vm1, %v6388_v1  ;;  %v428_v48 = vshll.u32 %v344_v29, 16  ;;  %v414_v52 = vrot.slane %v410_v42, 4 }
  0x38   : > { %290 = vst.msk [vmem:[#allocation2 + $0xb0] sm:$0x1] %vm247_vm1, %v6388_v1  ;;  %293 = vst.msk [vmem:[#allocation2 + $0xbc] sm:$0x1] %vm247_vm1, %v6388_v1  ;;  %v703_v31 = vld [vmem:[#allocation2 + $0x20] sm:$0x1]  ;;  %v421_v55 = vor.u32 %v419_v46, %v418_v45 }
  0x39   : > { %296 = vst.msk [vmem:[#allocation2 + $0xc8] sm:$0x1] %vm247_vm1, %v6388_v1  ;;  %299 = vst.msk [vmem:[#allocation2 + $0xd4] sm:$0x1] %vm247_vm1, %v6388_v1  ;;  %v710_v38 = vld [vmem:[#allocation2 + $0x2c] sm:$0x1] }
  0x3a   : > { %302 = vst.msk [vmem:[#allocation2 + $0xe0] sm:$0x1] %vm247_vm1, %v6388_v1  ;;  %305 = vst.msk [vmem:[#allocation2 + $0xec] sm:$0x1] %vm247_vm1, %v6388_v1  ;;  %v717_v53 = vld [vmem:[#allocation2 + $0x38] sm:$0x1] }
  0x3b   : > { %307 = vst.msk [vmem:[#allocation3] sm:$0xf] %vm306_vm2, %v6388_v1  ;;  %308 = vst.msk [vmem:[#allocation3 + $0x4] sm:$0xf] %vm306_vm2, %v6388_v1  ;;  %v346_v54 = vld [vmem:[%s6512_s26 + $0x20] sm:$0xf] }
  0x3c   : > { %311 = vst.msk [vmem:[#allocation3 + $0xc] sm:$0xf] %vm306_vm2, %v6388_v1  ;;  %312 = vst.msk [vmem:[#allocation3 + $0x10] sm:$0xf] %vm306_vm2, %v6388_v1  ;;  %v423_v56 = vrot.slane %v418_v45, 4  ;;  %v427_v57 = vrot.slane %v425_v47, 7 }
  0x3d   : > { %314 = vst.msk [vmem:[#allocation3 + $0x18] sm:$0xf] %vm306_vm2, %v6388_v1  ;;  %315 = vst.msk [vmem:[#allocation3 + $0x1c] sm:$0xf] %vm306_vm2, %v6388_v1  ;;  %v433_v58 = vshrl.u32 %v345_v43, 16  ;;  %v436_v62 = vshll.u32 %v345_v43, 16 }
  0x3e   : > { %317 = vst.msk [vmem:[#allocation3 + $0x24] sm:$0xf] %vm306_vm2, %v6388_v1  ;;  %318 = vst.msk [vmem:[#allocation3 + $0x28] sm:$0xf] %vm306_vm2, %v6388_v1  ;;  %v347_v59 = vld [vmem:[%s6512_s26 + $0x24] sm:$0xf]  ;;  %v430_v3 = vor.u32 %v428_v48, %v427_v57 }
  0x3f   : > { %320 = vst.msk [vmem:[#allocation3 + $0x30] sm:$0xf] %vm306_vm2, %v6388_v1  ;;  %321 = vst.msk [vmem:[#allocation3 + $0x34] sm:$0xf] %vm306_vm2, %v6388_v1  ;;  %v720_v61 = vld [vmem:[#allocation2 + $0x3c] sm:$0xf] }
  0x40   : > { %323 = vst.msk [vmem:[#allocation3 + $0x3c] sm:$0xf] %vm306_vm2, %v6388_v1  ;;  %324 = vst.msk [vmem:[#allocation3 + $0x40] sm:$0xf] %vm306_vm2, %v6388_v1  ;;  %v442_v63 = vshrl.u32 %v346_v54, 16  ;;  %v445_v0 = vshll.u32 %v346_v54, 16 }
  0x41   : > { %326 = vst.msk [vmem:[#allocation3 + $0x48] sm:$0xf] %vm306_vm2, %v6388_v1  ;;  %327 = vst.msk [vmem:[#allocation3 + $0x4c] sm:$0xf] %vm306_vm2, %v6388_v1  ;;  %v431_v4 = vrot.slane %v427_v57, 4  ;;  %v435_v7 = vrot.slane %v433_v58, 7 }
  0x42   : > { %329 = vst.msk [vmem:[#allocation3 + $0x54] sm:$0xf] %vm306_vm2, %v6388_v1  ;;  %330 = vst.msk [vmem:[#allocation3 + $0x58] sm:$0xf] %vm306_vm2, %v6388_v1  ;;  %v724_v5 = vld [vmem:[#allocation2 + $0x44] sm:$0x1] }
  0x43   : > { %332 = vst.msk [vmem:[#allocation3 + $0x60] sm:$0xf] %vm306_vm2, %v6388_v1  ;;  %333 = vst.msk [vmem:[#allocation3 + $0x64] sm:$0xf] %vm306_vm2, %v6388_v1  ;;  %v348_v6 = vld [vmem:[%s6512_s26 + $0x28] sm:$0xf]  ;;  %v438_v19 = vor.u32 %v436_v62, %v435_v7 }
  0x44   : > { %335 = vst.msk [vmem:[#allocation3 + $0x6c] sm:$0xf] %vm306_vm2, %v6388_v1  ;;  %336 = vst.msk [vmem:[#allocation3 + $0x70] sm:$0xf] %vm306_vm2, %v6388_v1  ;;  %v444_v8 = vrot.slane %v442_v63, 7  ;;  %v450_v10 = vshrl.u32 %v347_v59, 16 }
  0x45   : > { %310 = vst.msk [vmem:[#allocation3 + $0x8] sm:$0x1] %vm309_vm3, %v6388_v1  ;;  %313 = vst.msk [vmem:[#allocation3 + $0x14] sm:$0x1] %vm309_vm3, %v6388_v1  ;;  %v453_v11 = vshll.u32 %v347_v59, 16  ;;  %v462_v17 = vshll.u32 %v348_v6, 16 }
  0x46   : > { %316 = vst.msk [vmem:[#allocation3 + $0x20] sm:$0x1] %vm309_vm3, %v6388_v1  ;;  %319 = vst.msk [vmem:[#allocation3 + $0x2c] sm:$0x1] %vm309_vm3, %v6388_v1  ;;  %v349_v12 = vld [vmem:[%s6512_s26 + $0x2c] sm:$0xf]  ;;  %v447_v22 = vor.u32 %v445_v0, %v444_v8 }
  0x47   : > { %322 = vst.msk [vmem:[#allocation3 + $0x38] sm:$0x1] %vm309_vm3, %v6388_v1  ;;  %325 = vst.msk [vmem:[#allocation3 + $0x44] sm:$0x1] %vm309_vm3, %v6388_v1  ;;  %v467_v18 = vshrl.u32 %v349_v12, 16  ;;  %v440_v21 = vrot.slane %v435_v7, 4 }
  0x48   : > { %328 = vst.msk [vmem:[#allocation3 + $0x50] sm:$0x1] %vm309_vm3, %v6388_v1  ;;  %331 = vst.msk [vmem:[#allocation3 + $0x5c] sm:$0x1] %vm309_vm3, %v6388_v1  ;;  %v448_v23 = vrot.slane %v444_v8, 4  ;;  %v470_v29 = vshll.u32 %v349_v12, 16 }
  0x49   : > { %334 = vst.msk [vmem:[#allocation3 + $0x68] sm:$0x1] %vm309_vm3, %v6388_v1  ;;  %337 = vst.msk [vmem:[#allocation3 + $0x74] sm:$0x1] %vm309_vm3, %v6388_v1  ;;  %v350_v24 = vld [vmem:[%s6512_s26 + $0x30] sm:$0xf] }
  0x4a   : > { %vm6698_vm7 = vmand %vm244_vm0, %vm695_vm4  ;;  %v469_v28 = vrot.slane %v467_v18, 7  ;;  %v479_v45 = vshll.u32 %v350_v24, 16  ;;  %v352_v46 = vld [vmem:[%s6512_s26 + $0x38] sm:$0xf]  ;;  %v745_v57 = vld [vmem:[#allocation2 + $0x68] sm:$0x1] }
  0x4b   : > { %vm6705_vm8 = vmor %vm370_vm5, %vm371_vm6  ;;  %v698_v34 = vsel %vm6698_vm7, %v379_v14, %v697_v30  ;;  %v707_v39 = vsel %vm6698_vm7, %v396_v32, %v706_v33  ;;  %v714_v60 = vsel %vm6698_vm7, %v413_v51, %v713_v44  ;;  %v721_v13 = vsel %vm6698_vm7, %v430_v3, %v720_v61  ;;  %v727_v14 = vld [vmem:[#allocation2 + $0x48] sm:$0xf]  ;;  %v734_v33 = vld [vmem:[#allocation2 + $0x54] sm:$0xf] }
  0x4c   : > { %vm6712_vm9 = vmand %vm247_vm1, %vm370_vm5  ;;  %v388_v35 = vsel %vm6705_vm8, %v380_v16, %v387_v25  ;;  %699 = vst [vmem:[#allocation2 + $0x18] sm:$0xf] %v698_v34  ;;  %v405_v49 = vsel %vm6705_vm8, %v397_v37, %v404_v40  ;;  %v422_v1 = vsel %vm6705_vm8, %v414_v52, %v421_v55  ;;  %v459_v16 = vshrl.u32 %v348_v6, 16  ;;  %v738_v40 = vld [vmem:[#allocation2 + $0x5c] sm:$0x1] }
  0x4d   : > { %v704_v36 = vsel %vm6712_vm9, %v389_v26, %v703_v31  ;;  %700 = vst.msk [vmem:[#allocation2 + $0x1c] sm:$0xf] %vm244_vm0, %v388_v35  ;;  %708 = vst [vmem:[#allocation2 + $0x24] sm:$0xf] %v707_v39  ;;  %v711_v50 = vsel %vm6712_vm9, %v406_v41, %v710_v38  ;;  %v718_v2 = vsel %vm6712_vm9, %v423_v56, %v717_v53  ;;  %v452_v25 = vrot.slane %v450_v10, 7 }
  0x4e   : > { %705 = vst [vmem:[#allocation2 + $0x20] sm:$0x1] %v704_v36  ;;  %709 = vst.msk [vmem:[#allocation2 + $0x28] sm:$0xf] %vm244_vm0, %v405_v49  ;;  %v731_v26 = vld [vmem:[#allocation2 + $0x50] sm:$0x1]  ;;  %v439_v30 = vsel %vm6705_vm8, %v431_v4, %v438_v19  ;;  %v725_v31 = vsel %vm6712_vm9, %v440_v21, %v724_v5  ;;  %v728_v32 = vsel %vm6698_vm7, %v447_v22, %v727_v14 }
  0x4f   : > { %712 = vst [vmem:[#allocation2 + $0x2c] sm:$0x1] %v711_v50  ;;  %715 = vst [vmem:[#allocation2 + $0x30] sm:$0xf] %v714_v60  ;;  %v461_v27 = vrot.slane %v459_v16, 7  ;;  %v476_v34 = vshrl.u32 %v350_v24, 16  ;;  %v455_v36 = vor.u32 %v453_v11, %v452_v25  ;;  %v472_v42 = vor.u32 %v470_v29, %v469_v28 }
  0x50   : > { %716 = vst.msk [vmem:[#allocation2 + $0x34] sm:$0xf] %vm244_vm0, %v422_v1  ;;  %719 = vst [vmem:[#allocation2 + $0x38] sm:$0x1] %v718_v2  ;;  %v351_v35 = vld [vmem:[%s6512_s26 + $0x34] sm:$0xf] }
  0x51   : > { %722 = vst [vmem:[#allocation2 + $0x3c] sm:$0xf] %v721_v13  ;;  %723 = vst.msk [vmem:[#allocation2 + $0x40] sm:$0xf] %vm244_vm0, %v439_v30  ;;  %v457_v37 = vrot.slane %v452_v25, 4  ;;  %v464_v38 = vor.u32 %v462_v17, %v461_v27  ;;  %v465_v39 = vrot.slane %v461_v27, 4  ;;  %v456_v47 = vsel %vm6705_vm8, %v448_v23, %v455_v36 }
  0x52   : > { %726 = vst [vmem:[#allocation2 + $0x44] sm:$0x1] %v725_v31  ;;  %729 = vst [vmem:[#allocation2 + $0x48] sm:$0xf] %v728_v32  ;;  %v741_v41 = vld [vmem:[#allocation2 + $0x60] sm:$0xf] }
  0x53   : > { %v474_v43 = vrot.slane %v469_v28, 4  ;;  %v478_v44 = vrot.slane %v476_v34, 7  ;;  %v732_v48 = vsel %vm6712_vm9, %v457_v37, %v731_v26  ;;  %v735_v49 = vsel %vm6698_vm7, %v464_v38, %v734_v33  ;;  %v353_v51 = vld [vmem:[%s6512_s26 + $0x3c] sm:$0xf]  ;;  %v354_v52 = vld [vmem:[%s6512_s26 + $0x40] sm:$0xf] }
  0x54   : > { %v484_v50 = vshrl.u32 %v351_v35, 16  ;;  %730 = vst.msk [vmem:[#allocation2 + $0x4c] sm:$0xf] %vm244_vm0, %v456_v47  ;;  %733 = vst [vmem:[#allocation2 + $0x50] sm:$0x1] %v732_v48  ;;  %v473_v53 = vsel %vm6705_vm8, %v465_v39, %v472_v42  ;;  %v487_v59 = vshll.u32 %v351_v35, 16 }
  0x55   : > { %736 = vst [vmem:[#allocation2 + $0x54] sm:$0xf] %v735_v49  ;;  %v739_v54 = vsel %vm6712_vm9, %v474_v43, %v738_v40  ;;  %v481_v55 = vor.u32 %v479_v45, %v478_v44  ;;  %v482_v56 = vrot.slane %v478_v44, 4  ;;  %737 = vst.msk [vmem:[#allocation2 + $0x58] sm:$0xf] %vm244_vm0, %v473_v53  ;;  %v493_v60 = vshrl.u32 %v352_v46, 16 }
  0x56   : > { %740 = vst [vmem:[#allocation2 + $0x5c] sm:$0x1] %v739_v54  ;;  %v486_v58 = vrot.slane %v484_v50, 7  ;;  %v496_v61 = vshll.u32 %v352_v46, 16  ;;  %v355_v62 = vld [vmem:[%s6512_s26 + $0x44] sm:$0xf] }
  0x57   : > { %v742_v63 = vsel %vm6698_vm7, %v481_v55, %v741_v41  ;;  %v748_v0 = vld [vmem:[#allocation2 + $0x6c] sm:$0xf]  ;;  %v501_v1 = vshrl.u32 %v353_v51, 16  ;;  %v504_v2 = vshll.u32 %v353_v51, 16  ;;  %v510_v3 = vshrl.u32 %v354_v52, 16 }
  0x58   : > { %743 = vst [vmem:[#allocation2 + $0x60] sm:$0xf] %v742_v63  ;;  %v489_v4 = vor.u32 %v487_v59, %v486_v58  ;;  %v491_v5 = vrot.slane %v486_v58, 4  ;;  %v495_v6 = vrot.slane %v493_v60, 7  ;;  %v752_v7 = vld [vmem:[#allocation2 + $0x74] sm:$0x1] }
  0x59   : > { %v513_v8 = vshll.u32 %v354_v52, 16  ;;  %v503_v10 = vrot.slane %v501_v1, 7  ;;  %v512_v11 = vrot.slane %v510_v3, 7  ;;  %v518_v12 = vshrl.u32 %v355_v62, 16  ;;  %v356_v14 = vld [vmem:[%s6512_s26 + $0x48] sm:$0xf] }
  0x5a   : > { %v521_v13 = vshll.u32 %v355_v62, 16  ;;  %v490_v16 = vsel %vm6705_vm8, %v482_v56, %v489_v4  ;;  %v746_v17 = vsel %vm6712_vm9, %v491_v5, %v745_v57  ;;  %v498_v18 = vor.u32 %v496_v61, %v495_v6  ;;  %v755_v21 = vld [vmem:[#allocation2 + $0x78] sm:$0xf]  ;;  %v357_v22 = vld [vmem:[%s6512_s26 + $0x4c] sm:$0xf] }
  0x5b   : > { %v499_v19 = vrot.slane %v495_v6, 4  ;;  %744 = vst.msk [vmem:[#allocation2 + $0x64] sm:$0xf] %vm244_vm0, %v490_v16  ;;  %747 = vst [vmem:[#allocation2 + $0x68] sm:$0x1] %v746_v17  ;;  %v506_v23 = vor.u32 %v504_v2, %v503_v10  ;;  %v508_v24 = vrot.slane %v503_v10, 4  ;;  %v515_v25 = vor.u32 %v513_v8, %v512_v11 }
  0x5c   : > { %v516_v26 = vrot.slane %v512_v11, 4  ;;  %v358_v27 = vld [vmem:[%s6512_s26 + $0x50] sm:$0xf]  ;;  %v749_v28 = vsel %vm6698_vm7, %v498_v18, %v748_v0  ;;  %v520_v29 = vrot.slane %v518_v12, 7  ;;  %v527_v30 = vshrl.u32 %v356_v14, 16 }
  0x5d   : > { %v530_v31 = vshll.u32 %v356_v14, 16  ;;  %v359_v32 = vld [vmem:[%s6512_s26 + $0x54] sm:$0xf]  ;;  %750 = vst [vmem:[#allocation2 + $0x6c] sm:$0xf] %v749_v28  ;;  %v507_v33 = vsel %vm6705_vm8, %v499_v19, %v506_v23  ;;  %v753_v34 = vsel %vm6712_vm9, %v508_v24, %v752_v7  ;;  %v756_v35 = vsel %vm6698_vm7, %v515_v25, %v755_v21 }
  0x5e   : > { %v759_v36 = vld [vmem:[#allocation2 + $0x80] sm:$0x1]  ;;  %v535_v37 = vshrl.u32 %v357_v22, 16  ;;  %751 = vst.msk [vmem:[#allocation2 + $0x70] sm:$0xf] %vm244_vm0, %v507_v33  ;;  %v523_v38 = vor.u32 %v521_v13, %v520_v29  ;;  %v525_v39 = vrot.slane %v520_v29, 4 }
  0x5f   : > { %754 = vst [vmem:[#allocation2 + $0x74] sm:$0x1] %v753_v34  ;;  %757 = vst [vmem:[#allocation2 + $0x78] sm:$0xf] %v756_v35  ;;  %v529_v40 = vrot.slane %v527_v30, 7  ;;  %v538_v42 = vshll.u32 %v357_v22, 16 }
  0x60   : > { %v762_v41 = vld [vmem:[#allocation2 + $0x84] sm:$0xf]  ;;  %v537_v43 = vrot.slane %v535_v37, 7  ;;  %v544_v44 = vshrl.u32 %v358_v27, 16  ;;  %v547_v45 = vshll.u32 %v358_v27, 16  ;;  %v552_v46 = vshrl.u32 %v359_v32, 16 }
  0x61   : > { %v360_v47 = vld [vmem:[%s6512_s26 + $0x58] sm:$0xf]  ;;  %v524_v48 = vsel %vm6705_vm8, %v516_v26, %v523_v38  ;;  %v760_v49 = vsel %vm6712_vm9, %v525_v39, %v759_v36  ;;  %v532_v50 = vor.u32 %v530_v31, %v529_v40  ;;  %v533_v51 = vrot.slane %v529_v40, 4  ;;  %v766_v52 = vld [vmem:[#allocation2 + $0x8c] sm:$0x1] }
  0x62   : > { %v769_v53 = vld [vmem:[#allocation2 + $0x90] sm:$0xf]  ;;  %758 = vst.msk [vmem:[#allocation2 + $0x7c] sm:$0xf] %vm244_vm0, %v524_v48  ;;  %761 = vst [vmem:[#allocation2 + $0x80] sm:$0x1] %v760_v49  ;;  %v540_v54 = vor.u32 %v538_v42, %v537_v43 }
  0x63   : > { %v542_v55 = vrot.slane %v537_v43, 4  ;;  %v546_v56 = vrot.slane %v544_v44, 7  ;;  %v554_v57 = vrot.slane %v552_v46, 7  ;;  %v773_v58 = vld [vmem:[#allocation2 + $0x98] sm:$0x1]  ;;  %v763_v60 = vsel %vm6698_vm7, %v532_v50, %v762_v41 }
  0x64   : > { %v361_v59 = vld [vmem:[%s6512_s26 + $0x5c] sm:$0xf]  ;;  %v555_v61 = vshll.u32 %v359_v32, 16  ;;  %v561_v62 = vshrl.u32 %v360_v47, 16  ;;  %v564_v63 = vshll.u32 %v360_v47, 16  ;;  %v541_v1 = vsel %vm6705_vm8, %v533_v51, %v540_v54 }
  0x65   : > { %v362_v0 = vld [vmem:[%s6512_s26 + $0x60] sm:$0xf]  ;;  %764 = vst [vmem:[#allocation2 + $0x84] sm:$0xf] %v763_v60  ;;  %v767_v2 = vsel %vm6712_vm9, %v542_v55, %v766_v52  ;;  %v549_v3 = vor.u32 %v547_v45, %v546_v56  ;;  %v550_v4 = vrot.slane %v546_v56, 4  ;;  %v559_v8 = vrot.slane %v554_v57, 4 }
  0x66   : > { %v776_v5 = vld [vmem:[#allocation2 + $0x9c] sm:$0xf]  ;;  %v363_v6 = vld [vmem:[%s6512_s26 + $0x64] sm:$0xf]  ;;  %765 = vst.msk [vmem:[#allocation2 + $0x88] sm:$0xf] %vm244_vm0, %v541_v1  ;;  %v557_v7 = vor.u32 %v555_v61, %v554_v57 }
  0x67   : > { %768 = vst [vmem:[#allocation2 + $0x8c] sm:$0x1] %v767_v2  ;;  %v563_v10 = vrot.slane %v561_v62, 7  ;;  %v569_v11 = vshrl.u32 %v361_v59, 16  ;;  %v364_v12 = vld [vmem:[%s6512_s26 + $0x68] sm:$0xf]  ;;  %v770_v13 = vsel %vm6698_vm7, %v549_v3, %v769_v53  ;;  %v774_v21 = vsel %vm6712_vm9, %v559_v8, %v773_v58 }
  0x68   : > { %v572_v14 = vshll.u32 %v361_v59, 16  ;;  %v578_v16 = vshrl.u32 %v362_v0, 16  ;;  %v581_v17 = vshll.u32 %v362_v0, 16  ;;  %v365_v18 = vld [vmem:[%s6512_s26 + $0x6c] sm:$0xf]  ;;  %v558_v19 = vsel %vm6705_vm8, %v550_v4, %v557_v7 }
  0x69   : > { %771 = vst [vmem:[#allocation2 + $0x90] sm:$0xf] %v770_v13  ;;  %v566_v22 = vor.u32 %v564_v63, %v563_v10  ;;  %v567_v23 = vrot.slane %v563_v10, 4  ;;  %v780_v24 = vld [vmem:[#allocation2 + $0xa4] sm:$0x1]  ;;  %v571_v25 = vrot.slane %v569_v11, 7 }
  0x6a   : > { %772 = vst.msk [vmem:[#allocation2 + $0x94] sm:$0xf] %vm244_vm0, %v558_v19  ;;  %775 = vst [vmem:[#allocation2 + $0x98] sm:$0x1] %v774_v21  ;;  %v580_v26 = vrot.slane %v578_v16, 7  ;;  %v586_v28 = vshrl.u32 %v363_v6, 16 }
  0x6b   : > { %v783_v27 = vld [vmem:[#allocation2 + $0xa8] sm:$0xf]  ;;  %v589_v29 = vshll.u32 %v363_v6, 16  ;;  %v777_v30 = vsel %vm6698_vm7, %v566_v22, %v776_v5  ;;  %v595_v31 = vshrl.u32 %v364_v12, 16  ;;  %v598_v32 = vshll.u32 %v364_v12, 16 }
  0x6c   : > { %v603_v33 = vshrl.u32 %v365_v18, 16  ;;  %v366_v34 = vld [vmem:[%s6512_s26 + $0x70] sm:$0xf]  ;;  %778 = vst [vmem:[#allocation2 + $0x9c] sm:$0xf] %v777_v30  ;;  %v574_v35 = vor.u32 %v572_v14, %v571_v25  ;;  %v576_v36 = vrot.slane %v571_v25, 4  ;;  %v583_v37 = vor.u32 %v581_v17, %v580_v26 }
  0x6d   : > { %v584_v38 = vrot.slane %v580_v26, 4  ;;  %v588_v39 = vrot.slane %v586_v28, 7  ;;  %v787_v40 = vld [vmem:[#allocation2 + $0xb0] sm:$0x1]  ;;  %v597_v41 = vrot.slane %v595_v31, 7  ;;  %v606_v43 = vshll.u32 %v365_v18, 16 }
  0x6e   : > { %v605_v42 = vrot.slane %v603_v33, 7  ;;  %v575_v44 = vsel %vm6705_vm8, %v567_v23, %v574_v35  ;;  %v781_v45 = vsel %vm6712_vm9, %v576_v36, %v780_v24  ;;  %v784_v46 = vsel %vm6698_vm7, %v583_v37, %v783_v27  ;;  %v790_v47 = vld [vmem:[#allocation2 + $0xb4] sm:$0xf]  ;;  %v794_v54 = vld [vmem:[#allocation2 + $0xbc] sm:$0x1] }
  0x6f   : > { %v612_v48 = vshrl.u32 %v366_v34, 16  ;;  %v367_v49 = vld [vmem:[%s6512_s26 + $0x74] sm:$0xf]  ;;  %779 = vst.msk [vmem:[#allocation2 + $0xa0] sm:$0xf] %vm244_vm0, %v575_v44  ;;  %v591_v50 = vor.u32 %v589_v29, %v588_v39  ;;  %v593_v51 = vrot.slane %v588_v39, 4  ;;  %v600_v52 = vor.u32 %v598_v32, %v597_v41 }
  0x70   : > { %782 = vst [vmem:[#allocation2 + $0xa4] sm:$0x1] %v781_v45  ;;  %785 = vst [vmem:[#allocation2 + $0xa8] sm:$0xf] %v784_v46  ;;  %v601_v53 = vrot.slane %v597_v41, 4  ;;  %v608_v55 = vor.u32 %v606_v43, %v605_v42  ;;  %v610_v56 = vrot.slane %v605_v42, 4 }
  0x71   : > { %v614_v57 = vrot.slane %v612_v48, 7  ;;  %v615_v58 = vshll.u32 %v366_v34, 16  ;;  %v368_v59 = vld [vmem:[%s6512_s26 + $0x78] sm:$0xf]  ;;  %v592_v60 = vsel %vm6705_vm8, %v584_v38, %v591_v50  ;;  %v788_v61 = vsel %vm6712_vm9, %v593_v51, %v787_v40  ;;  %v797_v63 = vld [vmem:[#allocation2 + $0xc0] sm:$0xf] }
  0x72   : > { %v791_v62 = vsel %vm6698_vm7, %v600_v52, %v790_v47  ;;  %v620_v0 = vshrl.u32 %v367_v49, 16  ;;  %v369_v1 = vld [vmem:[%s6512_s26 + $0x7c] sm:$0xf]  ;;  %786 = vst.msk [vmem:[#allocation2 + $0xac] sm:$0xf] %vm244_vm0, %v592_v60  ;;  %v609_v2 = vsel %vm6705_vm8, %v601_v53, %v608_v55  ;;  %v795_v3 = vsel %vm6712_vm9, %v610_v56, %v794_v54 }
  0x73   : > { %789 = vst [vmem:[#allocation2 + $0xb0] sm:$0x1] %v788_v61  ;;  %792 = vst [vmem:[#allocation2 + $0xb4] sm:$0xf] %v791_v62  ;;  %v617_v4 = vor.u32 %v615_v58, %v614_v57  ;;  %v618_v5 = vrot.slane %v614_v57, 4  ;;  %v623_v7 = vshll.u32 %v367_v49, 16 }
  0x74   : > { %793 = vst.msk [vmem:[#allocation2 + $0xb8] sm:$0xf] %vm244_vm0, %v609_v2  ;;  %796 = vst [vmem:[#allocation2 + $0xbc] sm:$0x1] %v795_v3  ;;  %v622_v6 = vrot.slane %v620_v0, 7  ;;  %v629_v8 = vshrl.u32 %v368_v59, 16 }
  0x75   : > { %v632_v10 = vshll.u32 %v368_v59, 16  ;;  %v798_v11 = vsel %vm6698_vm7, %v617_v4, %v797_v63  ;;  %v801_v12 = vld [vmem:[#allocation2 + $0xc8] sm:$0x1]  ;;  %v637_v13 = vshrl.u32 %v369_v1, 16  ;;  %v640_v14 = vshll.u32 %v369_v1, 16 }
  0x76   : > { %799 = vst [vmem:[#allocation2 + $0xc0] sm:$0xf] %v798_v11  ;;  %v625_v16 = vor.u32 %v623_v7, %v622_v6  ;;  %v627_v17 = vrot.slane %v622_v6, 4  ;;  %v631_v18 = vrot.slane %v629_v8, 7  ;;  %v804_v19 = vld [vmem:[#allocation2 + $0xcc] sm:$0xf] }
  0x77   : > { %v639_v21 = vrot.slane %v637_v13, 7  ;;  %v808_v26 = vld [vmem:[#allocation2 + $0xd4] sm:$0x1] }
  0x78   : > { %v626_v22 = vsel %vm6705_vm8, %v618_v5, %v625_v16  ;;  %v802_v23 = vsel %vm6712_vm9, %v627_v17, %v801_v12  ;;  %v634_v24 = vor.u32 %v632_v10, %v631_v18  ;;  %v635_v25 = vrot.slane %v631_v18, 4 }
  0x79   : > { %800 = vst.msk [vmem:[#allocation2 + $0xc4] sm:$0xf] %vm244_vm0, %v626_v22  ;;  %803 = vst [vmem:[#allocation2 + $0xc8] sm:$0x1] %v802_v23  ;;  %v642_v27 = vor.u32 %v640_v14, %v639_v21  ;;  %v644_v28 = vrot.slane %v639_v21, 4 }
  0x7a   : > { %v805_v29 = vsel %vm6698_vm7, %v634_v24, %v804_v19 }
  0x7b   : > { %806 = vst [vmem:[#allocation2 + $0xcc] sm:$0xf] %v805_v29  ;;  %v643_v30 = vsel %vm6705_vm8, %v635_v25, %v642_v27  ;;  %v809_v31 = vsel %vm6712_vm9, %v644_v28, %v808_v26 }
  0x7c   : > { %807 = vst.msk [vmem:[#allocation2 + $0xd0] sm:$0xf] %vm244_vm0, %v643_v30  ;;  %810 = vst [vmem:[#allocation2 + $0xd4] sm:$0x1] %v809_v31 }
  0x7d PF: > { %s5996_s30 = smul.u32 96, %s6370_s21  ;;  %vm1269_vm10 = vcmask 1042432   ;;  %vm1270_vm11 = vcmask 1046532   ;;  %vm885_vm12 = vsmask.f32 3328  ;;  %s8769_s9 = smov 8  }
  0x7e   : > { %vm6855_vm13 = vmor %vm1269_vm10, %vm1270_vm11  ;;  %vm886_vm14 = vsmask.f32 7440  ;;  %s6390_s10 = smov 4   ;;  %s8767_s13 = smov 12   ;;  %vm834_vm0 = vcmask 27648   ;;  %vm2925_vm1 = vcmask 1041408  }
  0x7f   : > { %s6859_s8 = scalar_lea.vmem [#allocation2], %s5996_s30  ;;  %vm6886_vm15 = vmor %vm885_vm12, %vm886_vm14  ;;  %s6392_s14 = smov 16   ;;  %vm1188_vm2 = vcmask 60448   ;;  %vm1402_vm3 = vcmask 93248   ;;  %vm1527_vm4 = vcmask 126048   ;;  %vm1878_vm5 = vcmask 158848  }
  0x80   : > { %s6393_s15 = smov 20   ;;  %s6394_s16 = smov 24   ;;  %vm2089_vm6 = vcmask 191648   ;;  %vm2214_vm7 = vcmask 224448   ;;  %vm2565_vm8 = vcmask 257248   ;;  %vm2776_vm9 = vcmask 290048  }
  0x81   : > { %s6395_s17 = smov 28   ;;  %s6396_s26 = smov 32   ;;  %vm8771_vm10 = vcmask 293888  }
  0x82   : > { %s8785_s30 = smov 12  }
  0x83   : > { %v1209_v9 = vld [vmem:[%s6859_s8] sm:$0xe]  ;;  %v1210_v15 = vld [vmem:[%s6859_s8 + $0x4] sm:$0xf]  ;;  %v1211_v20 = vld [vmem:[%s6859_s8 + $0x8] sm:$0x1] }
  0x84   : > { %v5673_v33 = vrot.slane %v1209_v9, 9  ;;  %v1274_v34 = vrot.slane %v1210_v15, 5  ;;  %v1277_v35 = vrot.slane %v1211_v20, 5  ;;  %v1212_v36 = vld [vmem:[%s6859_s8 + $0xc] sm:$0xe] }
  0x85   : > { %v1213_v37 = vld [vmem:[%s6859_s8 + $0x10] sm:$0xf]  ;;  %v5674_v38 = vrot.slane %v1212_v36, 9  ;;  %v1214_v39 = vld [vmem:[%s6859_s8 + $0x14] sm:$0x1] }
  0x86   : > { %v1275_v40 = vsel %vm6855_vm13, %v5673_v33, %v1274_v34  ;;  %v1276_v41 = vrot.slane %v1274_v34, 4  ;;  %v1281_v42 = vrot.slane %v1213_v37, 5  ;;  %v1284_v43 = vrot.slane %v1214_v39, 5  ;;  %v855_v44 = vld [vmem:[%s6859_s8] sm:$0xf] }
  0x87   : > { %1342 = vrot.lane.b32.xlu0 %v1275_v40, %s8769_s9  ;;  %v856_v45 = vld [vmem:[%s6859_s8 + $0x4] sm:$0xf]  ;;  %v889_v46 = vshrl.u32 %v855_v44, 16  ;;  %v892_v47 = vshll.u32 %v855_v44, 16  ;;  %v858_v48 = vld [vmem:[%s6859_s8 + $0xc] sm:$0xf] }
  0x88   : > { %v1278_v49 = vsel %vm6855_vm13, %v1276_v41, %v1277_v35  ;;  %v1282_v50 = vsel %vm6855_vm13, %v5674_v38, %v1281_v42  ;;  %v1283_v51 = vrot.slane %v1281_v42, 4  ;;  %v898_v52 = vshll.u32 %v856_v45, 16  ;;  %v859_v53 = vld [vmem:[%s6859_s8 + $0x10] sm:$0xf]  ;;  %v857_v54 = vld [vmem:[%s6859_s8 + $0x8] sm:$0x1] }
  0x89   : > { %1344 = vrot.lane.b32.xlu1 %v1278_v49, %s8769_s9  ;;  %v891_v55 = vrot.slane %v889_v46, 4  ;;  %v894_v56 = vrot.slane %v892_v47, 5  ;;  %v902_v57 = vshrl.u32 %v856_v45, 16  ;;  %v913_v58 = vshrl.u32 %v858_v48, 16  ;;  %v860_v59 = vld [vmem:[%s6859_s8 + $0x14] sm:$0x1] }
  0x8a   : > { %v1285_v60 = vsel %vm6855_vm13, %v1283_v51, %v1284_v43  ;;  %v900_v61 = vrot.slane %v898_v52, 5  ;;  %v916_v62 = vshll.u32 %v858_v48, 16  ;;  %v922_v63 = vshll.u32 %v859_v53, 16  ;;  %v5706_v13 = vld [vmem:[%s6859_s8 + $0x10] sm:$0xf] }
  0x8b   : > { %1346 = vrot.lane.b32.xlu0 %v1282_v50, %s8769_s9  ;;  %v895_v0 = vor.u32 %v894_v56, %v891_v55  ;;  %v915_v1 = vrot.slane %v913_v58, 4  ;;  %v926_v2 = vshrl.u32 %v859_v53, 16  ;;  %v904_v3 = vrot.slane %v902_v57, 4  ;;  %v5705_v23 = vld [vmem:[%s6859_s8 + $0xc] sm:$0xf] }
  0x8c   : > { %v918_v5 = vrot.slane %v916_v62, 5  ;;  %v924_v6 = vrot.slane %v922_v63, 5  ;;  %v908_v7 = vshll.u32 %v857_v54, 16  ;;  %v932_v8 = vshll.u32 %v860_v59, 16  ;;  %v5709_v27 = vld [vmem:[%s6859_s8 + $0x1c] sm:$0xf] }
  0x8d   : > { %1348 = vrot.lane.b32.xlu1 %v1285_v60, %s8769_s9  ;;  %v896_v10 = vrot.slane %v895_v0, 4  ;;  %v905_v11 = vor.u32 %v904_v3, %v900_v61  ;;  %v928_v12 = vrot.slane %v926_v2, 4  ;;  %v1588_v17 = vshll.u32 %v5706_v13, 16  ;;  %v5708_v31 = vld [vmem:[%s6859_s8 + $0x18] sm:$0xf] }
  0x8e   : > { %v919_v14 = vor.u32 %v918_v5, %v915_v1  ;;  %v910_v16 = vrot.slane %v908_v7, 5  ;;  %v1592_v22 = vshrl.u32 %v5706_v13, 16  ;;  %v934_v25 = vrot.slane %v932_v8, 5  ;;  %v5685_v40 = vld [vmem:[%s6859_s8 + $0xc] sm:$0xf] }
  0x8f   : > { %v901_v18 = vsel %vm6886_vm15, %v896_v10, %v900_v61  ;;  %v906_v19 = vrot.slane %v905_v11, 4  ;;  %v929_v21 = vor.u32 %v928_v12, %v924_v6  ;;  %v1579_v26 = vshrl.u32 %v5705_v23, 16  ;;  %v5707_v41 = vld [vmem:[%s6859_s8 + $0x14] sm:$0x1]  ;;  %v5686_v45 = vld [vmem:[%s6859_s8 + $0x10] sm:$0xf] }
  0x90   : > { %1128 = vrot.lane.b32.xlu0 %v901_v18, %s6390_s10  ;;  %v920_v24 = vrot.slane %v919_v14, 4  ;;  %v1582_v30 = vshll.u32 %v5705_v23, 16  ;;  %v1590_v20 = vrot.slane %v1588_v17, 5  ;;  %v1594_v33 = vrot.slane %v1592_v22, 4  ;;  %v5687_v50 = vld [vmem:[%s6859_s8 + $0x18] sm:$0xf] }
  0x91   : > { %v911_v28 = vsel %vm6886_vm15, %v906_v19, %v910_v16  ;;  %v930_v29 = vrot.slane %v929_v21, 4  ;;  %v1581_v15 = vrot.slane %v1579_v26, 4  ;;  %v1612_v35 = vshll.u32 %v5709_v27, 16  ;;  %v5710_v52 = vld [vmem:[%s6859_s8 + $0x20] sm:$0x1] }
  0x92   : > { %v925_v9 = vsel %vm6886_vm15, %v920_v24, %v924_v6  ;;  %v1584_v34 = vrot.slane %v1582_v30, 5  ;;  %v1616_v37 = vshrl.u32 %v5709_v27, 16  ;;  %v1603_v38 = vshrl.u32 %v5708_v31, 16  ;;  %v5688_v54 = vld [vmem:[%s6859_s8 + $0x1c] sm:$0xf] }
  0x93   : > { %1132 = vrot.lane.b32.xlu1 %v925_v9, %s6390_s10  ;;  %v935_v36 = vsel %vm6886_vm15, %v930_v29, %v934_v25  ;;  %v1606_v39 = vshll.u32 %v5708_v31, 16  ;;  %v1595_v46 = vor.u32 %v1594_v33, %v1590_v20  ;;  %v1598_v47 = vshll.u32 %v5707_v41, 16  ;;  %v5736_v61 = vld [vmem:[%s6859_s8 + $0x10] sm:$0xf]  ;;  %v5735_v62 = vld [vmem:[%s6859_s8 + $0xc] sm:$0xe] }
  0x94   : > { %1130 = vrot.lane.b32.xlu0 %v911_v28, %s6390_s10  ;;  %v1585_v42 = vor.u32 %v1584_v34, %v1581_v15  ;;  %v1605_v43 = vrot.slane %v1603_v38, 4  ;;  %v1614_v48 = vrot.slane %v1612_v35, 5  ;;  %v1618_v49 = vrot.slane %v1616_v37, 4  ;;  %v5739_v3 = vld [vmem:[%s6859_s8 + $0x1c] sm:$0xf] }
  0x95   : > { %v1608_v44 = vrot.slane %v1606_v39, 5  ;;  %v1596_v55 = vrot.slane %v1595_v46, 4  ;;  %v1600_v56 = vrot.slane %v1598_v47, 5  ;;  %v1622_v58 = vshll.u32 %v5710_v52, 16  ;;  %v5737_v6 = vld [vmem:[%s6859_s8 + $0x14] sm:$0x1] }
  0x96   : > { %v1586_v51 = vrot.slane %v1585_v42, 4  ;;  %v1619_v57 = vor.u32 %v1618_v49, %v1614_v48  ;;  %v1961_v2 = vrot.slane %v5736_v61, 5  ;;  %v5765_v7 = vrot.slane %v5735_v62, 9  ;;  %v5738_v8 = vld [vmem:[%s6859_s8 + $0x18] sm:$0xe] }
  0x97   : > { %1134 = vrot.lane.b32.xlu1 %v935_v36, %s6390_s10  ;;  %v1609_v53 = vor.u32 %v1608_v44, %v1605_v43  ;;  %v1601_v63 = vsel %vm6886_vm15, %v1596_v55, %v1600_v56  ;;  %v1624_v1 = vrot.slane %v1622_v58, 5  ;;  %v5797_v10 = vld [vmem:[%s6859_s8 + $0x18] sm:$0xf]  ;;  %v1968_v11 = vrot.slane %v5739_v3, 5  ;;  %v5740_v16 = vld [vmem:[%s6859_s8 + $0x20] sm:$0x1] }
  0x98   : > { %1467 = vrot.lane.b32.xlu0 %v5685_v40, %s8767_s13  ;;  %v1591_v59 = vsel %vm6886_vm15, %v1586_v51, %v1590_v20  ;;  %v1620_v0 = vrot.slane %v1619_v57, 4  ;;  %v1963_v13 = vrot.slane %v1961_v2, 4  ;;  %v1964_v14 = vrot.slane %v5737_v6, 5  ;;  %v5798_v19 = vld [vmem:[%s6859_s8 + $0x1c] sm:$0xf] }
  0x99   : > { %v1610_v60 = vrot.slane %v1609_v53, 4  ;;  %v5766_v17 = vrot.slane %v5738_v8, 9  ;;  %v1962_v18 = vsel %vm6855_vm13, %v5765_v7, %v1961_v2  ;;  %v2266_v21 = vshrl.u32 %v5797_v10, 16  ;;  %v5800_v23 = vld [vmem:[%s6859_s8 + $0x24] sm:$0xf] }
  0x9a   : > { %v1625_v12 = vsel %vm6886_vm15, %v1620_v0, %v1624_v1  ;;  %v2269_v22 = vshll.u32 %v5797_v10, 16  ;;  %v1970_v24 = vrot.slane %v1968_v11, 4  ;;  %v1971_v25 = vrot.slane %v5740_v16, 5  ;;  %v5801_v9 = vld [vmem:[%s6859_s8 + $0x28] sm:$0xf] }
  0x9b   : > { %1469 = vrot.lane.b32.xlu1 %v5686_v45, %s8767_s13  ;;  %v1615_v5 = vsel %vm6886_vm15, %v1610_v60, %v1614_v48  ;;  %v1965_v26 = vsel %vm6855_vm13, %v1963_v13, %v1964_v14  ;;  %v1969_v27 = vsel %vm6855_vm13, %v5766_v17, %v1968_v11  ;;  %v2275_v28 = vshll.u32 %v5798_v19, 16  ;;  %v5799_v34 = vld [vmem:[%s6859_s8 + $0x20] sm:$0x1]  ;;  %v5777_v39 = vld [vmem:[%s6859_s8 + $0x18] sm:$0xf] }
  0x9c   : > { %1471 = vrot.lane.b32.xlu0 %v5687_v50, %s8767_s13  ;;  %v2279_v29 = vshrl.u32 %v5798_v19, 16  ;;  %v2268_v30 = vrot.slane %v2266_v21, 4  ;;  %v2271_v31 = vrot.slane %v2269_v22, 5  ;;  %v2290_v15 = vshrl.u32 %v5800_v23, 16  ;;  %v861_v43 = vld [vmem:[%s6859_s8 + $0x18] sm:$0xf] }
  0x9d   : > { %v2293_v20 = vshll.u32 %v5800_v23, 16  ;;  %v1972_v33 = vsel %vm6855_vm13, %v1970_v24, %v1971_v25  ;;  %v2277_v35 = vrot.slane %v2275_v28, 5  ;;  %v2299_v37 = vshll.u32 %v5801_v9, 16  ;;  %v5778_v44 = vld [vmem:[%s6859_s8 + $0x1c] sm:$0xf] }
  0x9e   : > { %v2281_v36 = vrot.slane %v2279_v29, 4  ;;  %v2303_v38 = vshrl.u32 %v5801_v9, 16  ;;  %v2272_v40 = vor.u32 %v2271_v31, %v2268_v30  ;;  %v2292_v41 = vrot.slane %v2290_v15, 4  ;;  %v5779_v46 = vld [vmem:[%s6859_s8 + $0x24] sm:$0xf] }
  0x9f   : > { %1473 = vrot.lane.b32.xlu1 %v5688_v54, %s8767_s13  ;;  %v2295_v42 = vrot.slane %v2293_v20, 5  ;;  %v2285_v45 = vshll.u32 %v5799_v34, 16  ;;  %v5802_v48 = vld [vmem:[%s6859_s8 + $0x2c] sm:$0x1]  ;;  %v2301_v49 = vrot.slane %v2299_v37, 5  ;;  %v937_v54 = vshrl.u32 %v861_v43, 16 }
  0xa0   : > { %1818 = vrot.lane.b32.xlu0 %v1591_v59, %s6392_s14  ;;  %v2282_v47 = vor.u32 %v2281_v36, %v2277_v35  ;;  %v2305_v50 = vrot.slane %v2303_v38, 4  ;;  %v2273_v51 = vrot.slane %v2272_v40, 4  ;;  %v862_v53 = vld [vmem:[%s6859_s8 + $0x1c] sm:$0xf]  ;;  %v940_v55 = vshll.u32 %v861_v43, 16 }
  0xa1   : > { %v2296_v52 = vor.u32 %v2295_v42, %v2292_v41  ;;  %v5780_v56 = vld [vmem:[%s6859_s8 + $0x28] sm:$0xf]  ;;  %v2287_v57 = vrot.slane %v2285_v45, 5  ;;  %v2309_v58 = vshll.u32 %v5802_v48, 16  ;;  %v5828_v59 = vld [vmem:[%s6859_s8 + $0x1c] sm:$0xf] }
  0xa2   : > { %v2283_v60 = vrot.slane %v2282_v47, 4  ;;  %v2306_v61 = vor.u32 %v2305_v50, %v2301_v49  ;;  %v5827_v62 = vld [vmem:[%s6859_s8 + $0x18] sm:$0xe]  ;;  %v950_v0 = vshrl.u32 %v862_v53, 16  ;;  %v2278_v1 = vsel %vm6886_vm15, %v2273_v51, %v2277_v35  ;;  %v864_v6 = vld [vmem:[%s6859_s8 + $0x24] sm:$0xf] }
  0xa3   : > { %1820 = vrot.lane.b32.xlu1 %v1601_v63, %s6392_s14  ;;  %v946_v63 = vshll.u32 %v862_v53, 16  ;;  %v2297_v2 = vrot.slane %v2296_v52, 4  ;;  %v939_v3 = vrot.slane %v937_v54, 4  ;;  %v2311_v7 = vrot.slane %v2309_v58, 5  ;;  %v5829_v8 = vld [vmem:[%s6859_s8 + $0x20] sm:$0x1] }
  0xa4   : > { %1822 = vrot.lane.b32.xlu0 %v1615_v5, %s6392_s14  ;;  %v942_v5 = vrot.slane %v940_v55, 5  ;;  %v2648_v10 = vrot.slane %v5828_v59, 5  ;;  %v5857_v11 = vrot.slane %v5827_v62, 9  ;;  %v2307_v13 = vrot.slane %v2306_v61, 4  ;;  %v863_v14 = vld [vmem:[%s6859_s8 + $0x20] sm:$0x1] }
  0xa5   : > { %v948_v16 = vrot.slane %v946_v63, 5  ;;  %v952_v17 = vrot.slane %v950_v0, 4  ;;  %v865_v21 = vld [vmem:[%s6859_s8 + $0x28] sm:$0xf]  ;;  %v961_v22 = vshrl.u32 %v864_v6, 16  ;;  %v964_v23 = vshll.u32 %v864_v6, 16 }
  0xa6   : > { %v943_v19 = vor.u32 %v942_v5, %v939_v3  ;;  %v2650_v24 = vrot.slane %v2648_v10, 4  ;;  %v2651_v25 = vrot.slane %v5829_v8, 5  ;;  %v5831_v29 = vld [vmem:[%s6859_s8 + $0x28] sm:$0xf]  ;;  %v970_v30 = vshll.u32 %v865_v21, 16 }
  0xa7   : > { %1824 = vrot.lane.b32.xlu1 %v1625_v12, %s6392_s14  ;;  %v2288_v12 = vsel %vm6886_vm15, %v2283_v60, %v2287_v57  ;;  %v953_v28 = vor.u32 %v952_v17, %v948_v16  ;;  %v974_v31 = vshrl.u32 %v865_v21, 16  ;;  %v2649_v9 = vsel %vm6855_vm13, %v5857_v11, %v2648_v10  ;;  %v5830_v34 = vld [vmem:[%s6859_s8 + $0x24] sm:$0xe]  ;;  %v816_v48 = vld [vmem:[%s6859_s8 + $0xc] sm:$0xf] }
  0xa8   : > { %2029 = vrot.lane.b32.xlu0 %v1962_v18, %s6393_s15  ;;  %v2302_v18 = vsel %vm6886_vm15, %v2297_v2, %v2301_v49  ;;  %v944_v15 = vrot.slane %v943_v19, 4  ;;  %v963_v20 = vrot.slane %v961_v22, 4  ;;  %v2652_v35 = vsel %vm6855_vm13, %v2650_v24, %v2651_v25  ;;  %837 = vst.msk [vmem:[#allocation4 + $0x8] sm:$0xf] %vm834_vm0, %v816_v48  ;;  %v1216_v55 = vld [vmem:[%s6859_s8 + $0x1c] sm:$0xf] }
  0xa9   : > { %v2655_v36 = vrot.slane %v5831_v29, 5  ;;  %v954_v37 = vrot.slane %v953_v28, 4  ;;  %v972_v40 = vrot.slane %v970_v30, 5  ;;  %v976_v41 = vrot.slane %v974_v31, 4  ;;  %v1215_v57 = vld [vmem:[%s6859_s8 + $0x18] sm:$0xe] }
  0xaa   : > { %v949_v42 = vsel %vm6886_vm15, %v944_v15, %v948_v16  ;;  %v5858_v43 = vrot.slane %v5830_v34, 9  ;;  %v817_v58 = vld [vmem:[%s6859_s8 + $0x10] sm:$0xf]  ;;  %v1288_v62 = vrot.slane %v1216_v55, 5  ;;  %v1219_v63 = vld [vmem:[%s6859_s8 + $0x28] sm:$0xf] }
  0xab   : > { %2031 = vrot.lane.b32.xlu1 %v1965_v26, %s6393_s15  ;;  %v956_v26 = vshll.u32 %v863_v14, 16  ;;  %v2657_v50 = vrot.slane %v2655_v36, 4  ;;  %v977_v51 = vor.u32 %v976_v41, %v972_v40  ;;  %838 = vst.msk [vmem:[#allocation4 + $0xc] sm:$0xf] %vm834_vm0, %v817_v58  ;;  %v5675_v2 = vrot.slane %v1215_v57, 9 }
  0xac   : > { %2033 = vrot.lane.b32.xlu0 %v1969_v27, %s6393_s15  ;;  %v2312_v27 = vsel %vm6886_vm15, %v2307_v13, %v2311_v7  ;;  %v2656_v53 = vsel %vm6855_vm13, %v5858_v43, %v2655_v36  ;;  %v1218_v3 = vld [vmem:[%s6859_s8 + $0x24] sm:$0xe]  ;;  %v1295_v6 = vrot.slane %v1219_v63, 5  ;;  %v1290_v8 = vrot.slane %v1288_v62, 4  ;;  %v1220_v11 = vld [vmem:[%s6859_s8 + $0x2c] sm:$0x1] }
  0xad   : > { %v958_v38 = vrot.slane %v956_v26, 5  ;;  %v978_v60 = vrot.slane %v977_v51, 4  ;;  %v5711_v5 = vld [vmem:[%s6859_s8 + $0x24] sm:$0xf]  ;;  %v1289_v13 = vsel %vm6855_vm13, %v5675_v2, %v1288_v62  ;;  %v5712_v14 = vld [vmem:[%s6859_s8 + $0x28] sm:$0xf] }
  0xae   : > { %v1627_v16 = vshrl.u32 %v5711_v5, 16  ;;  %v1630_v17 = vshll.u32 %v5711_v5, 16  ;;  %v1297_v19 = vrot.slane %v1295_v6, 4  ;;  %v1298_v21 = vrot.slane %v1220_v11, 5  ;;  %v5715_v28 = vld [vmem:[%s6859_s8 + $0x34] sm:$0xf] }
  0xaf   : > { %2035 = vrot.lane.b32.xlu1 %v1972_v33, %s6393_s15  ;;  %v966_v33 = vrot.slane %v964_v23, 5  ;;  %v959_v49 = vsel %vm6886_vm15, %v954_v37, %v958_v38  ;;  %v1636_v24 = vshll.u32 %v5712_v14, 16  ;;  %v1640_v25 = vshrl.u32 %v5712_v14, 16  ;;  %v5689_v34 = vld [vmem:[%s6859_s8 + $0x24] sm:$0xf] }
  0xb0   : > { %2154 = vrot.lane.b32.xlu0 %v5777_v39, %s6394_s16  ;;  %v5832_v39 = vld [vmem:[%s6859_s8 + $0x2c] sm:$0x1]  ;;  %v1629_v26 = vrot.slane %v1627_v16, 4  ;;  %v1299_v31 = vsel %vm6855_vm13, %v1297_v19, %v1298_v21  ;;  %v5742_v55 = vld [vmem:[%s6859_s8 + $0x28] sm:$0xf] }
  0xb1   : > { %v967_v45 = vor.u32 %v966_v33, %v963_v20  ;;  %v2658_v47 = vrot.slane %v5832_v39, 5  ;;  %v1642_v15 = vrot.slane %v1640_v25, 4  ;;  %v1660_v20 = vshll.u32 %v5715_v28, 16  ;;  %v5690_v39 = vld [vmem:[%s6859_s8 + $0x28] sm:$0xf] }
  0xb2   : > { %v1664_v33 = vshrl.u32 %v5715_v28, 16  ;;  %v5743_v58 = vld [vmem:[%s6859_s8 + $0x2c] sm:$0x1]  ;;  %v1975_v62 = vrot.slane %v5742_v55, 5  ;;  %v819_v63 = vld [vmem:[%s6859_s8 + $0x1c] sm:$0xf] }
  0xb3   : > { %2156 = vrot.lane.b32.xlu1 %v5778_v44, %s6394_s16  ;;  %v866_v44 = vld [vmem:[%s6859_s8 + $0x2c] sm:$0x1]  ;;  %v968_v54 = vrot.slane %v967_v45, 4  ;;  %v2659_v59 = vsel %vm6855_vm13, %v2657_v50, %v2658_v47  ;;  %v1662_v43 = vrot.slane %v1660_v20, 5  ;;  %v5691_v45 = vld [vmem:[%s6859_s8 + $0x30] sm:$0xf] }
  0xb4   : > { %2158 = vrot.lane.b32.xlu0 %v5779_v46, %s6394_s16  ;;  %v814_v46 = vld [vmem:[%s6859_s8] sm:$0xf]  ;;  %v980_v52 = vshll.u32 %v866_v44, 16  ;;  %v1666_v44 = vrot.slane %v1664_v33, 4  ;;  %840 = vst.msk [vmem:[#allocation4 + $0x14] sm:$0xf] %vm834_vm0, %v819_v63 }
  0xb5   : > { %835 = vst.msk [vmem:[#allocation4] sm:$0xf] %vm834_vm0, %v814_v46  ;;  %v973_v0 = vsel %vm6886_vm15, %v968_v54, %v972_v40  ;;  %v5803_v5 = vld [vmem:[%s6859_s8 + $0x30] sm:$0xf]  ;;  %v5807_v20 = vld [vmem:[%s6859_s8 + $0x40] sm:$0xf] }
  0xb6   : > { %v982_v61 = vrot.slane %v980_v52, 5  ;;  %v1667_v52 = vor.u32 %v1666_v44, %v1662_v43  ;;  %v2314_v19 = vshrl.u32 %v5803_v5, 16  ;;  %v2317_v21 = vshll.u32 %v5803_v5, 16  ;;  %v868_v55 = vld [vmem:[%s6859_s8 + $0x34] sm:$0xf] }
  0xb7   : > { %2160 = vrot.lane.b32.xlu1 %v5780_v56, %s6394_s16  ;;  %v815_v56 = vld [vmem:[%s6859_s8 + $0x4] sm:$0xf] }
  0xb8   : > { %2505 = vrot.lane.b32.xlu0 %v2278_v1, %s6395_s17  ;;  %836 = vst.msk [vmem:[#allocation4 + $0x4] sm:$0xf] %vm834_vm0, %v815_v56  ;;  %v1217_v1 = vld [vmem:[%s6859_s8 + $0x20] sm:$0x1]  ;;  %v983_v7 = vsel %vm6886_vm15, %v978_v60, %v982_v61  ;;  %v5741_v56 = vld [vmem:[%s6859_s8 + $0x24] sm:$0xe] }
  0xb9   : > { %v1291_v10 = vrot.slane %v1217_v1, 5  ;;  %v1668_v61 = vrot.slane %v1667_v52, 4  ;;  %v5767_v2 = vrot.slane %v5741_v56, 9 }
  0xbb   : > { %2507 = vrot.lane.b32.xlu1 %v2288_v12, %s6395_s17  ;;  %v5676_v12 = vrot.slane %v1218_v3, 9  ;;  %v1292_v22 = vsel %vm6855_vm13, %v1290_v8, %v1291_v10  ;;  %v5744_v3 = vld [vmem:[%s6859_s8 + $0x30] sm:$0xe]  ;;  %v1978_v8 = vrot.slane %v5743_v58, 5  ;;  %v5784_v58 = vld [vmem:[%s6859_s8 + $0x40] sm:$0xf] }
  0xbc   : > { %2509 = vrot.lane.b32.xlu0 %v2302_v18, %s6395_s17  ;;  %v5714_v18 = vld [vmem:[%s6859_s8 + $0x30] sm:$0xf]  ;;  %v5768_v14 = vrot.slane %v5744_v3, 9 }
  0xbd   : > { %v1296_v23 = vsel %vm6855_vm13, %v5676_v12, %v1295_v6  ;;  %v1651_v29 = vshrl.u32 %v5714_v18, 16  ;;  %v1654_v30 = vshll.u32 %v5714_v18, 16  ;;  %v6237_v6 = vld [vmem:[%s8761_s1 + $0x10] ss:$0 sps:$4 sm:$0x33]   ;;  %v1977_v12 = vrot.slane %v1975_v62, 4 }
  0xbe   : > { %6151 = vmatprep.subr.msk.bf16.mxu0 %vm2925_vm1, %v6237_v6  ;;  %v2927_v16 = vsel %vm2925_vm1, %v6237_v6, 0  ;;  %v5804_v18 = vld [vmem:[%s6859_s8 + $0x34] sm:$0xf]  ;;  %vm3366_vm1 = vsmask.f32 7938 }
  0xbf   : > { %2511 = vrot.lane.b32.xlu1 %v2312_v27, %s6395_s17  ;;  %v1632_v27 = vrot.slane %v1630_v17, 5  ;;  %v1653_v37 = vrot.slane %v1651_v29, 4  ;;  %v1656_v38 = vrot.slane %v1654_v30, 5  ;;  %v1976_v17 = vsel %vm6855_vm13, %v5767_v2, %v1975_v62  ;;  %6106 = vmatpush3.bf16.msra.mxu0 %v2927_v16 }
  0xc0   : > { %2716 = vrot.lane.b32.xlu0 %v2649_v9, %s6396_s26  ;;  %v1638_v9 = vrot.slane %v1636_v24, 5  ;;  %v6240_v24 = vld [vmem:[%s8761_s1] sm:$0xff]   ;;  %v1979_v28 = vsel %vm6855_vm13, %v1977_v12, %v1978_v8  ;;  %v2323_v30 = vshll.u32 %v5804_v18, 16  ;;  %v998_v2 = vshrl.u32 %v868_v55, 16  ;;  %v870_v8 = vld [vmem:[%s6859_s8 + $0x3c] sm:$0xf] }
  0xc1   : > { %v1633_v36 = vor.u32 %v1632_v27, %v1629_v26  ;;  %v1657_v47 = vor.u32 %v1656_v38, %v1653_v37  ;;  %v820_v27 = vld [vmem:[%s6859_s8 + $0x24] sm:$0xf] }
  0xc2   : > { %v1643_v40 = vor.u32 %v1642_v15, %v1638_v9  ;;  %841 = vst.msk [vmem:[#allocation4 + $0x18] sm:$0xf] %vm834_vm0, %v820_v27  ;;  %v2319_v15 = vrot.slane %v2317_v21, 5  ;;  %v2325_v37 = vrot.slane %v2323_v30, 5 }
  0xc3   : > { %2718 = vrot.lane.b32.xlu1 %v2652_v35, %s6396_s26  ;;  %v5713_v35 = vld [vmem:[%s6859_s8 + $0x2c] sm:$0x1]  ;;  %v1634_v46 = vrot.slane %v1633_v36, 4  ;;  %v1658_v54 = vrot.slane %v1657_v47, 4  ;;  %v5805_v36 = vld [vmem:[%s6859_s8 + $0x38] sm:$0x1] }
  0xc4   : > { %1136 = vrot.lane.b32.xlu0 %v949_v42, %s6390_s10  ;;  %v1646_v41 = vshll.u32 %v5713_v35, 16  ;;  %v5716_v42 = vld [vmem:[%s6859_s8 + $0x38] sm:$0x1]  ;;  %v1644_v50 = vrot.slane %v1643_v40, 4  ;;  %v2351_v40 = vshrl.u32 %v5807_v20, 16  ;;  %v2333_v47 = vshll.u32 %v5805_v36, 16 }
  0xc5   : > { %v1670_v48 = vshll.u32 %v5716_v42, 16  ;;  %v1663_v1 = vsel %vm6886_vm15, %v1658_v54, %v1662_v43  ;;  %v5837_v36 = vld [vmem:[%s6859_s8 + $0x40] sm:$0xf] }
  0xc6   : > { %v1648_v51 = vrot.slane %v1646_v41, 5  ;;  %v5781_v41 = vld [vmem:[%s6859_s8 + $0x30] sm:$0xf]  ;;  %v2353_v52 = vrot.slane %v2351_v40, 4 }
  0xc7   : > { %1138 = vrot.lane.b32.xlu1 %v959_v49, %s6390_s10  ;;  %v5692_v49 = vld [vmem:[%s6859_s8 + $0x34] sm:$0xf]  ;;  %v1672_v57 = vrot.slane %v1670_v48, 5  ;;  %v5783_v48 = vld [vmem:[%s6859_s8 + $0x3c] sm:$0xf] }
  0xc8   : > { %2720 = vrot.lane.b32.xlu0 %v2656_v53, %s6396_s26  ;;  %v1639_v53 = vsel %vm6886_vm15, %v1634_v46, %v1638_v9  ;;  %v1649_v60 = vsel %vm6886_vm15, %v1644_v50, %v1648_v51  ;;  %v2316_v9 = vrot.slane %v2314_v19, 4  ;;  %v5782_v46 = vld [vmem:[%s6859_s8 + $0x34] sm:$0xf]  ;;  %v5808_v50 = vld [vmem:[%s6859_s8 + $0x44] sm:$0x1]  ;;  %v1000_v19 = vrot.slane %v998_v2, 4 }
  0xc9   : > { %v1673_v11 = vsel %vm6886_vm15, %v1668_v61, %v1672_v57  ;;  %v5834_v61 = vld [vmem:[%s6859_s8 + $0x34] sm:$0xf] }
  0xca   : > { %v2320_v42 = vor.u32 %v2319_v15, %v2316_v9  ;;  %v2662_v12 = vrot.slane %v5834_v61, 5  ;;  %v1222_v61 = vld [vmem:[%s6859_s8 + $0x34] sm:$0xf] }
  0xcb   : > { %2722 = vrot.lane.b32.xlu1 %v2659_v59, %s6396_s26  ;;  %v5745_v59 = vld [vmem:[%s6859_s8 + $0x34] sm:$0xf] }
  0xcc   : > { %1140 = vrot.lane.b32.xlu0 %v973_v0, %s6390_s10  ;;  %v818_v0 = vld [vmem:[%s6859_s8 + $0x18] sm:$0xf]  ;;  %v1982_v10 = vrot.slane %v5745_v59, 5  ;;  %v2335_v59 = vrot.slane %v2333_v47, 5 }
  0xcd   : > { %839 = vst.msk [vmem:[#allocation4 + $0x10] sm:$0xf] %vm834_vm0, %v818_v0  ;;  %v5833_v0 = vld [vmem:[%s6859_s8 + $0x30] sm:$0xe] }
  0xce   : > { %v1984_v25 = vrot.slane %v1982_v10, 4  ;;  %v1983_v29 = vsel %vm6855_vm13, %v5768_v14, %v1982_v10 }
  0xcf   : > { %1142 = vrot.lane.b32.xlu1 %v983_v7, %s6390_s10  ;;  %v6238_v7 = vld [vmem:[%s8761_s1 + $0x8] sm:$0xff]  }
  0xd0   : > { %1350 = vrot.lane.b32.xlu0 %v1289_v13, %s8769_s9  ;;  %v5746_v13 = vld [vmem:[%s6859_s8 + $0x38] sm:$0x1]  ;;  %6107 = vmatprep.subr.bf16.mxu0 %v6238_v7 }
  0xd1   : > { %v1985_v26 = vrot.slane %v5746_v13, 5  ;;  %6108 = vmatpush3.bf16.msra.mxu0 %v6238_v7  ;;  %v5859_v13 = vrot.slane %v5833_v0, 9  ;;  %v1221_v0 = vld [vmem:[%s6859_s8 + $0x30] sm:$0xe] }
  0xd2   : > { %6109 = vmatprep.subr.bf16.mxu0 %v6240_v24 }
  0xd3   : > { %1352 = vrot.lane.b32.xlu1 %v1292_v22, %s8769_s9  ;;  %v5806_v22 = vld [vmem:[%s6859_s8 + $0x3c] sm:$0xf]  ;;  %v1986_v35 = vsel %vm6855_vm13, %v1984_v25, %v1985_v26  ;;  %v1009_v25 = vshrl.u32 %v870_v8, 16  ;;  %v1012_v26 = vshll.u32 %v870_v8, 16 }
  0xd4   : > { %1354 = vrot.lane.b32.xlu0 %v1296_v23, %s8769_s9  ;;  %v821_v23 = vld [vmem:[%s6859_s8 + $0x28] sm:$0xf]  ;;  %v2338_v33 = vshrl.u32 %v5806_v22, 16 }
  0xd5   : > { %842 = vst.msk [vmem:[#allocation4 + $0x1c] sm:$0xf] %vm834_vm0, %v821_v23  ;;  %6110 = vmatpush3.bf16.msra.mxu0 %v6240_v24  ;;  %v871_v24 = vld [vmem:[%s6859_s8 + $0x40] sm:$0xf] }
  0xd6   : > { %v2340_v43 = vrot.slane %v2338_v33, 4  ;;  %v1018_v15 = vshll.u32 %v871_v24, 16 }
  0xd7   : > { %1356 = vrot.lane.b32.xlu1 %v1299_v31, %s8769_s9  ;;  %v2327_v31 = vshrl.u32 %v5804_v18, 16 }
  0xd8   : > { %1475 = vrot.lane.b32.xlu0 %v5689_v34, %s8767_s13  ;;  %v2341_v34 = vshll.u32 %v5806_v22, 16 }
  0xd9   : > { %v2329_v38 = vrot.slane %v2327_v31, 4 }
  0xda   : > { %v2343_v44 = vrot.slane %v2341_v34, 5  ;;  %v2663_v34 = vsel %vm6855_vm13, %v5859_v13, %v2662_v12  ;;  %v1224_v13 = vld [vmem:[%s6859_s8 + $0x3c] sm:$0xe] }
  0xdb   : > { %1477 = vrot.lane.b32.xlu1 %v5690_v39, %s8767_s13  ;;  %v2347_v39 = vshll.u32 %v5807_v20, 16  ;;  %v1022_v20 = vshrl.u32 %v871_v24, 16  ;;  %v1226_v24 = vld [vmem:[%s6859_s8 + $0x44] sm:$0x1] }
  0xdc   : > { %1479 = vrot.lane.b32.xlu0 %v5691_v45, %s8767_s13  ;;  %v867_v45 = vld [vmem:[%s6859_s8 + $0x30] sm:$0xf]  ;;  %v2344_v54 = vor.u32 %v2343_v44, %v2340_v43  ;;  %v5838_v44 = vld [vmem:[%s6859_s8 + $0x44] sm:$0x1] }
  0xdd   : > { %v2349_v51 = vrot.slane %v2347_v39, 5  ;;  %v985_v56 = vshrl.u32 %v867_v45, 16  ;;  %v988_v57 = vshll.u32 %v867_v45, 16  ;;  %v5836_v39 = vld [vmem:[%s6859_s8 + $0x3c] sm:$0xe]  ;;  %v2669_v45 = vrot.slane %v5837_v36, 5 }
  0xde   : > { %v2345_v5 = vrot.slane %v2344_v54, 4  ;;  %v1024_v47 = vrot.slane %v1022_v20, 4  ;;  %v1312_v20 = vrot.slane %v1226_v24, 5 }
  0xdf   : > { %1481 = vrot.lane.b32.xlu1 %v5692_v49, %s8767_s13  ;;  %v2330_v49 = vor.u32 %v2329_v38, %v2325_v37  ;;  %v2354_v63 = vor.u32 %v2353_v52, %v2349_v51  ;;  %v987_v6 = vrot.slane %v985_v56, 4  ;;  %v990_v7 = vrot.slane %v988_v57, 5  ;;  %s8784_s13 = smov 8  }
  0xe0   : > { %1826 = vrot.lane.b32.xlu0 %v1639_v53, %s6392_s14  ;;  %v2321_v53 = vrot.slane %v2320_v42, 4  ;;  %v2350_v22 = vsel %vm6886_vm15, %v2345_v5, %v2349_v51  ;;  %v1014_v38 = vrot.slane %v1012_v26, 5 }
  0xe1   : > { %v2331_v62 = vrot.slane %v2330_v49, 4  ;;  %v2355_v16 = vrot.slane %v2354_v63, 4  ;;  %v991_v23 = vor.u32 %v990_v7, %v987_v6  ;;  %v5860_v49 = vrot.slane %v5836_v39, 9  ;;  %v1225_v7 = vld [vmem:[%s6859_s8 + $0x40] sm:$0xf] }
  0xe2   : > { %v2326_v3 = vsel %vm6886_vm15, %v2321_v53, %v2325_v37  ;;  %v1011_v37 = vrot.slane %v1009_v25, 4  ;;  %v2672_v53 = vrot.slane %v5838_v44, 5  ;;  %v1302_v6 = vrot.slane %v1222_v61, 5 }
  0xe3   : > { %1828 = vrot.lane.b32.xlu1 %v1649_v60, %s6392_s14  ;;  %v2357_v60 = vshll.u32 %v5808_v50, 16  ;;  %v2336_v14 = vsel %vm6886_vm15, %v2331_v62, %v2335_v59  ;;  %v872_v50 = vld [vmem:[%s6859_s8 + $0x44] sm:$0x1]  ;;  %v2670_v59 = vsel %vm6855_vm13, %v5860_v49, %v2669_v45  ;;  %v823_v62 = vld [vmem:[%s6859_s8 + $0x34] sm:$0xf]  ;;  %v5678_v25 = vrot.slane %v1224_v13, 9 }
  0xe4   : > { %1830 = vrot.lane.b32.xlu0 %v1663_v1, %s6392_s14  ;;  %v994_v1 = vshll.u32 %v868_v55, 16  ;;  %v1015_v51 = vor.u32 %v1014_v38, %v1011_v37  ;;  %v2671_v55 = vrot.slane %v2669_v45, 4  ;;  %v1028_v57 = vshll.u32 %v872_v50, 16  ;;  %844 = vst.msk [vmem:[#allocation4 + $0x24] sm:$0xf] %vm834_vm0, %v823_v62 }
  0xe5   : > { %v2359_v10 = vrot.slane %v2357_v60, 5  ;;  %v5693_v50 = vld [vmem:[%s6859_s8 + $0x3c] sm:$0xf]  ;;  %v5695_v62 = vld [vmem:[%s6859_s8 + $0x48] sm:$0xf] }
  0xe6   : > { %v996_v18 = vrot.slane %v994_v1, 5  ;;  %v1016_v60 = vrot.slane %v1015_v51, 4  ;;  %v822_v1 = vld [vmem:[%s6859_s8 + $0x30] sm:$0xf]  ;;  %v2673_v2 = vsel %vm6855_vm13, %v2671_v55, %v2672_v53  ;;  %v1030_v5 = vrot.slane %v1028_v57, 5 }
  0xe7   : > { %1832 = vrot.lane.b32.xlu1 %v1673_v11, %s6392_s14  ;;  %v5835_v11 = vld [vmem:[%s6859_s8 + $0x38] sm:$0x1]  ;;  %v2360_v31 = vsel %vm6886_vm15, %v2355_v16, %v2359_v10  ;;  %843 = vst.msk [vmem:[#allocation4 + $0x20] sm:$0xf] %vm834_vm0, %v822_v1  ;;  %v5717_v16 = vld [vmem:[%s6859_s8 + $0x3c] sm:$0xf] }
  0xe8   : > { %2037 = vrot.lane.b32.xlu0 %v1976_v17, %s6393_s15  ;;  %v869_v17 = vld [vmem:[%s6859_s8 + $0x38] sm:$0x1]  ;;  %v1001_v9 = vor.u32 %v1000_v19, %v996_v18  ;;  %v824_v19 = vld [vmem:[%s6859_s8 + $0x3c] sm:$0xf]  ;;  %v5719_v51 = vld [vmem:[%s6859_s8 + $0x44] sm:$0x1] }
  0xe9   : > { %v1004_v30 = vshll.u32 %v869_v17, 16  ;;  %v825_v17 = vld [vmem:[%s6859_s8 + $0x40] sm:$0xf]  ;;  %845 = vst.msk [vmem:[#allocation4 + $0x28] sm:$0xf] %vm834_vm0, %v824_v19 }
  0xea   : > { %v1002_v43 = vrot.slane %v1001_v9, 4  ;;  %846 = vst.msk [vmem:[#allocation4 + $0x2c] sm:$0xf] %vm834_vm0, %v825_v17  ;;  %v5720_v9 = vld [vmem:[%s6859_s8 + $0x48] sm:$0xf] }
  0xeb   : > { %2039 = vrot.lane.b32.xlu1 %v1979_v28, %s6393_s15  ;;  %v2664_v28 = vrot.slane %v2662_v12, 4  ;;  %v1006_v42 = vrot.slane %v1004_v30, 5  ;;  %v5677_v12 = vrot.slane %v1221_v0, 9  ;;  %v1678_v30 = vshll.u32 %v5717_v16, 16  ;;  %v5722_v0 = vld [vmem:[%s6859_s8 + $0x50] sm:$0x1] }
  0xec   : > { %2041 = vrot.lane.b32.xlu0 %v1983_v29, %s6393_s15  ;;  %v2665_v29 = vrot.slane %v5835_v11, 5  ;;  %v1223_v11 = vld [vmem:[%s6859_s8 + $0x38] sm:$0x1] }
  0xed   : > { %v1007_v54 = vsel %vm6886_vm15, %v1002_v43, %v1006_v42  ;;  %v1680_v39 = vrot.slane %v1678_v30, 5  ;;  %v1702_v42 = vshll.u32 %v5720_v9, 16 }
  0xef   : > { %2043 = vrot.lane.b32.xlu1 %v1986_v35, %s6393_s15  ;;  %v992_v35 = vrot.slane %v991_v23, 4  ;;  %v1305_v23 = vrot.slane %v1223_v11, 5 }
  0xf0   : > { %2162 = vrot.lane.b32.xlu0 %v5781_v41, %s6394_s16  ;;  %v2666_v41 = vsel %vm6855_vm13, %v2664_v28, %v2665_v29  ;;  %v5718_v28 = vld [vmem:[%s6859_s8 + $0x40] sm:$0xf]  ;;  %v1675_v29 = vshrl.u32 %v5717_v16, 16  ;;  %v5747_v16 = vld [vmem:[%s6859_s8 + $0x3c] sm:$0xe] }
  0xf1   : > { %v1688_v36 = vshrl.u32 %v5718_v28, 16 }
  0xf2   : > { %v1677_v38 = vrot.slane %v1675_v29, 4  ;;  %v5809_v29 = vld [vmem:[%s6859_s8 + $0x48] sm:$0xf] }
  0xf3   : > { %2164 = vrot.lane.b32.xlu1 %v5782_v46, %s6394_s16  ;;  %v1020_v46 = vrot.slane %v1018_v15, 5 }
  0xf4   : > { %2166 = vrot.lane.b32.xlu0 %v5783_v48, %s6394_s16  ;;  %v997_v48 = vsel %vm6886_vm15, %v992_v35, %v996_v18  ;;  %v1309_v18 = vrot.slane %v1225_v7, 5  ;;  %v1684_v35 = vshll.u32 %v5718_v28, 16 }
  0xf5   : > { %v1025_v56 = vor.u32 %v1024_v47, %v1020_v46  ;;  %v1021_v10 = vsel %vm6886_vm15, %v1016_v60, %v1020_v46  ;;  %v1690_v46 = vrot.slane %v1688_v36, 4  ;;  %v5810_v36 = vld [vmem:[%s6859_s8 + $0x4c] sm:$0xf] }
  0xf6   : > { %v1311_v15 = vrot.slane %v1309_v18, 4  ;;  %v1686_v45 = vrot.slane %v1684_v35, 5  ;;  %v5752_v35 = vld [vmem:[%s6859_s8 + $0x50] sm:$0x1] }
  0xf7   : > { %2168 = vrot.lane.b32.xlu1 %v5784_v58, %s6394_s16 }
  0xf8   : > { %2513 = vrot.lane.b32.xlu0 %v2326_v3, %s6395_s17  ;;  %v1026_v3 = vrot.slane %v1025_v56, 4  ;;  %v1313_v44 = vsel %vm6855_vm13, %v1311_v15, %v1312_v20  ;;  %v5694_v56 = vld [vmem:[%s6859_s8 + $0x40] sm:$0xf]  ;;  %v1691_v57 = vor.u32 %v1690_v46, %v1686_v45  ;;  %v2375_v46 = vshrl.u32 %v5810_v36, 16 }
  0xf9   : > { %v1343_v21 = vpop.permute.xlu0 %1342 }
  0xfb   : > { %2515 = vrot.lane.b32.xlu1 %v2336_v14, %s6395_s17  ;;  %v1345_v27 = vpop.permute.xlu1 %1344 }
  0xfc   : > { %2517 = vrot.lane.b32.xlu0 %v2350_v22, %s6395_s17  ;;  %v1304_v22 = vrot.slane %v1302_v6, 4 }
  0xfd   : > { %v1347_v33 = vpop.permute.xlu0 %1346 }
  0xff   : > { %2519 = vrot.lane.b32.xlu1 %v2360_v31, %s6395_s17  ;;  %v1349_v40 = vpop.permute.xlu1 %1348 }
 0x100   : > { %2724 = vrot.lane.b32.xlu0 %v2663_v34, %s6396_s26  ;;  %v1310_v34 = vsel %vm6855_vm13, %v5678_v25, %v1309_v18 }
 0x102   : > { %v1129_v52 = vpop.permute.xlu0 %1128 }
 0x103   : > { %2726 = vrot.lane.b32.xlu1 %v2666_v41, %s6396_s26  ;;  %1189 = vst.msk [vmem:[#allocation4] sm:$0xf] %vm1188_vm2, %v1129_v52  ;;  %v1699_v41 = vshrl.u32 %v5720_v9, 16  ;;  %v1681_v52 = vor.u32 %v1680_v39, %v1677_v38  ;;  %v2365_v38 = vshll.u32 %v5809_v29, 16 }
 0x104   : > { %1144 = vrot.lane.b32.xlu0 %v997_v48, %s6390_s10  ;;  %1403 = vst.msk [vmem:[#allocation4] sm:$0xf] %vm1402_vm3, %v1343_v21  ;;  %v1031_v21 = vsel %vm6886_vm15, %v1026_v3, %v1030_v5  ;;  %v5696_v3 = vld [vmem:[%s6859_s8 + $0x4c] sm:$0xf]  ;;  %v1692_v5 = vrot.slane %v1691_v57, 4 }
 0x105   : > { %v1133_v58 = vpop.permute.xlu1 %1132  ;;  %v1701_v53 = vrot.slane %v1699_v41, 4 }
 0x106   : > { %1191 = vst.msk [vmem:[#allocation4 + $0x8] sm:$0xf] %vm1188_vm2, %v1133_v58  ;;  %v1131_v63 = vpop.permute.xlu0 %1130  ;;  %v1694_v58 = vshll.u32 %v5719_v51, 16 }
 0x107   : > { %1146 = vrot.lane.b32.xlu1 %v1007_v54, %s6390_s10  ;;  %1190 = vst.msk [vmem:[#allocation4 + $0x4] sm:$0xf] %vm1188_vm2, %v1131_v63  ;;  %v1704_v54 = vrot.slane %v1702_v42, 5  ;;  %v1682_v63 = vrot.slane %v1681_v52, 4 }
 0x108   : > { %1405 = vst.msk [vmem:[#allocation4 + $0x8] sm:$0xf] %vm1402_vm3, %v1347_v33  ;;  %2728 = vrot.lane.b32.xlu0 %v2670_v59, %s6396_s26  ;;  %1404 = vst.msk [vmem:[#allocation4 + $0x4] sm:$0xf] %vm1402_vm3, %v1345_v27  ;;  %v1303_v27 = vsel %vm6855_vm13, %v5677_v12, %v1302_v6  ;;  %v1306_v33 = vsel %vm6855_vm13, %v1304_v22, %v1305_v23  ;;  %v1696_v6 = vrot.slane %v1694_v58, 5  ;;  %v2377_v58 = vrot.slane %v2375_v46, 4 }
 0x109   : > { %v1135_v8 = vpop.permute.xlu1 %1134  ;;  %v1705_v1 = vor.u32 %v1704_v54, %v1701_v53  ;;  %v1687_v12 = vsel %vm6886_vm15, %v1682_v63, %v1686_v45  ;;  %v5749_v22 = vld [vmem:[%s6859_s8 + $0x44] sm:$0x1]  ;;  %v5751_v23 = vld [vmem:[%s6859_s8 + $0x4c] sm:$0xf]  ;;  %v2371_v45 = vshll.u32 %v5810_v36, 16 }
 0x10a   : > { %1192 = vst.msk [vmem:[#allocation4 + $0xc] sm:$0xf] %vm1188_vm2, %v1135_v8  ;;  %v1468_v14 = vpop.permute.xlu0 %1467  ;;  %v1718_v8 = vshll.u32 %v5722_v0, 16  ;;  %v1697_v18 = vsel %vm6886_vm15, %v1692_v5, %v1696_v6  ;;  %v1996_v9 = vrot.slane %v5751_v23, 5  ;;  %v5840_v23 = vld [vmem:[%s6859_s8 + $0x4c] sm:$0xf] }
 0x10b   : > { %2730 = vrot.lane.b32.xlu1 %v2673_v2, %s6396_s26  ;;  %1406 = vst.msk [vmem:[#allocation4 + $0xc] sm:$0xf] %vm1402_vm3, %v1349_v40  ;;  %v5721_v40 = vld [vmem:[%s6859_s8 + $0x4c] sm:$0xf]  ;;  %v1706_v13 = vrot.slane %v1705_v1, 4  ;;  %v2373_v57 = vrot.slane %v2371_v45, 5 }
 0x10c   : > { %1528 = vst.msk [vmem:[#allocation4] sm:$0xf] %vm1527_vm4, %v1468_v14  ;;  %1148 = vrot.lane.b32.xlu0 %v1021_v10, %s6390_s10  ;;  %v1708_v47 = vshll.u32 %v5721_v40, 16  ;;  %v1712_v48 = vshrl.u32 %v5721_v40, 16  ;;  %v5748_v10 = vld [vmem:[%s6859_s8 + $0x40] sm:$0xf] }
 0x10d   : > { %v1470_v26 = vpop.permute.xlu1 %1469  ;;  %v1989_v17 = vrot.slane %v5748_v10, 5  ;;  %v5812_v40 = vld [vmem:[%s6859_s8 + $0x54] sm:$0xf]  ;;  %v1998_v42 = vrot.slane %v1996_v9, 4  ;;  %v826_v45 = vld [vmem:[%s6859_s8 + $0x48] sm:$0xf] }
 0x10e   : > { %1529 = vst.msk [vmem:[#allocation4 + $0x4] sm:$0xf] %vm1527_vm4, %v1470_v26  ;;  %v1472_v31 = vpop.permute.xlu0 %1471  ;;  %v1710_v59 = vrot.slane %v1708_v47, 5  ;;  %v1714_v60 = vrot.slane %v1712_v48, 4  ;;  %v5769_v26 = vrot.slane %v5747_v16, 9  ;;  %v2386_v51 = vshrl.u32 %v5812_v40, 16 }
 0x10f   : > { %1150 = vrot.lane.b32.xlu1 %v1031_v21, %s6390_s10  ;;  %1530 = vst.msk [vmem:[#allocation4 + $0x8] sm:$0xf] %vm1527_vm4, %v1472_v31  ;;  %v1720_v21 = vrot.slane %v1718_v8, 5  ;;  %v1991_v30 = vrot.slane %v1989_v17, 4  ;;  %v1992_v31 = vrot.slane %v5749_v22, 5  ;;  %v2389_v52 = vshll.u32 %v5812_v40, 16 }
 0x110   : > { %1358 = vrot.lane.b32.xlu0 %v1303_v27, %s8784_s13  ;;  %v1715_v7 = vor.u32 %v1714_v60, %v1710_v59  ;;  %v1711_v25 = vsel %vm6886_vm15, %v1706_v13, %v1710_v59  ;;  %v5750_v27 = vld [vmem:[%s6859_s8 + $0x48] sm:$0xe]  ;;  %v5813_v47 = vld [vmem:[%s6859_s8 + $0x58] sm:$0xf]  ;;  %v2388_v63 = vrot.slane %v2386_v51, 4  ;;  %v2378_v8 = vor.u32 %v2377_v58, %v2373_v57 }
 0x111   : > { %v1474_v37 = vpop.permute.xlu1 %1473  ;;  %v5770_v20 = vrot.slane %v5750_v27, 9  ;;  %v1993_v41 = vsel %vm6855_vm13, %v1991_v30, %v1992_v31  ;;  %v2395_v54 = vshll.u32 %v5813_v47, 16  ;;  %v5785_v60 = vld [vmem:[%s6859_s8 + $0x48] sm:$0xf]  ;;  %v2391_v0 = vrot.slane %v2389_v52, 5 }
 0x112   : > { %1531 = vst.msk [vmem:[#allocation4 + $0xc] sm:$0xf] %vm1527_vm4, %v1474_v37  ;;  %v1819_v43 = vpop.permute.xlu0 %1818  ;;  %v1716_v19 = vrot.slane %v1715_v7, 4  ;;  %v2362_v37 = vshrl.u32 %v5809_v29, 16  ;;  %v5786_v7 = vld [vmem:[%s6859_s8 + $0x4c] sm:$0xf] }
 0x113   : > { %1360 = vrot.lane.b32.xlu1 %v1306_v33, %s8784_s13  ;;  %1879 = vst.msk [vmem:[#allocation4] sm:$0xf] %vm1878_vm5, %v1819_v43  ;;  %v1999_v43 = vrot.slane %v5752_v35, 5  ;;  %v7263_v5 = vrot.slane %v2395_v54, 5  ;;  %v5787_v13 = vld [vmem:[%s6859_s8 + $0x54] sm:$0xf]  ;;  %v2392_v16 = vor.u32 %v2391_v0, %v2388_v63 }
 0x114   : > { %1362 = vrot.lane.b32.xlu0 %v1310_v34, %s8784_s13  ;;  %v1721_v15 = vsel %vm6886_vm15, %v1716_v19, %v1720_v21  ;;  %v1990_v34 = vsel %vm6855_vm13, %v5769_v26, %v1989_v17  ;;  %v5788_v26 = vld [vmem:[%s6859_s8 + $0x58] sm:$0xf]  ;;  %v2379_v27 = vrot.slane %v2378_v8, 4  ;;  %v5839_v29 = vld [vmem:[%s6859_s8 + $0x48] sm:$0xe]  ;;  %v2676_v35 = vrot.slane %v5840_v23, 5 }
 0x115   : > { %v1821_v49 = vpop.permute.xlu1 %1820  ;;  %v876_v36 = vld [vmem:[%s6859_s8 + $0x54] sm:$0xf]  ;;  %847 = vst.msk [vmem:[#allocation4 + $0x30] sm:$0xf] %vm834_vm0, %v826_v45  ;;  %v5843_v58 = vld [vmem:[%s6859_s8 + $0x58] sm:$0xf] }
 0x116   : > { %1880 = vst.msk [vmem:[#allocation4 + $0x4] sm:$0xf] %vm1878_vm5, %v1821_v49  ;;  %v1823_v55 = vpop.permute.xlu0 %1822  ;;  %v2364_v49 = vrot.slane %v2362_v37, 4  ;;  %v1060_v51 = vshll.u32 %v876_v36, 16  ;;  %v5844_v8 = vld [vmem:[%s6859_s8 + $0x5c] sm:$0x1] }
 0x117   : > { %1364 = vrot.lane.b32.xlu1 %v1313_v44, %s8784_s13  ;;  %1881 = vst.msk [vmem:[#allocation4 + $0x8] sm:$0xf] %vm1878_vm5, %v1823_v55  ;;  %v1997_v44 = vsel %vm6855_vm13, %v5770_v20, %v1996_v9  ;;  %v2399_v55 = vshrl.u32 %v5813_v47, 16  ;;  %v2393_v9 = vrot.slane %v2392_v16, 4  ;;  %v828_v16 = vld [vmem:[%s6859_s8 + $0x54] sm:$0xf] }
 0x118   : > { %1483 = vrot.lane.b32.xlu0 %v5693_v50, %s8785_s30  ;;  %v2367_v50 = vrot.slane %v2365_v38, 5  ;;  %v5841_v38 = vld [vmem:[%s6859_s8 + $0x50] sm:$0x1]  ;;  %849 = vst.msk [vmem:[#allocation4 + $0x38] sm:$0xf] %vm834_vm0, %v828_v16 }
 0x119   : > { %v1825_v61 = vpop.permute.xlu1 %1824  ;;  %v2401_v6 = vrot.slane %v2399_v55, 4  ;;  %v2398_v47 = vsel %vm6886_vm15, %v2393_v9, %v7263_v5  ;;  %v5723_v45 = vld [vmem:[%s6859_s8 + $0x54] sm:$0xf] }
 0x11a   : > { %1882 = vst.msk [vmem:[#allocation4 + $0xc] sm:$0xf] %vm1878_vm5, %v1825_v61  ;;  %v2030_v2 = vpop.permute.xlu0 %2029  ;;  %v5811_v61 = vld [vmem:[%s6859_s8 + $0x50] sm:$0x1] }
 0x11b   : > { %1485 = vrot.lane.b32.xlu1 %v5694_v56, %s8785_s30  ;;  %2090 = vst.msk [vmem:[#allocation4] sm:$0xf] %vm2089_vm6, %v2030_v2  ;;  %v2000_v56 = vsel %vm6855_vm13, %v1998_v42, %v1999_v43  ;;  %v873_v2 = vld [vmem:[%s6859_s8 + $0x48] sm:$0xf]  ;;  %v2381_v10 = vshll.u32 %v5811_v61, 16  ;;  %v2402_v22 = vor.u32 %v2401_v6, %v7263_v5 }
 0x11c   : > { %1487 = vrot.lane.b32.xlu0 %v5695_v62, %s8785_s30  ;;  %v2368_v62 = vor.u32 %v2367_v50, %v2364_v49  ;;  %v1033_v17 = vshrl.u32 %v873_v2, 16  ;;  %v875_v43 = vld [vmem:[%s6859_s8 + $0x50] sm:$0x1]  ;;  %v877_v49 = vld [vmem:[%s6859_s8 + $0x58] sm:$0xf]  ;;  %v1057_v50 = vshrl.u32 %v876_v36, 16 }
 0x11d   : > { %v2032_v11 = vpop.permute.xlu1 %2031  ;;  %v2403_v37 = vrot.slane %v2402_v22, 4  ;;  %v1052_v55 = vshll.u32 %v875_v43, 16  ;;  %v5842_v5 = vld [vmem:[%s6859_s8 + $0x54] sm:$0xe] }
 0x11e   : > { %2091 = vst.msk [vmem:[#allocation4 + $0x4] sm:$0xf] %vm2089_vm6, %v2032_v11  ;;  %v2034_v14 = vpop.permute.xlu0 %2033  ;;  %v874_v11 = vld [vmem:[%s6859_s8 + $0x4c] sm:$0xf]  ;;  %v1230_v43 = vld [vmem:[%s6859_s8 + $0x54] sm:$0xe] }
 0x11f   : > { %1489 = vrot.lane.b32.xlu1 %v5696_v3, %s8785_s30  ;;  %2092 = vst.msk [vmem:[#allocation4 + $0x8] sm:$0xf] %vm2089_vm6, %v2034_v14  ;;  %v5814_v3 = vld [vmem:[%s6859_s8 + $0x5c] sm:$0x1]  ;;  %v2369_v14 = vrot.slane %v2368_v62, 4 }
 0x120   : > { %1834 = vrot.lane.b32.xlu0 %v1687_v12, %s6392_s14  ;;  %v2405_v21 = vshll.u32 %v5814_v3, 16 }
 0x121   : > { %v2036_v24 = vpop.permute.xlu1 %2035  ;;  %v2374_v31 = vsel %vm6886_vm15, %v2369_v14, %v2373_v57  ;;  %v2678_v57 = vrot.slane %v2676_v35, 4  ;;  %v829_v14 = vld [vmem:[%s6859_s8 + $0x58] sm:$0xf] }
 0x122   : > { %2093 = vst.msk [vmem:[#allocation4 + $0xc] sm:$0xf] %vm2089_vm6, %v2036_v24  ;;  %v2155_v28 = vpop.permute.xlu0 %2154  ;;  %v1042_v24 = vshll.u32 %v874_v11, 16 }
 0x123   : > { %1836 = vrot.lane.b32.xlu1 %v1697_v18, %s6392_s14  ;;  %2215 = vst.msk [vmem:[#allocation4] sm:$0xf] %vm2214_vm7, %v2155_v28  ;;  %v1036_v18 = vshll.u32 %v873_v2, 16  ;;  %v2383_v28 = vrot.slane %v2381_v10, 5  ;;  %v1062_v2 = vrot.slane %v1060_v51, 5  ;;  %v2683_v10 = vrot.slane %v5843_v58, 5 }
 0x124   : > { %1838 = vrot.lane.b32.xlu0 %v1711_v25, %s6392_s14  ;;  %v1046_v25 = vshrl.u32 %v874_v11, 16  ;;  %v7284_v40 = vrot.slane %v1042_v24, 5  ;;  %850 = vst.msk [vmem:[#allocation4 + $0x3c] sm:$0xf] %vm834_vm0, %v829_v14  ;;  %v2686_v24 = vrot.slane %v5844_v8, 5  ;;  %v5680_v51 = vrot.slane %v1230_v43, 9 }
 0x125   : > { %v2157_v33 = vpop.permute.xlu1 %2156  ;;  %v1038_v20 = vrot.slane %v1036_v18, 5  ;;  %v2384_v42 = vsel %vm6886_vm15, %v2379_v27, %v2383_v28  ;;  %v5726_v58 = vld [vmem:[%s6859_s8 + $0x60] sm:$0xf]  ;;  %v5753_v43 = vld [vmem:[%s6859_s8 + $0x54] sm:$0xe] }
 0x126   : > { %2216 = vst.msk [vmem:[#allocation4 + $0x4] sm:$0xf] %vm2214_vm7, %v2157_v33  ;;  %v2159_v39 = vpop.permute.xlu0 %2158 }
 0x127   : > { %1840 = vrot.lane.b32.xlu1 %v1721_v15, %s6392_s14  ;;  %2217 = vst.msk [vmem:[#allocation4 + $0x8] sm:$0xf] %vm2214_vm7, %v2159_v39  ;;  %v1035_v15 = vrot.slane %v1033_v17, 4  ;;  %v5861_v39 = vrot.slane %v5839_v29, 9 }
 0x128   : > { %2045 = vrot.lane.b32.xlu0 %v1990_v34, %s6393_s15  ;;  %v2407_v34 = vrot.slane %v2405_v21, 5  ;;  %v878_v21 = vld [vmem:[%s6859_s8 + $0x5c] sm:$0x1] }
 0x129   : > { %v2161_v48 = vpop.permute.xlu1 %2160  ;;  %v2677_v63 = vsel %vm6855_vm13, %v5861_v39, %v2676_v35  ;;  %v1076_v28 = vshll.u32 %v878_v21, 16 }
 0x12a   : > { %2218 = vst.msk [vmem:[#allocation4 + $0xc] sm:$0xf] %vm2214_vm7, %v2161_v48  ;;  %v2506_v53 = vpop.permute.xlu0 %2505  ;;  %v1039_v48 = vor.u32 %v1038_v20, %v1035_v15  ;;  %v1228_v15 = vld [vmem:[%s6859_s8 + $0x4c] sm:$0xf] }
 0x12b   : > { %2047 = vrot.lane.b32.xlu1 %v1993_v41, %s6393_s15  ;;  %2566 = vst.msk [vmem:[#allocation4] sm:$0xf] %vm2565_vm8, %v2506_v53  ;;  %v1048_v41 = vrot.slane %v1046_v25, 4  ;;  %v2679_v53 = vrot.slane %v5841_v38, 5  ;;  %v1078_v36 = vrot.slane %v1076_v28, 5 }
 0x12c   : > { %2049 = vrot.lane.b32.xlu0 %v1997_v44, %s6393_s15  ;;  %v827_v44 = vld [vmem:[%s6859_s8 + $0x4c] sm:$0xf]  ;;  %v1040_v0 = vrot.slane %v1039_v48, 4  ;;  %v1231_v38 = vld [vmem:[%s6859_s8 + $0x58] sm:$0xf] }
 0x12d   : > { %v2508_v59 = vpop.permute.xlu1 %2507  ;;  %848 = vst.msk [vmem:[#allocation4 + $0x34] sm:$0xf] %vm834_vm0, %v827_v44  ;;  %v1049_v54 = vor.u32 %v1048_v41, %v7284_v40  ;;  %v2680_v11 = vsel %vm6855_vm13, %v2678_v57, %v2679_v53  ;;  %v1229_v41 = vld [vmem:[%s6859_s8 + $0x50] sm:$0x1] }
 0x12e   : > { %2567 = vst.msk [vmem:[#allocation4 + $0x4] sm:$0xf] %vm2565_vm8, %v2508_v59  ;;  %v2510_v1 = vpop.permute.xlu0 %2509  ;;  %v1066_v59 = vshll.u32 %v877_v49, 16  ;;  %v1045_v18 = vsel %vm6886_vm15, %v1040_v0, %v7284_v40 }
 0x12f   : > { %2051 = vrot.lane.b32.xlu1 %v2000_v56, %s6393_s15  ;;  %2568 = vst.msk [vmem:[#allocation4 + $0x8] sm:$0xf] %vm2565_vm8, %v2510_v1  ;;  %v2408_v56 = vsel %vm6886_vm15, %v2403_v37, %v2407_v34  ;;  %v1059_v1 = vrot.slane %v1057_v50, 4  ;;  %v1050_v6 = vrot.slane %v1049_v54, 4  ;;  %v1316_v37 = vrot.slane %v1228_v15, 5 }
 0x130   : > { %2170 = vrot.lane.b32.xlu0 %v5785_v60, %s6394_s16  ;;  %v1070_v60 = vshrl.u32 %v877_v49, 16  ;;  %v1319_v49 = vrot.slane %v1229_v41, 5  ;;  %v1232_v50 = vld [vmem:[%s6859_s8 + $0x5c] sm:$0x1]  ;;  %v5724_v54 = vld [vmem:[%s6859_s8 + $0x58] sm:$0xf] }
 0x131   : > { %v2512_v12 = vpop.permute.xlu1 %2511  ;;  %v1063_v22 = vor.u32 %v1062_v2, %v1059_v1  ;;  %v1318_v48 = vrot.slane %v1316_v37, 4  ;;  %v1736_v0 = vshrl.u32 %v5724_v54, 16  ;;  %v5754_v41 = vld [vmem:[%s6859_s8 + $0x58] sm:$0xf] }
 0x132   : > { %2569 = vst.msk [vmem:[#allocation4 + $0xc] sm:$0xf] %vm2565_vm8, %v2512_v12  ;;  %v2717_v19 = vpop.permute.xlu0 %2716  ;;  %v1068_v12 = vrot.slane %v1066_v59, 5 }
 0x133   : > { %2172 = vrot.lane.b32.xlu1 %v5786_v7, %s6394_s16  ;;  %2777 = vst.msk [vmem:[#allocation4] sm:$0xf] %vm2776_vm9, %v2717_v19  ;;  %v1054_v7 = vrot.slane %v1052_v55, 5  ;;  %v5862_v19 = vrot.slane %v5842_v5, 9  ;;  %v1064_v9 = vrot.slane %v1063_v22, 4  ;;  %v1723_v55 = vshrl.u32 %v5723_v45, 16 }
 0x134   : > { %2174 = vrot.lane.b32.xlu0 %v5787_v13, %s6394_s16  ;;  %v1072_v13 = vrot.slane %v1070_v60, 4  ;;  %v1326_v60 = vrot.slane %v1232_v50, 5  ;;  %v5727_v5 = vld [vmem:[%s6859_s8 + $0x64] sm:$0xf] }
 0x135   : > { %v2719_v30 = vpop.permute.xlu1 %2718  ;;  %v1055_v25 = vsel %vm6886_vm15, %v1050_v6, %v1054_v7  ;;  %v1069_v40 = vsel %vm6886_vm15, %v1064_v9, %v1068_v12  ;;  %v1725_v2 = vrot.slane %v1723_v55, 4  ;;  %v1747_v6 = vshrl.u32 %v5726_v58, 16  ;;  %v5728_v9 = vld [vmem:[%s6859_s8 + $0x68] sm:$0x1]  ;;  %v5815_v55 = vld [vmem:[%s6859_s8 + $0x60] sm:$0xf] }
 0x136   : > { %2778 = vst.msk [vmem:[#allocation4 + $0x4] sm:$0xf] %vm2776_vm9, %v2719_v30  ;;  %v1137_v33 = vpop.permute.xlu0 %1136  ;;  %v1073_v27 = vor.u32 %v1072_v13, %v1068_v12  ;;  %v1750_v7 = vshll.u32 %v5726_v58, 16  ;;  %v1738_v12 = vrot.slane %v1736_v0, 4  ;;  %v1756_v13 = vshll.u32 %v5727_v5, 16 }
 0x137   : > { %2176 = vrot.lane.b32.xlu1 %v5788_v26, %s6394_s16  ;;  %1193 = vst.msk [vmem:[#allocation4 + $0x10] sm:$0xf] %vm1188_vm2, %v1137_v33  ;;  %v2685_v26 = vrot.slane %v2683_v10, 4  ;;  %v1227_v33 = vld [vmem:[%s6859_s8 + $0x48] sm:$0xe]  ;;  %v1760_v14 = vshrl.u32 %v5727_v5, 16 }
 0x138   : > { %2521 = vrot.lane.b32.xlu0 %v2374_v31, %s6395_s17  ;;  %v2684_v31 = vsel %vm6855_vm13, %v5862_v19, %v2683_v10  ;;  %v1074_v35 = vrot.slane %v1073_v27, 4  ;;  %v1749_v21 = vrot.slane %v1747_v6, 4  ;;  %v1752_v22 = vrot.slane %v1750_v7, 5  ;;  %v5816_v0 = vld [vmem:[%s6859_s8 + $0x64] sm:$0xf] }
 0x139   : > { %v1139_v46 = vpop.permute.xlu1 %1138  ;;  %v2687_v34 = vsel %vm6855_vm13, %v2685_v26, %v2686_v24  ;;  %v5698_v24 = vld [vmem:[%s6859_s8 + $0x58] sm:$0xf]  ;;  %v1758_v27 = vrot.slane %v1756_v13, 5  ;;  %v1762_v28 = vrot.slane %v1760_v14, 4  ;;  %v5818_v5 = vld [vmem:[%s6859_s8 + $0x6c] sm:$0xf] }
 0x13a   : > { %1194 = vst.msk [vmem:[#allocation4 + $0x14] sm:$0xf] %vm1188_vm2, %v1139_v46  ;;  %v2721_v52 = vpop.permute.xlu0 %2720  ;;  %v1323_v46 = vrot.slane %v1231_v38, 5  ;;  %v1753_v15 = vor.u32 %v1752_v22, %v1749_v21 }
 0x13b   : > { %2523 = vrot.lane.b32.xlu1 %v2384_v42, %s6395_s17  ;;  %2779 = vst.msk [vmem:[#allocation4 + $0x8] sm:$0xf] %vm2776_vm9, %v2721_v52  ;;  %v5679_v42 = vrot.slane %v1227_v33, 9  ;;  %v5700_v33 = vld [vmem:[%s6859_s8 + $0x64] sm:$0xf] }
 0x13c   : > { %2525 = vrot.lane.b32.xlu0 %v2398_v47, %s6395_s17  ;;  %v1079_v47 = vsel %vm6886_vm15, %v1074_v35, %v1078_v36  ;;  %v1325_v59 = vrot.slane %v1323_v46, 4  ;;  %v1763_v36 = vor.u32 %v1762_v28, %v1758_v27 }
 0x13d   : > { %v2723_v61 = vpop.permute.xlu1 %2722  ;;  %v6239_v62 = vld [vmem:[#allocation4] sm:$0xff]   ;;  %v1317_v53 = vsel %vm6855_vm13, %v5679_v42, %v1316_v37  ;;  %v1766_v37 = vshll.u32 %v5728_v9, 16 }
 0x13e   : > { %2780 = vst.msk [vmem:[#allocation4 + $0xc] sm:$0xf] %vm2776_vm9, %v2723_v61  ;;  %v1141_v3 = vpop.permute.xlu0 %1140  ;;  %6111 = vmatprep.mubr.msk.bf16.mxu0 %vm8771_vm10, %v6239_v62  ;;  %v1320_v61 = vsel %vm6855_vm13, %v1318_v48, %v1319_v49  ;;  %v1324_v62 = vsel %vm6855_vm13, %v5680_v51, %v1323_v46  ;;  %v1327_v10 = vsel %vm6855_vm13, %v1325_v59, %v1326_v60  ;;  %v5757_v48 = vld [vmem:[%s6859_s8 + $0x64] sm:$0xf]  ;;  %v5755_v51 = vld [vmem:[%s6859_s8 + $0x5c] sm:$0x1] }
 0x13f   : > { %2527 = vrot.lane.b32.xlu1 %v2408_v56, %s6395_s17  ;;  %1195 = vst.msk [vmem:[#allocation4 + $0x18] sm:$0xf] %vm1188_vm2, %v1141_v3  ;;  %v1726_v56 = vshll.u32 %v5723_v45, 16  ;;  %v1764_v45 = vrot.slane %v1763_v36, 4  ;;  %v1768_v46 = vrot.slane %v1766_v37, 5  ;;  %v2006_v59 = vrot.slane %v5755_v51, 5 }
 0x140   : > { %2732 = vrot.lane.b32.xlu0 %v2677_v63, %s6396_s26  ;;  %v1732_v63 = vshll.u32 %v5724_v54, 16  ;;  %v5758_v60 = vld [vmem:[%s6859_s8 + $0x68] sm:$0x1]  ;;  %v5820_v36 = vld [vmem:[%s6859_s8 + $0x74] sm:$0x1] }
 0x141   : > { %v1143_v17 = vpop.permute.xlu1 %1142  ;;  %v1728_v3 = vrot.slane %v1726_v56, 5  ;;  %v2010_v56 = vrot.slane %v5757_v48, 5  ;;  %v2013_v7 = vrot.slane %v5758_v60, 5 }
 0x142   : > { %1196 = vst.msk [vmem:[#allocation4 + $0x1c] sm:$0xf] %vm1188_vm2, %v1143_v17  ;;  %v1351_v23 = vpop.permute.xlu0 %1350  ;;  %v5697_v17 = vld [vmem:[%s6859_s8 + $0x54] sm:$0xf] }
 0x143   : > { %2734 = vrot.lane.b32.xlu1 %v2680_v11, %s6396_s26  ;;  %1407 = vst.msk [vmem:[#allocation4 + $0x10] sm:$0xf] %vm1402_vm3, %v1351_v23  ;;  %v1734_v11 = vrot.slane %v1732_v63, 5  ;;  %v1729_v19 = vor.u32 %v1728_v3, %v1725_v2  ;;  %v2413_v2 = vshll.u32 %v5815_v55, 16  ;;  %v2012_v6 = vrot.slane %v2010_v56, 4 }
 0x144   : > { %1152 = vrot.lane.b32.xlu0 %v1045_v18, %s6390_s10  ;;  %v5725_v18 = vld [vmem:[%s6859_s8 + $0x5c] sm:$0x1] }
 0x145   : > { %v1353_v29 = vpop.permute.xlu1 %1352  ;;  %v6241_v30 = vld [vmem:[#allocation4 + $0x8] sm:$0xff]   ;;  %v1742_v26 = vshll.u32 %v5725_v18, 16  ;;  %v2434_v18 = vshrl.u32 %v5818_v5, 16  ;;  %v2014_v22 = vsel %vm6855_vm13, %v2012_v6, %v2013_v7 }
 0x146   : > { %1408 = vst.msk [vmem:[#allocation4 + $0x14] sm:$0xf] %vm1402_vm3, %v1353_v29  ;;  %v1355_v20 = vpop.permute.xlu0 %1354  ;;  %6112 = vmatmul.mubr.msk.bf16.vlgmr.msra.gmra.mxu0 %vm8771_vm10, %v6241_v30  ;;  %v5699_v30 = vld [vmem:[%s6859_s8 + $0x60] sm:$0xf] }
 0x147   : > { %1154 = vrot.lane.b32.xlu1 %v1055_v25, %s6390_s10  ;;  %1409 = vst.msk [vmem:[#allocation4 + $0x18] sm:$0xf] %vm1402_vm3, %v1355_v20  ;;  %v1739_v25 = vor.u32 %v1738_v12, %v1734_v11  ;;  %v1744_v35 = vrot.slane %v1742_v26, 5  ;;  %v2423_v12 = vshrl.u32 %v5816_v0, 16 }
 0x148   : > { %2736 = vrot.lane.b32.xlu0 %v2684_v31, %s6396_s26  ;;  %v1730_v31 = vrot.slane %v1729_v19, 4  ;;  %v2437_v19 = vshll.u32 %v5818_v5, 16 }
 0x149   : > { %v1357_v39 = vpop.permute.xlu1 %1356 }
 0x14a   : > { %1410 = vst.msk [vmem:[#allocation4 + $0x1c] sm:$0xf] %vm1402_vm3, %v1357_v39  ;;  %v1476_v44 = vpop.permute.xlu0 %1475  ;;  %v1735_v39 = vsel %vm6886_vm15, %v1730_v31, %v1734_v11  ;;  %v2419_v11 = vshll.u32 %v5816_v0, 16  ;;  %v2436_v31 = vrot.slane %v2434_v18, 4  ;;  %v2439_v9 = vrot.slane %v2437_v19, 5 }
 0x14b   : > { %2738 = vrot.lane.b32.xlu1 %v2687_v34, %s6396_s26  ;;  %1532 = vst.msk [vmem:[#allocation4 + $0x10] sm:$0xf] %vm1527_vm4, %v1476_v44  ;;  %v1740_v34 = vrot.slane %v1739_v25, 4  ;;  %v2425_v25 = vrot.slane %v2423_v12, 4 }
 0x14c   : > { %1156 = vrot.lane.b32.xlu0 %v1069_v40, %s6390_s10  ;;  %v1754_v40 = vrot.slane %v1753_v15, 4 }
 0x14d   : > { %v1478_v52 = vpop.permute.xlu1 %1477  ;;  %v1745_v44 = vsel %vm6886_vm15, %v1740_v34, %v1744_v35 }
 0x14e   : > { %1533 = vst.msk [vmem:[#allocation4 + $0x14] sm:$0xf] %vm1527_vm4, %v1478_v52  ;;  %v1480_v57 = vpop.permute.xlu0 %1479  ;;  %v1759_v50 = vsel %vm6886_vm15, %v1754_v40, %v1758_v27  ;;  %v5771_v52 = vrot.slane %v5753_v43, 9  ;;  %v2440_v43 = vor.u32 %v2439_v9, %v2436_v31 }
 0x14f   : > { %1158 = vrot.lane.b32.xlu1 %v1079_v47, %s6390_s10  ;;  %1534 = vst.msk [vmem:[#allocation4 + $0x18] sm:$0xf] %vm1527_vm4, %v1480_v57  ;;  %v2003_v47 = vrot.slane %v5754_v41, 5  ;;  %v1769_v57 = vsel %vm6886_vm15, %v1764_v45, %v1768_v46  ;;  %v5791_v41 = vld [vmem:[%s6859_s8 + $0x6c] sm:$0xf] }
 0x150   : > { %1366 = vrot.lane.b32.xlu0 %v1317_v53, %s8784_s13  ;;  %v5756_v53 = vld [vmem:[%s6859_s8 + $0x60] sm:$0xe] }
 0x151   : > { %v1482_v1 = vpop.permute.xlu1 %1481  ;;  %v2005_v58 = vrot.slane %v2003_v47, 4  ;;  %v2004_v63 = vsel %vm6855_vm13, %v5771_v52, %v2003_v47  ;;  %v2453_v47 = vshll.u32 %v5820_v36, 16 }
 0x152   : > { %1535 = vst.msk [vmem:[#allocation4 + $0x1c] sm:$0xf] %vm1527_vm4, %v1482_v1  ;;  %v1827_v8 = vpop.permute.xlu0 %1826  ;;  %v2410_v1 = vshrl.u32 %v5815_v55, 16 }
 0x153   : > { %1368 = vrot.lane.b32.xlu1 %v1320_v61, %s8784_s13  ;;  %1883 = vst.msk [vmem:[#allocation4 + $0x10] sm:$0xf] %vm1878_vm5, %v1827_v8  ;;  %v5772_v61 = vrot.slane %v5756_v53, 9  ;;  %v2007_v8 = vsel %vm6855_vm13, %v2005_v58, %v2006_v59  ;;  %v5845_v58 = vld [vmem:[%s6859_s8 + $0x60] sm:$0xe]  ;;  %v2455_v0 = vrot.slane %v2453_v47, 5 }
 0x154   : > { %1370 = vrot.lane.b32.xlu0 %v1324_v62, %s8784_s13  ;;  %v2412_v14 = vrot.slane %v2410_v1, 4  ;;  %v884_v47 = vld [vmem:[%s6859_s8 + $0x74] sm:$0x1] }
 0x155   : > { %v1829_v16 = vpop.permute.xlu1 %1828 }
 0x156   : > { %1884 = vst.msk [vmem:[#allocation4 + $0x14] sm:$0xf] %vm1878_vm5, %v1829_v16  ;;  %v1831_v23 = vpop.permute.xlu0 %1830  ;;  %v2415_v16 = vrot.slane %v2413_v2, 5  ;;  %v881_v2 = vld [vmem:[%s6859_s8 + $0x68] sm:$0x1] }
 0x157   : > { %1372 = vrot.lane.b32.xlu1 %v1327_v10, %s8784_s13  ;;  %1885 = vst.msk [vmem:[#allocation4 + $0x18] sm:$0xf] %vm1878_vm5, %v1831_v23  ;;  %v2011_v10 = vsel %vm6855_vm13, %v5772_v61, %v2010_v56  ;;  %v5817_v23 = vld [vmem:[%s6859_s8 + $0x68] sm:$0x1] }
 0x158   : > { %1491 = vrot.lane.b32.xlu0 %v5697_v17, %s8785_s30  ;;  %v5819_v17 = vld [vmem:[%s6859_s8 + $0x70] sm:$0xf]  ;;  %v2429_v34 = vshll.u32 %v5817_v23, 16  ;;  %v1100_v23 = vshll.u32 %v881_v2, 16 }
 0x159   : > { %v1833_v29 = vpop.permute.xlu1 %1832  ;;  %v2443_v26 = vshll.u32 %v5819_v17, 16  ;;  %v2447_v27 = vshrl.u32 %v5819_v17, 16  ;;  %v1237_v2 = vld [vmem:[%s6859_s8 + $0x70] sm:$0xf] }
 0x15a   : > { %1886 = vst.msk [vmem:[#allocation4 + $0x1c] sm:$0xf] %vm1878_vm5, %v1833_v29  ;;  %v2038_v20 = vpop.permute.xlu0 %2037  ;;  %v5789_v29 = vld [vmem:[%s6859_s8 + $0x60] sm:$0xf]  ;;  %v2431_v52 = vrot.slane %v2429_v34, 5  ;;  %v1102_v36 = vrot.slane %v1100_v23, 5 }
 0x15b   : > { %1493 = vrot.lane.b32.xlu1 %v5698_v24, %s8785_s30  ;;  %2094 = vst.msk [vmem:[#allocation4 + $0x10] sm:$0xf] %vm2089_vm6, %v2038_v20  ;;  %v2421_v24 = vrot.slane %v2419_v11, 5  ;;  %v879_v20 = vld [vmem:[%s6859_s8 + $0x60] sm:$0xf]  ;;  %v2445_v37 = vrot.slane %v2443_v26, 5 }
 0x15c   : > { %1495 = vrot.lane.b32.xlu0 %v5699_v30, %s8785_s30  ;;  %v2416_v30 = vor.u32 %v2415_v16, %v2412_v14  ;;  %v1084_v45 = vshll.u32 %v879_v20, 16  ;;  %v830_v11 = vld [vmem:[%s6859_s8 + $0x60] sm:$0xf]  ;;  %v883_v16 = vld [vmem:[%s6859_s8 + $0x70] sm:$0xf] }
 0x15d   : > { %v2040_v38 = vpop.permute.xlu1 %2039  ;;  %v2426_v35 = vor.u32 %v2425_v25, %v2421_v24  ;;  %851 = vst.msk [vmem:[#allocation4 + $0x40] sm:$0xf] %vm834_vm0, %v830_v11  ;;  %v5849_v26 = vld [vmem:[%s6859_s8 + $0x70] sm:$0xf]  ;;  %v5848_v34 = vld [vmem:[%s6859_s8 + $0x6c] sm:$0xe] }
 0x15e   : > { %2095 = vst.msk [vmem:[#allocation4 + $0x14] sm:$0xf] %vm2089_vm6, %v2040_v38  ;;  %v2042_v42 = vpop.permute.xlu0 %2041  ;;  %v2449_v38 = vrot.slane %v2447_v27, 4  ;;  %v1086_v60 = vrot.slane %v1084_v45, 5  ;;  %v1114_v27 = vshll.u32 %v883_v16, 16 }
 0x15f   : > { %1497 = vrot.lane.b32.xlu1 %v5700_v33, %s8785_s30  ;;  %2096 = vst.msk [vmem:[#allocation4 + $0x18] sm:$0xf] %vm2089_vm6, %v2042_v42  ;;  %v5790_v33 = vld [vmem:[%s6859_s8 + $0x64] sm:$0xf]  ;;  %v2417_v42 = vrot.slane %v2416_v30, 4  ;;  %v2427_v51 = vrot.slane %v2426_v35, 4 }
 0x160   : > { %1842 = vrot.lane.b32.xlu0 %v1735_v39, %s6392_s14  ;;  %v880_v39 = vld [vmem:[%s6859_s8 + $0x64] sm:$0xf]  ;;  %v2450_v53 = vor.u32 %v2449_v38, %v2445_v37  ;;  %v2697_v38 = vrot.slane %v5849_v26, 5  ;;  %v5729_v11 = vld [vmem:[%s6859_s8 + $0x6c] sm:$0xf] }
 0x161   : > { %v2044_v49 = vpop.permute.xlu1 %2043  ;;  %v1090_v48 = vshll.u32 %v880_v39, 16  ;;  %v2422_v56 = vsel %vm6886_vm15, %v2417_v42, %v2421_v24  ;;  %v2432_v6 = vsel %vm6886_vm15, %v2427_v51, %v2431_v52  ;;  %v833_v42 = vld [vmem:[%s6859_s8 + $0x70] sm:$0xf]  ;;  %v1771_v23 = vshrl.u32 %v5729_v11, 16  ;;  %v5732_v26 = vld [vmem:[%s6859_s8 + $0x78] sm:$0xf] }
 0x162   : > { %2097 = vst.msk [vmem:[#allocation4 + $0x1c] sm:$0xf] %vm2089_vm6, %v2044_v49  ;;  %v2163_v54 = vpop.permute.xlu0 %2162  ;;  %v1094_v49 = vshrl.u32 %v880_v39, 16  ;;  %v2451_v7 = vrot.slane %v2450_v53, 4  ;;  %v2699_v52 = vrot.slane %v2697_v38, 4 }
 0x163   : > { %1844 = vrot.lane.b32.xlu1 %v1745_v44, %s6392_s14  ;;  %2219 = vst.msk [vmem:[#allocation4 + $0x10] sm:$0xf] %vm2214_vm7, %v2163_v54  ;;  %v1081_v44 = vshrl.u32 %v879_v20, 16  ;;  %v5846_v54 = vld [vmem:[%s6859_s8 + $0x64] sm:$0xf] }
 0x164   : > { %1846 = vrot.lane.b32.xlu0 %v1759_v50, %s6392_s14  ;;  %v5792_v50 = vld [vmem:[%s6859_s8 + $0x70] sm:$0xf]  ;;  %v2690_v1 = vrot.slane %v5846_v54, 5  ;;  %v1096_v5 = vrot.slane %v1094_v49, 4  ;;  %v2456_v24 = vsel %vm6886_vm15, %v2451_v7, %v2455_v0  ;;  %854 = vst.msk [vmem:[#allocation4 + $0x4c] sm:$0xf] %vm834_vm0, %v833_v42 }
 0x165   : > { %v2165_v62 = vpop.permute.xlu1 %2164  ;;  %v1083_v59 = vrot.slane %v1081_v44, 4  ;;  %v1124_v54 = vshll.u32 %v884_v47, 16 }
 0x166   : > { %2220 = vst.msk [vmem:[#allocation4 + $0x14] sm:$0xf] %vm2214_vm7, %v2165_v62  ;;  %v2167_v3 = vpop.permute.xlu0 %2166  ;;  %v5847_v62 = vld [vmem:[%s6859_s8 + $0x68] sm:$0x1]  ;;  %v2692_v25 = vrot.slane %v2690_v1, 4 }
 0x167   : > { %1848 = vrot.lane.b32.xlu1 %v1769_v57, %s6392_s14  ;;  %2221 = vst.msk [vmem:[#allocation4 + $0x18] sm:$0xf] %vm2214_vm7, %v2167_v3  ;;  %v2441_v57 = vrot.slane %v2440_v43, 4  ;;  %v7456_v3 = vrot.slane %v1090_v48, 5  ;;  %v1087_v14 = vor.u32 %v1086_v60, %v1083_v59  ;;  %v832_v43 = vld [vmem:[%s6859_s8 + $0x6c] sm:$0xf] }
 0x168   : > { %2053 = vrot.lane.b32.xlu0 %v2004_v63, %s6393_s15  ;;  %v882_v63 = vld [vmem:[%s6859_s8 + $0x6c] sm:$0xf]  ;;  %853 = vst.msk [vmem:[#allocation4 + $0x48] sm:$0xf] %vm834_vm0, %v832_v43  ;;  %v1234_v59 = vld [vmem:[%s6859_s8 + $0x64] sm:$0xf] }
 0x169   : > { %v2169_v13 = vpop.permute.xlu1 %2168  ;;  %v1105_v17 = vshrl.u32 %v882_v63, 16  ;;  %v1108_v18 = vshll.u32 %v882_v63, 16  ;;  %v1088_v9 = vrot.slane %v1087_v14, 4  ;;  %v1126_v0 = vrot.slane %v1124_v54, 5 }
 0x16a   : > { %2222 = vst.msk [vmem:[#allocation4 + $0x1c] sm:$0xf] %vm2214_vm7, %v2169_v13  ;;  %v2514_v21 = vpop.permute.xlu0 %2513  ;;  %v2446_v13 = vsel %vm6886_vm15, %v2441_v57, %v2445_v37  ;;  %v5850_v37 = vld [vmem:[%s6859_s8 + $0x74] sm:$0x1] }
 0x16b   : > { %2055 = vrot.lane.b32.xlu1 %v2007_v8, %s6393_s15  ;;  %2570 = vst.msk [vmem:[#allocation4 + $0x10] sm:$0xf] %vm2565_vm8, %v2514_v21  ;;  %v5863_v8 = vrot.slane %v5845_v58, 9  ;;  %v2693_v21 = vrot.slane %v5847_v62, 5  ;;  %v1110_v20 = vrot.slane %v1108_v18, 5  ;;  %v1093_v45 = vsel %vm6886_vm15, %v1088_v9, %v7456_v3 }
 0x16c   : > { %2057 = vrot.lane.b32.xlu0 %v2011_v10, %s6393_s15  ;;  %v831_v10 = vld [vmem:[%s6859_s8 + $0x64] sm:$0xf] }
 0x16d   : > { %v2516_v28 = vpop.permute.xlu1 %2515  ;;  %852 = vst.msk [vmem:[#allocation4 + $0x44] sm:$0xf] %vm834_vm0, %v831_v10  ;;  %v2691_v31 = vsel %vm6855_vm13, %v5863_v8, %v2690_v1  ;;  %v2694_v39 = vsel %vm6855_vm13, %v2692_v25, %v2693_v21  ;;  %v1330_v1 = vrot.slane %v1234_v59, 5  ;;  %v1236_v8 = vld [vmem:[%s6859_s8 + $0x6c] sm:$0xe]  ;;  %vm3365_vm0 = vcmask 257024  }
 0x16e   : > { %2571 = vst.msk [vmem:[#allocation4 + $0x14] sm:$0xf] %vm2565_vm8, %v2516_v28  ;;  %v2518_v15 = vpop.permute.xlu0 %2517  ;;  %v1118_v28 = vshrl.u32 %v883_v16, 16  ;;  %v5682_v18 = vrot.slane %v1236_v8, 9  ;;  %v5759_v8 = vld [vmem:[%s6859_s8 + $0x6c] sm:$0xe] }
 0x16f   : > { %2059 = vrot.lane.b32.xlu1 %v2014_v22, %s6393_s15  ;;  %2572 = vst.msk [vmem:[#allocation4 + $0x18] sm:$0xf] %vm2565_vm8, %v2518_v15  ;;  %v1097_v22 = vor.u32 %v1096_v5, %v7456_v3  ;;  %v1107_v15 = vrot.slane %v1105_v17, 4  ;;  %v1332_v14 = vrot.slane %v1330_v1, 4  ;;  %v1238_v17 = vld [vmem:[%s6859_s8 + $0x74] sm:$0x1] }
 0x170   : > { %2178 = vrot.lane.b32.xlu0 %v5789_v29, %s6394_s16 }
 0x171   : > { %v2520_v40 = vpop.permute.xlu1 %2519  ;;  %v1098_v35 = vrot.slane %v1097_v22, 4  ;;  %v1111_v48 = vor.u32 %v1110_v20, %v1107_v15  ;;  %v5730_v22 = vld [vmem:[%s6859_s8 + $0x70] sm:$0xf]  ;;  %v1773_v20 = vrot.slane %v1771_v23, 4  ;;  %v5821_v23 = vld [vmem:[%s6859_s8 + $0x78] sm:$0xf] }
 0x172   : > { %2573 = vst.msk [vmem:[#allocation4 + $0x1c] sm:$0xf] %vm2565_vm8, %v2520_v40  ;;  %v2725_v46 = vpop.permute.xlu0 %2724  ;;  %v1116_v40 = vrot.slane %v1114_v27, 5  ;;  %v1784_v9 = vshrl.u32 %v5730_v22, 16 }
 0x173   : > { %2180 = vrot.lane.b32.xlu1 %v5790_v33, %s6394_s16  ;;  %2781 = vst.msk [vmem:[#allocation4 + $0x10] sm:$0xf] %vm2776_vm9, %v2725_v46  ;;  %v5864_v46 = vrot.slane %v5848_v34, 9  ;;  %v1103_v51 = vsel %vm6886_vm15, %v1098_v35, %v1102_v36  ;;  %v1112_v58 = vrot.slane %v1111_v48, 4  ;;  %v5733_v34 = vld [vmem:[%s6859_s8 + $0x7c] sm:$0xf] }
 0x174   : > { %2182 = vrot.lane.b32.xlu0 %v5791_v41, %s6394_s16  ;;  %v1120_v41 = vrot.slane %v1118_v28, 4  ;;  %v1340_v28 = vrot.slane %v1238_v17, 5  ;;  %v1795_v35 = vshrl.u32 %v5732_v26, 16  ;;  %v1798_v36 = vshll.u32 %v5732_v26, 16 }
 0x175   : > { %v2727_v55 = vpop.permute.xlu1 %2726  ;;  %v2698_v57 = vsel %vm6855_vm13, %v5864_v46, %v2697_v38  ;;  %v1117_v5 = vsel %vm6886_vm15, %v1112_v58, %v1116_v40  ;;  %v1808_v42 = vshrl.u32 %v5733_v34, 16  ;;  %v5734_v58 = vld [vmem:[%s6859_s8 + $0x80] sm:$0x1] }
 0x176   : > { %2782 = vst.msk [vmem:[#allocation4 + $0x14] sm:$0xf] %vm2776_vm9, %v2727_v55  ;;  %v1145_v61 = vpop.permute.xlu0 %1144  ;;  %v1121_v53 = vor.u32 %v1120_v41, %v1116_v40  ;;  %v1786_v40 = vrot.slane %v1784_v9, 4  ;;  %v1804_v41 = vshll.u32 %v5733_v34, 16  ;;  %v1797_v47 = vrot.slane %v1795_v35, 4 }
 0x177   : > { %2184 = vrot.lane.b32.xlu1 %v5792_v50, %s6394_s16  ;;  %1197 = vst.msk [vmem:[#allocation4 + $0x20] sm:$0xf] %vm1188_vm2, %v1145_v61  ;;  %v2700_v50 = vrot.slane %v5850_v37, 5  ;;  %v1233_v61 = vld [vmem:[%s6859_s8 + $0x60] sm:$0xe]  ;;  %v1800_v48 = vrot.slane %v1798_v36, 5 }
 0x178   : > { %2529 = vrot.lane.b32.xlu0 %v2422_v56, %s6395_s17  ;;  %v1122_v63 = vrot.slane %v1121_v53, 4  ;;  %v5681_v7 = vrot.slane %v1233_v61, 9  ;;  %v1806_v53 = vrot.slane %v1804_v41, 5  ;;  %v1810_v54 = vrot.slane %v1808_v42, 4  ;;  %v5704_v61 = vld [vmem:[%s6859_s8 + $0x7c] sm:$0xf] }
 0x179   : > { %v1147_v12 = vpop.permute.xlu1 %1146  ;;  %v2701_v62 = vsel %vm6855_vm13, %v2699_v52, %v2700_v50  ;;  %v5702_v50 = vld [vmem:[%s6859_s8 + $0x70] sm:$0xf]  ;;  %v1801_v59 = vor.u32 %v1800_v48, %v1797_v47  ;;  %v5822_v9 = vld [vmem:[%s6859_s8 + $0x7c] sm:$0xf]  ;;  %v5824_v34 = vld [vmem:[%s6859_s8 + $0x84] sm:$0xf] }
 0x17a   : > { %1198 = vst.msk [vmem:[#allocation4 + $0x24] sm:$0xf] %vm1188_vm2, %v1147_v12  ;;  %v2729_v19 = vpop.permute.xlu0 %2728  ;;  %v1337_v12 = vrot.slane %v1237_v2, 5  ;;  %v1331_v21 = vsel %vm6855_vm13, %v5681_v7, %v1330_v1  ;;  %v1814_v1 = vshll.u32 %v5734_v58, 16 }
 0x17b   : > { %2531 = vrot.lane.b32.xlu1 %v2432_v6, %s6395_s17  ;;  %2783 = vst.msk [vmem:[#allocation4 + $0x18] sm:$0xf] %vm2776_vm9, %v2729_v19  ;;  %v1235_v6 = vld [vmem:[%s6859_s8 + $0x68] sm:$0x1] }
 0x17c   : > { %2533 = vrot.lane.b32.xlu0 %v2446_v13, %s6395_s17  ;;  %v1127_v13 = vsel %vm6886_vm15, %v1122_v63, %v1126_v0  ;;  %v1333_v16 = vrot.slane %v1235_v6, 5  ;;  %v1339_v27 = vrot.slane %v1337_v12, 4  ;;  %v1811_v0 = vor.u32 %v1810_v54, %v1806_v53  ;;  %v5760_v6 = vld [vmem:[%s6859_s8 + $0x70] sm:$0xf]  ;;  %v5793_v54 = vld [vmem:[%s6859_s8 + $0x78] sm:$0xf] }
 0x17d   : > { %v2731_v29 = vpop.permute.xlu1 %2730  ;;  %v6242_v30 = vld [vmem:[#allocation4 + $0x10] sm:$0xff]  }
 0x17e   : > { %2784 = vst.msk [vmem:[#allocation4 + $0x1c] sm:$0xf] %vm2776_vm9, %v2731_v29  ;;  %v1149_v33 = vpop.permute.xlu0 %1148  ;;  %6115 = vmatprep.mubr.msk.bf16.mxu0 %vm8771_vm10, %v6242_v30  ;;  %v1334_v29 = vsel %vm6855_vm13, %v1332_v14, %v1333_v16  ;;  %v1338_v30 = vsel %vm6855_vm13, %v5682_v18, %v1337_v12  ;;  %v1341_v38 = vsel %vm6855_vm13, %v1339_v27, %v1340_v28  ;;  %v1816_v12 = vrot.slane %v1814_v1, 5  ;;  %v5763_v14 = vld [vmem:[%s6859_s8 + $0x7c] sm:$0xf] }
 0x17f   : > { %2535 = vrot.lane.b32.xlu1 %v2456_v24, %s6395_s17  ;;  %1199 = vst.msk [vmem:[#allocation4 + $0x28] sm:$0xf] %vm1188_vm2, %v1149_v33  ;;  %v1774_v24 = vshll.u32 %v5729_v11, 16  ;;  %v1812_v11 = vrot.slane %v1811_v0, 4  ;;  %v5761_v18 = vld [vmem:[%s6859_s8 + $0x74] sm:$0x1] }
 0x180   : > { %2740 = vrot.lane.b32.xlu0 %v2691_v31, %s6396_s26  ;;  %v1780_v31 = vshll.u32 %v5730_v22, 16  ;;  %v2020_v27 = vrot.slane %v5761_v18, 5  ;;  %v5764_v28 = vld [vmem:[%s6859_s8 + $0x80] sm:$0x1]  ;;  %v5852_v18 = vld [vmem:[%s6859_s8 + $0x7c] sm:$0xf] }
 0x181   : > { %v1151_v44 = vpop.permute.xlu1 %1150  ;;  %v1776_v33 = vrot.slane %v1774_v24, 5  ;;  %v2024_v24 = vrot.slane %v5763_v14, 5  ;;  %v2027_v36 = vrot.slane %v5764_v28, 5  ;;  %v5853_v28 = vld [vmem:[%s6859_s8 + $0x80] sm:$0x1] }
 0x182   : > { %1200 = vst.msk [vmem:[#allocation4 + $0x2c] sm:$0xf] %vm1188_vm2, %v1151_v44  ;;  %v1359_v49 = vpop.permute.xlu0 %1358  ;;  %v5701_v44 = vld [vmem:[%s6859_s8 + $0x6c] sm:$0xf] }
 0x183   : > { %2742 = vrot.lane.b32.xlu1 %v2694_v39, %s6396_s26  ;;  %1411 = vst.msk [vmem:[#allocation4 + $0x20] sm:$0xf] %vm1402_vm3, %v1359_v49  ;;  %v1782_v39 = vrot.slane %v1780_v31, 5  ;;  %v1777_v46 = vor.u32 %v1776_v33, %v1773_v20  ;;  %v2461_v20 = vshll.u32 %v5821_v23, 16  ;;  %v2026_v35 = vrot.slane %v2024_v24, 4 }
 0x184   : > { %1160 = vrot.lane.b32.xlu0 %v1093_v45, %s6390_s10  ;;  %v5731_v45 = vld [vmem:[%s6859_s8 + $0x74] sm:$0x1] }
 0x185   : > { %v1361_v55 = vpop.permute.xlu1 %1360  ;;  %v6243_v56 = vld [vmem:[#allocation4 + $0x18] sm:$0xff]   ;;  %v1790_v52 = vshll.u32 %v5731_v45, 16  ;;  %v2482_v45 = vshrl.u32 %v5824_v34, 16  ;;  %v2028_v48 = vsel %vm6855_vm13, %v2026_v35, %v2027_v36 }
 0x186   : > { %1412 = vst.msk [vmem:[#allocation4 + $0x24] sm:$0xf] %vm1402_vm3, %v1361_v55  ;;  %v1363_v60 = vpop.permute.xlu0 %1362  ;;  %6116 = vmatmul.mubr.msk.bf16.gmra.mxu0 %vm8771_vm10, %v6243_v56  ;;  %v5703_v56 = vld [vmem:[%s6859_s8 + $0x78] sm:$0xf] }
 0x187   : > { %1162 = vrot.lane.b32.xlu1 %v1103_v51, %s6390_s10  ;;  %1413 = vst.msk [vmem:[#allocation4 + $0x28] sm:$0xf] %vm1402_vm3, %v1363_v60  ;;  %v1787_v51 = vor.u32 %v1786_v40, %v1782_v39  ;;  %v1792_v63 = vrot.slane %v1790_v52, 5  ;;  %v2471_v40 = vshrl.u32 %v5822_v9, 16 }
 0x188   : > { %2744 = vrot.lane.b32.xlu0 %v2698_v57, %s6396_s26  ;;  %v1778_v57 = vrot.slane %v1777_v46, 4  ;;  %v2485_v46 = vshll.u32 %v5824_v34, 16 }
 0x189   : > { %v1365_v3 = vpop.permute.xlu1 %1364 }
 0x18a   : > { %1414 = vst.msk [vmem:[#allocation4 + $0x2c] sm:$0xf] %vm1402_vm3, %v1365_v3  ;;  %v1484_v10 = vpop.permute.xlu0 %1483  ;;  %v1783_v3 = vsel %vm6886_vm15, %v1778_v57, %v1782_v39  ;;  %v2467_v39 = vshll.u32 %v5822_v9, 16  ;;  %v2484_v57 = vrot.slane %v2482_v45, 4  ;;  %v2487_v58 = vrot.slane %v2485_v46, 5 }
 0x18b   : > { %2746 = vrot.lane.b32.xlu1 %v2701_v62, %s6396_s26  ;;  %1536 = vst.msk [vmem:[#allocation4 + $0x20] sm:$0xf] %vm1527_vm4, %v1484_v10  ;;  %v1788_v62 = vrot.slane %v1787_v51, 4  ;;  %v5854_v9 = vld [vmem:[%s6859_s8 + $0x84] sm:$0xe] }
 0x18c   : > { %1164 = vrot.lane.b32.xlu0 %v1117_v5, %s6390_s10  ;;  %v1802_v5 = vrot.slane %v1801_v59, 4 }
 0x18d   : > { %v1486_v19 = vpop.permute.xlu1 %1485  ;;  %v1793_v10 = vsel %vm6886_vm15, %v1788_v62, %v1792_v63 }
 0x18e   : > { %1537 = vst.msk [vmem:[#allocation4 + $0x24] sm:$0xf] %vm1527_vm4, %v1486_v19  ;;  %v1488_v25 = vpop.permute.xlu0 %1487  ;;  %v1807_v17 = vsel %vm6886_vm15, %v1802_v5, %v1806_v53  ;;  %v5773_v19 = vrot.slane %v5759_v8, 9  ;;  %v5826_v5 = vld [vmem:[%s6859_s8 + $0x8c] sm:$0x1] }
 0x18f   : > { %1166 = vrot.lane.b32.xlu1 %v1127_v13, %s6390_s10  ;;  %1538 = vst.msk [vmem:[#allocation4 + $0x28] sm:$0xf] %vm1527_vm4, %v1488_v25  ;;  %v2017_v13 = vrot.slane %v5760_v6, 5  ;;  %v1817_v25 = vsel %vm6886_vm15, %v1812_v11, %v1816_v12  ;;  %v2488_v6 = vor.u32 %v2487_v58, %v2484_v57  ;;  %v5796_v8 = vld [vmem:[%s6859_s8 + $0x88] sm:$0xf] }
 0x190   : > { %1374 = vrot.lane.b32.xlu0 %v1331_v21, %s8784_s13  ;;  %v5762_v21 = vld [vmem:[%s6859_s8 + $0x78] sm:$0xe] }
 0x191   : > { %v1490_v15 = vpop.permute.xlu1 %1489  ;;  %v2019_v26 = vrot.slane %v2017_v13, 4  ;;  %v2018_v31 = vsel %vm6855_vm13, %v5773_v19, %v2017_v13  ;;  %v2501_v13 = vshll.u32 %v5826_v5, 16 }
 0x192   : > { %1539 = vst.msk [vmem:[#allocation4 + $0x2c] sm:$0xf] %vm1527_vm4, %v1490_v15  ;;  %v1835_v37 = vpop.permute.xlu0 %1834  ;;  %v2458_v15 = vshrl.u32 %v5821_v23, 16 }
 0x193   : > { %1376 = vrot.lane.b32.xlu1 %v1334_v29, %s8784_s13  ;;  %1887 = vst.msk [vmem:[#allocation4 + $0x20] sm:$0xf] %vm1878_vm5, %v1835_v37  ;;  %v5774_v29 = vrot.slane %v5762_v21, 9  ;;  %v2021_v37 = vsel %vm6855_vm13, %v2019_v26, %v2020_v27  ;;  %v5851_v21 = vld [vmem:[%s6859_s8 + $0x78] sm:$0xe] }
 0x194   : > { %1378 = vrot.lane.b32.xlu0 %v1338_v30, %s8784_s13  ;;  %v2460_v42 = vrot.slane %v2458_v15, 4 }
 0x195   : > { %v1837_v43 = vpop.permute.xlu1 %1836 }
 0x196   : > { %1888 = vst.msk [vmem:[#allocation4 + $0x24] sm:$0xf] %vm1878_vm5, %v1837_v43  ;;  %v1839_v49 = vpop.permute.xlu0 %1838  ;;  %v2463_v43 = vrot.slane %v2461_v20, 5 }
 0x197   : > { %1380 = vrot.lane.b32.xlu1 %v1341_v38, %s8784_s13  ;;  %1889 = vst.msk [vmem:[#allocation4 + $0x28] sm:$0xf] %vm1878_vm5, %v1839_v49  ;;  %v2025_v38 = vsel %vm6855_vm13, %v5774_v29, %v2024_v24  ;;  %v2469_v49 = vrot.slane %v2467_v39, 5  ;;  %v2503_v24 = vrot.slane %v2501_v13, 5  ;;  %v5865_v29 = vrot.slane %v5851_v21, 9 }
 0x198   : > { %1499 = vrot.lane.b32.xlu0 %v5701_v44, %s8785_s30  ;;  %v5825_v44 = vld [vmem:[%s6859_s8 + $0x88] sm:$0xf]  ;;  %v5866_v39 = vrot.slane %v5854_v9, 9 }
 0x199   : > { %v1841_v55 = vpop.permute.xlu1 %1840  ;;  %v2491_v51 = vshll.u32 %v5825_v44, 16  ;;  %v2495_v52 = vshrl.u32 %v5825_v44, 16 }
 0x19a   : > { %1890 = vst.msk [vmem:[#allocation4 + $0x2c] sm:$0xf] %vm1878_vm5, %v1841_v55  ;;  %v2046_v60 = vpop.permute.xlu0 %2045  ;;  %v5823_v55 = vld [vmem:[%s6859_s8 + $0x80] sm:$0x1] }
 0x19b   : > { %1501 = vrot.lane.b32.xlu1 %v5702_v50, %s8785_s30  ;;  %2098 = vst.msk [vmem:[#allocation4 + $0x20] sm:$0xf] %vm2089_vm6, %v2046_v60  ;;  %v2473_v50 = vrot.slane %v2471_v40, 4  ;;  %v5794_v60 = vld [vmem:[%s6859_s8 + $0x7c] sm:$0xf]  ;;  %v2477_v62 = vshll.u32 %v5823_v55, 16 }
 0x19c   : > { %1503 = vrot.lane.b32.xlu0 %v5703_v56, %s8785_s30  ;;  %v2464_v56 = vor.u32 %v2463_v43, %v2460_v42  ;;  %v2493_v63 = vrot.slane %v2491_v51, 5  ;;  %v2497_v0 = vrot.slane %v2495_v52, 4 }
 0x19d   : > { %v2048_v2 = vpop.permute.xlu1 %2047  ;;  %v2479_v11 = vrot.slane %v2477_v62, 5 }
 0x19e   : > { %2099 = vst.msk [vmem:[#allocation4 + $0x24] sm:$0xf] %vm2089_vm6, %v2048_v2  ;;  %v2050_v7 = vpop.permute.xlu0 %2049  ;;  %v5795_v2 = vld [vmem:[%s6859_s8 + $0x84] sm:$0xf]  ;;  %v2498_v12 = vor.u32 %v2497_v0, %v2493_v63 }
 0x19f   : > { %1505 = vrot.lane.b32.xlu1 %v5704_v61, %s8785_s30  ;;  %2100 = vst.msk [vmem:[#allocation4 + $0x28] sm:$0xf] %vm2089_vm6, %v2050_v7  ;;  %v2474_v61 = vor.u32 %v2473_v50, %v2469_v49 }
 0x1a0   : > { %1850 = vrot.lane.b32.xlu0 %v1783_v3, %s6392_s14  ;;  %v2465_v3 = vrot.slane %v2464_v56, 4  ;;  %v2499_v23 = vrot.slane %v2498_v12, 4 }
 0x1a1   : > { %v2052_v16 = vpop.permute.xlu1 %2051 }
 0x1a2   : > { %2101 = vst.msk [vmem:[#allocation4 + $0x2c] sm:$0xf] %vm2089_vm6, %v2052_v16  ;;  %v2171_v22 = vpop.permute.xlu0 %2170  ;;  %v2470_v16 = vsel %vm6886_vm15, %v2465_v3, %v2469_v49  ;;  %v2504_v15 = vsel %vm6886_vm15, %v2499_v23, %v2503_v24  ;;  %v7691_v23 = vld [vmem:[%s8762_s2] ss:$0 sm:$0xff] }
 0x1a3   : > { %1852 = vrot.lane.b32.xlu1 %v1793_v10, %s6392_s14  ;;  %2223 = vst.msk [vmem:[#allocation4 + $0x20] sm:$0xf] %vm2214_vm7, %v2171_v22  ;;  %v2475_v10 = vrot.slane %v2474_v61, 4 }
 0x1a4   : > { %1854 = vrot.lane.b32.xlu0 %v1807_v17, %s6392_s14  ;;  %v2489_v17 = vrot.slane %v2488_v6, 4 }
 0x1a5   : > { %v2173_v30 = vpop.permute.xlu1 %2172  ;;  %v2480_v22 = vsel %vm6886_vm15, %v2475_v10, %v2479_v11 }
 0x1a6   : > { %2224 = vst.msk [vmem:[#allocation4 + $0x24] sm:$0xf] %vm2214_vm7, %v2173_v30  ;;  %v2175_v33 = vpop.permute.xlu0 %2174  ;;  %v2494_v27 = vsel %vm6886_vm15, %v2489_v17, %v2493_v63  ;;  %v5855_v30 = vld [vmem:[%s6859_s8 + $0x88] sm:$0xf] }
 0x1a7   : > { %1856 = vrot.lane.b32.xlu1 %v1817_v25, %s6392_s14  ;;  %2225 = vst.msk [vmem:[#allocation4 + $0x28] sm:$0xf] %vm2214_vm7, %v2175_v33  ;;  %v2704_v25 = vrot.slane %v5852_v18, 5  ;;  %v2707_v33 = vrot.slane %v5853_v28, 5  ;;  %v2711_v34 = vrot.slane %v5855_v30, 5 }
 0x1a8   : > { %2061 = vrot.lane.b32.xlu0 %v2018_v31, %s6393_s15 }
 0x1a9   : > { %v2177_v41 = vpop.permute.xlu1 %2176  ;;  %v2706_v20 = vrot.slane %v2704_v25, 4  ;;  %v2713_v42 = vrot.slane %v2711_v34, 4  ;;  %v2712_v45 = vsel %vm6855_vm13, %v5866_v39, %v2711_v34 }
 0x1aa   : > { %2226 = vst.msk [vmem:[#allocation4 + $0x2c] sm:$0xf] %vm2214_vm7, %v2177_v41  ;;  %v2522_v47 = vpop.permute.xlu0 %2521 }
 0x1ab   : > { %2063 = vrot.lane.b32.xlu1 %v2021_v37, %s6393_s15  ;;  %2574 = vst.msk [vmem:[#allocation4 + $0x20] sm:$0xf] %vm2565_vm8, %v2522_v47  ;;  %v2705_v37 = vsel %vm6855_vm13, %v5865_v29, %v2704_v25  ;;  %v2708_v41 = vsel %vm6855_vm13, %v2706_v20, %v2707_v33 }
 0x1ac   : > { %2065 = vrot.lane.b32.xlu0 %v2025_v38, %s6393_s15  ;;  %v5856_v38 = vld [vmem:[%s6859_s8 + $0x8c] sm:$0x1] }
 0x1ad   : > { %v2524_v53 = vpop.permute.xlu1 %2523  ;;  %v2714_v43 = vrot.slane %v5856_v38, 5 }
 0x1ae   : > { %2575 = vst.msk [vmem:[#allocation4 + $0x24] sm:$0xf] %vm2565_vm8, %v2524_v53  ;;  %v2526_v59 = vpop.permute.xlu0 %2525 }
 0x1af   : > { %2067 = vrot.lane.b32.xlu1 %v2028_v48, %s6393_s15  ;;  %2576 = vst.msk [vmem:[#allocation4 + $0x28] sm:$0xf] %vm2565_vm8, %v2526_v59  ;;  %v2715_v47 = vsel %vm6855_vm13, %v2713_v42, %v2714_v43 }
 0x1b0   : > { %2186 = vrot.lane.b32.xlu0 %v5793_v54, %s6394_s16 }
 0x1b1   : > { %v2528_v1 = vpop.permute.xlu1 %2527 }
 0x1b2   : > { %2577 = vst.msk [vmem:[#allocation4 + $0x2c] sm:$0xf] %vm2565_vm8, %v2528_v1  ;;  %v2733_v7 = vpop.permute.xlu0 %2732 }
 0x1b3   : > { %2188 = vrot.lane.b32.xlu1 %v5794_v60, %s6394_s16  ;;  %2785 = vst.msk [vmem:[#allocation4 + $0x20] sm:$0xf] %vm2776_vm9, %v2733_v7 }
 0x1b4   : > { %2190 = vrot.lane.b32.xlu0 %v5795_v2, %s6394_s16 }
 0x1b5   : > { %v2735_v14 = vpop.permute.xlu1 %2734 }
 0x1b6   : > { %2786 = vst.msk [vmem:[#allocation4 + $0x24] sm:$0xf] %vm2776_vm9, %v2735_v14  ;;  %v1153_v19 = vpop.permute.xlu0 %1152 }
 0x1b7   : > { %2192 = vrot.lane.b32.xlu1 %v5796_v8, %s6394_s16  ;;  %1201 = vst.msk [vmem:[#allocation4 + $0x30] sm:$0xf] %vm1188_vm2, %v1153_v19 }
 0x1b8   : > { %2537 = vrot.lane.b32.xlu0 %v2470_v16, %s6395_s17 }
 0x1b9   : > { %v1155_v26 = vpop.permute.xlu1 %1154 }
 0x1ba   : > { %1202 = vst.msk [vmem:[#allocation4 + $0x34] sm:$0xf] %vm1188_vm2, %v1155_v26  ;;  %v2737_v31 = vpop.permute.xlu0 %2736 }
 0x1bb   : > { %2539 = vrot.lane.b32.xlu1 %v2480_v22, %s6395_s17  ;;  %2787 = vst.msk [vmem:[#allocation4 + $0x28] sm:$0xf] %vm2776_vm9, %v2737_v31 }
 0x1bc   : > { %2541 = vrot.lane.b32.xlu0 %v2494_v27, %s6395_s17 }
 0x1bd   : > { %v2739_v35 = vpop.permute.xlu1 %2738  ;;  %v6244_v36 = vld [vmem:[#allocation4 + $0x20] sm:$0xff]  }
 0x1be   : > { %2788 = vst.msk [vmem:[#allocation4 + $0x2c] sm:$0xf] %vm2776_vm9, %v2739_v35  ;;  %v1157_v40 = vpop.permute.xlu0 %1156  ;;  %6119 = vmatprep.mubr.msk.bf16.mxu0 %vm8771_vm10, %v6244_v36 }
 0x1bf   : > { %2543 = vrot.lane.b32.xlu1 %v2504_v15, %s6395_s17  ;;  %1203 = vst.msk [vmem:[#allocation4 + $0x38] sm:$0xf] %vm1188_vm2, %v1157_v40 }
 0x1c0   : > { %2748 = vrot.lane.b32.xlu0 %v2705_v37, %s6396_s26 }
 0x1c1   : > { %v1159_v44 = vpop.permute.xlu1 %1158 }
 0x1c2   : > { %1204 = vst.msk [vmem:[#allocation4 + $0x3c] sm:$0xf] %vm1188_vm2, %v1159_v44  ;;  %v1367_v46 = vpop.permute.xlu0 %1366 }
 0x1c3   : > { %2750 = vrot.lane.b32.xlu1 %v2708_v41, %s6396_s26  ;;  %1415 = vst.msk [vmem:[#allocation4 + $0x30] sm:$0xf] %vm1402_vm3, %v1367_v46 }
 0x1c4   : > { %2752 = vrot.lane.b32.xlu0 %v2712_v45, %s6396_s26 }
 0x1c5   : > { %v1369_v48 = vpop.permute.xlu1 %1368  ;;  %v6245_v49 = vld [vmem:[#allocation4 + $0x28] sm:$0xff]  }
 0x1c6   : > { %1416 = vst.msk [vmem:[#allocation4 + $0x34] sm:$0xf] %vm1402_vm3, %v1369_v48  ;;  %v1371_v50 = vpop.permute.xlu0 %1370  ;;  %6120 = vmatmul.mubr.msk.bf16.gmra.mxu0 %vm8771_vm10, %v6245_v49  ;;  %v3378_v48 = vld [vmem:[#allocation3 + $0xc] sm:$0xf] }
 0x1c7   : > { %2754 = vrot.lane.b32.xlu1 %v2715_v47, %s6396_s26  ;;  %1417 = vst.msk [vmem:[#allocation4 + $0x38] sm:$0xf] %vm1402_vm3, %v1371_v50 }
 0x1c9   : > { %v1373_v51 = vpop.permute.xlu1 %1372 }
 0x1ca   : > { %1418 = vst.msk [vmem:[#allocation4 + $0x3c] sm:$0xf] %vm1402_vm3, %v1373_v51  ;;  %v1492_v52 = vpop.permute.xlu0 %1491 }
 0x1cb   : > { %1540 = vst.msk [vmem:[#allocation4 + $0x30] sm:$0xf] %vm1527_vm4, %v1492_v52 }
 0x1cd   : > { %v1494_v53 = vpop.permute.xlu1 %1493 }
 0x1ce   : > { %1541 = vst.msk [vmem:[#allocation4 + $0x34] sm:$0xf] %vm1527_vm4, %v1494_v53  ;;  %v1496_v54 = vpop.permute.xlu0 %1495 }
 0x1cf   : > { %1542 = vst.msk [vmem:[#allocation4 + $0x38] sm:$0xf] %vm1527_vm4, %v1496_v54 }
 0x1d1   : > { %v1498_v55 = vpop.permute.xlu1 %1497 }
 0x1d2   : > { %1543 = vst.msk [vmem:[#allocation4 + $0x3c] sm:$0xf] %vm1527_vm4, %v1498_v55  ;;  %v1843_v56 = vpop.permute.xlu0 %1842 }
 0x1d3   : > { %1891 = vst.msk [vmem:[#allocation4 + $0x30] sm:$0xf] %vm1878_vm5, %v1843_v56 }
 0x1d5   : > { %v1845_v57 = vpop.permute.xlu1 %1844 }
 0x1d6   : > { %1892 = vst.msk [vmem:[#allocation4 + $0x34] sm:$0xf] %vm1878_vm5, %v1845_v57  ;;  %v1847_v58 = vpop.permute.xlu0 %1846 }
 0x1d7   : > { %1893 = vst.msk [vmem:[#allocation4 + $0x38] sm:$0xf] %vm1878_vm5, %v1847_v58 }
 0x1d9   : > { %v1849_v59 = vpop.permute.xlu1 %1848 }
 0x1da   : > { %1894 = vst.msk [vmem:[#allocation4 + $0x3c] sm:$0xf] %vm1878_vm5, %v1849_v59  ;;  %v2054_v60 = vpop.permute.xlu0 %2053  ;;  %v3368_v59 = vld [vmem:[#allocation3] sm:$0xf] }
 0x1db   : > { %2102 = vst.msk [vmem:[#allocation4 + $0x30] sm:$0xf] %vm2089_vm6, %v2054_v60 }
 0x1dd   : > { %v2056_v61 = vpop.permute.xlu1 %2055 }
 0x1de   : > { %2103 = vst.msk [vmem:[#allocation4 + $0x34] sm:$0xf] %vm2089_vm6, %v2056_v61  ;;  %v2058_v62 = vpop.permute.xlu0 %2057 }
 0x1df   : > { %2104 = vst.msk [vmem:[#allocation4 + $0x38] sm:$0xf] %vm2089_vm6, %v2058_v62 }
 0x1e1   : > { %v2060_v63 = vpop.permute.xlu1 %2059 }
 0x1e2   : > { %2105 = vst.msk [vmem:[#allocation4 + $0x3c] sm:$0xf] %vm2089_vm6, %v2060_v63  ;;  %v2179_v0 = vpop.permute.xlu0 %2178 }
 0x1e3   : > { %2227 = vst.msk [vmem:[#allocation4 + $0x30] sm:$0xf] %vm2214_vm7, %v2179_v0 }
 0x1e5   : > { %v2181_v1 = vpop.permute.xlu1 %2180 }
 0x1e6   : > { %2228 = vst.msk [vmem:[#allocation4 + $0x34] sm:$0xf] %vm2214_vm7, %v2181_v1  ;;  %v2183_v2 = vpop.permute.xlu0 %2182 }
 0x1e7   : > { %2229 = vst.msk [vmem:[#allocation4 + $0x38] sm:$0xf] %vm2214_vm7, %v2183_v2 }
 0x1e9   : > { %v2185_v3 = vpop.permute.xlu1 %2184 }
 0x1ea   : > { %2230 = vst.msk [vmem:[#allocation4 + $0x3c] sm:$0xf] %vm2214_vm7, %v2185_v3  ;;  %v2530_v5 = vpop.permute.xlu0 %2529 }
 0x1eb   : > { %2578 = vst.msk [vmem:[#allocation4 + $0x30] sm:$0xf] %vm2565_vm8, %v2530_v5  ;;  %v3382_v5 = vld [vmem:[#allocation3 + $0x14] sm:$0x1] }
 0x1ed   : > { %v2532_v6 = vpop.permute.xlu1 %2531 }
 0x1ee   : > { %2579 = vst.msk [vmem:[#allocation4 + $0x34] sm:$0xf] %vm2565_vm8, %v2532_v6  ;;  %v2534_v7 = vpop.permute.xlu0 %2533 }
 0x1ef   : > { %2580 = vst.msk [vmem:[#allocation4 + $0x38] sm:$0xf] %vm2565_vm8, %v2534_v7 }
 0x1f1   : > { %v2536_v8 = vpop.permute.xlu1 %2535 }
 0x1f2   : > { %2581 = vst.msk [vmem:[#allocation4 + $0x3c] sm:$0xf] %vm2565_vm8, %v2536_v8  ;;  %v2741_v10 = vpop.permute.xlu0 %2740 }
 0x1f3   : > { %2789 = vst.msk [vmem:[#allocation4 + $0x30] sm:$0xf] %vm2776_vm9, %v2741_v10 }
 0x1f5   : > { %v2743_v11 = vpop.permute.xlu1 %2742 }
 0x1f6   : > { %2790 = vst.msk [vmem:[#allocation4 + $0x34] sm:$0xf] %vm2776_vm9, %v2743_v11  ;;  %v1161_v12 = vpop.permute.xlu0 %1160 }
 0x1f7   : > { %1205 = vst.msk [vmem:[#allocation4 + $0x40] sm:$0xf] %vm1188_vm2, %v1161_v12 }
 0x1f9   : > { %v1163_v13 = vpop.permute.xlu1 %1162 }
 0x1fa   : > { %1206 = vst.msk [vmem:[#allocation4 + $0x44] sm:$0xf] %vm1188_vm2, %v1163_v13  ;;  %v2745_v14 = vpop.permute.xlu0 %2744 }
 0x1fb   : > { %2791 = vst.msk [vmem:[#allocation4 + $0x38] sm:$0xf] %vm2776_vm9, %v2745_v14 }
 0x1fd   : > { %v2747_v16 = vpop.permute.xlu1 %2746  ;;  %v6246_v17 = vld [vmem:[#allocation4 + $0x30] sm:$0xff]  }
 0x1fe   : > { %2792 = vst.msk [vmem:[#allocation4 + $0x3c] sm:$0xf] %vm2776_vm9, %v2747_v16  ;;  %v1165_v18 = vpop.permute.xlu0 %1164  ;;  %6123 = vmatprep.mubr.msk.bf16.mxu0 %vm8771_vm10, %v6246_v17 }
 0x1ff   : > { %1207 = vst.msk [vmem:[#allocation4 + $0x48] sm:$0xf] %vm1188_vm2, %v1165_v18  ;;  %v3375_v18 = vld [vmem:[#allocation3 + $0x8] sm:$0x1] }
 0x201   : > { %v1167_v19 = vpop.permute.xlu1 %1166 }
 0x202   : > { %1208 = vst.msk [vmem:[#allocation4 + $0x4c] sm:$0xf] %vm1188_vm2, %v1167_v19  ;;  %v1375_v21 = vpop.permute.xlu0 %1374 }
 0x203   : > { %1419 = vst.msk [vmem:[#allocation4 + $0x40] sm:$0xf] %vm1402_vm3, %v1375_v21 }
 0x205   : > { %v1377_v22 = vpop.permute.xlu1 %1376  ;;  %v6247_v24 = vld [vmem:[#allocation4 + $0x38] sm:$0xff]  }
 0x206   : > { %1420 = vst.msk [vmem:[#allocation4 + $0x44] sm:$0xf] %vm1402_vm3, %v1377_v22  ;;  %v1379_v25 = vpop.permute.xlu0 %1378  ;;  %v6113_v26 = vpop.f32.mrf.mxu0  ;;  %6124 = vmatmul.mubr.msk.bf16.gmra.mxu0 %vm8771_vm10, %v6247_v24  ;;  %vm3373_vm10 = vcmask 253952  }
 0x207   : > { %1421 = vst.msk [vmem:[#allocation4 + $0x48] sm:$0xf] %vm1402_vm3, %v1379_v25  ;;  %v2972_v27 = vadd.f32 %v6113_v26, %v7691_v23 }
 0x208   : > { %v2963_v29 = vpop.f32.mrf.mxu0 }
 0x209   : > { %v1381_v28 = vpop.permute.xlu1 %1380  ;;  %vm3044_vm11 = vcmp.ge.f32.partialorder %v2972_v27, 0.0  ;;  %v3064_v30 = vmul.f32 0.01, %v2972_v27  ;;  %v2964_v31 = vadd.f32 %v7691_v23, %v2963_v29 }
 0x20a   : > { %1422 = vst.msk [vmem:[#allocation4 + $0x4c] sm:$0xf] %vm1402_vm3, %v1381_v28  ;;  %v1500_v9 = vpop.permute.xlu0 %1499  ;;  %v6114_v15 = vpop.f32.mrf.mxu0  ;;  %vm7705_vm3 = vmand %vm3365_vm0, %vm3366_vm1 }
 0x20b   : > { %1544 = vst.msk [vmem:[#allocation4 + $0x40] sm:$0xf] %vm1527_vm4, %v1500_v9  ;;  %v3084_v20 = vsel %vm3044_vm11, %v2972_v27, %v3064_v30  ;;  %vm3042_vm12 = vcmp.ge.f32.partialorder %v2964_v31, 0.0  ;;  %v3062_v33 = vmul.f32 0.01, %v2964_v31  ;;  %v2975_v34 = vadd.f32 %v6114_v15, %v7691_v23 }
 0x20c   : > { %v5999_v35 = vpack.c.bf16 %v3084_v20, %v3084_v20  ;;  %v2966_v37 = vpop.f32.mrf.mxu0  ;;  %vm3162_vm11 = vsmask.f32 256 }
 0x20d   : > { %v1502_v36 = vpop.permute.xlu1 %1501  ;;  %v3082_v38 = vsel %vm3042_vm12, %v2964_v31, %v3062_v33  ;;  %vm3045_vm14 = vcmp.ge.f32.partialorder %v2975_v34, 0.0  ;;  %v3065_v39 = vmul.f32 0.01, %v2975_v34  ;;  %v2967_v40 = vadd.f32 %v7691_v23, %v2966_v37 }
 0x20e   : > { %1545 = vst.msk [vmem:[#allocation4 + $0x44] sm:$0xf] %vm1527_vm4, %v1502_v36  ;;  %v1504_v41 = vpop.permute.xlu0 %1503  ;;  %v3183_v42 = vshrl.u32 %v5999_v35, 16  ;;  %v5997_v43 = vpack.c.bf16 %v3082_v38, %v3082_v38  ;;  %v3186_v47 = vshll.u32 %v5999_v35, 16  ;;  %vm3163_vm12 = vsmask.f32 4368 }
 0x20f   : > { %1546 = vst.msk [vmem:[#allocation4 + $0x48] sm:$0xf] %vm1527_vm4, %v1504_v41  ;;  %v3085_v44 = vsel %vm3045_vm14, %v2975_v34, %v3065_v39  ;;  %vm3043_vm2 = vcmp.ge.f32.partialorder %v2967_v40, 0.0  ;;  %v3063_v45 = vmul.f32 0.01, %v2967_v40  ;;  %vm7714_vm14 = vmor %vm3162_vm11, %vm3163_vm12 }
 0x210   : > { %v3185_v46 = vrot.slane %v3183_v42, 7  ;;  %v3166_v49 = vshrl.u32 %v5997_v43, 16  ;;  %v6000_v50 = vpack.c.bf16 %v3085_v44, %v3085_v44  ;;  %v3169_v57 = vshll.u32 %v5997_v43, 16 }
 0x211   : > { %v1506_v51 = vpop.permute.xlu1 %1505  ;;  %v3083_v53 = vsel %vm3043_vm2, %v2967_v40, %v3063_v45 }
 0x212   : > { %1547 = vst.msk [vmem:[#allocation4 + $0x4c] sm:$0xf] %vm1527_vm4, %v1506_v51  ;;  %v1851_v54 = vpop.permute.xlu0 %1850  ;;  %v3188_v55 = vor.u32 %v3186_v47, %v3185_v46  ;;  %v3168_v56 = vrot.slane %v3166_v49, 7  ;;  %v3191_v58 = vshrl.u32 %v6000_v50, 16  ;;  %v5998_v60 = vpack.c.bf16 %v3083_v53, %v3083_v53  ;;  %vm7720_vm4 = vmand %vm3373_vm10, %vm3162_vm11 }
 0x213   : > { %1895 = vst.msk [vmem:[#allocation4 + $0x40] sm:$0xf] %vm1878_vm5, %v1851_v54  ;;  %v3194_v1 = vshll.u32 %v6000_v50, 16  ;;  %v3189_v8 = vrot.slane %v3185_v46, 4 }
 0x214   : > { %v3379_v61 = vsel %vm7705_vm3, %v3188_v55, %v3378_v48  ;;  %v3171_v62 = vor.u32 %v3169_v57, %v3168_v56  ;;  %v3193_v0 = vrot.slane %v3191_v58, 7  ;;  %v3174_v6 = vshrl.u32 %v5998_v60, 16 }
 0x215   : > { %v1853_v2 = vpop.permute.xlu1 %1852  ;;  %3380 = vst [vmem:[#allocation3 + $0xc] sm:$0xf] %v3379_v61  ;;  %v3177_v14 = vshll.u32 %v5998_v60, 16  ;;  %v3172_v21 = vrot.slane %v3168_v56, 4 }
 0x216   : > { %1896 = vst.msk [vmem:[#allocation4 + $0x44] sm:$0xf] %vm1878_vm5, %v1853_v2  ;;  %v1855_v7 = vpop.permute.xlu0 %1854  ;;  %v3369_v10 = vsel %vm7705_vm3, %v3171_v62, %v3368_v59  ;;  %v3196_v11 = vor.u32 %v3194_v1, %v3193_v0  ;;  %v3198_v12 = vrot.slane %v3193_v0, 4  ;;  %v3176_v13 = vrot.slane %v3174_v6, 7 }
 0x217   : > { %1897 = vst.msk [vmem:[#allocation4 + $0x48] sm:$0xf] %vm1878_vm5, %v1855_v7  ;;  %3370 = vst [vmem:[#allocation3] sm:$0xf] %v3369_v10 }
 0x218   : > { %v3197_v16 = vsel %vm7714_vm14, %v3189_v8, %v3196_v11  ;;  %v3383_v17 = vsel %vm7720_vm4, %v3198_v12, %v3382_v5  ;;  %v3179_v22 = vor.u32 %v3177_v14, %v3176_v13  ;;  %v3181_v24 = vrot.slane %v3176_v13, 4  ;;  %v3392_v5 = vld [vmem:[#allocation3 + $0x24] sm:$0xf]  ;;  %v3385_v12 = vld [vmem:[#allocation3 + $0x18] sm:$0xf] }
 0x219   : > { %v1857_v19 = vpop.permute.xlu1 %1856  ;;  %3381 = vst.msk [vmem:[#allocation3 + $0x10] sm:$0xf] %vm3365_vm0, %v3197_v16  ;;  %3384 = vst [vmem:[#allocation3 + $0x14] sm:$0x1] %v3383_v17 }
 0x21a   : > { %1898 = vst.msk [vmem:[#allocation4 + $0x4c] sm:$0xf] %vm1878_vm5, %v1857_v19  ;;  %v2062_v25 = vpop.permute.xlu0 %2061  ;;  %v3180_v26 = vsel %vm7714_vm14, %v3172_v21, %v3179_v22  ;;  %v3376_v27 = vsel %vm7720_vm4, %v3181_v24, %v3375_v18  ;;  %vm8792_vm5 = vcmask 293888   ;;  %v3396_v19 = vld [vmem:[#allocation3 + $0x2c] sm:$0x1] }
 0x21b   : > { %2106 = vst.msk [vmem:[#allocation4 + $0x40] sm:$0xf] %vm2089_vm6, %v2062_v25  ;;  %3377 = vst [vmem:[#allocation3 + $0x8] sm:$0x1] %v3376_v27 }
 0x21c   : > { %3372 = vst.msk [vmem:[#allocation3 + $0x4] sm:$0xf] %vm3365_vm0, %v3180_v26 }
 0x21d   : > { %v2064_v28 = vpop.permute.xlu1 %2063 }
 0x21e   : > { %2107 = vst.msk [vmem:[#allocation4 + $0x44] sm:$0xf] %vm2089_vm6, %v2064_v28  ;;  %v2066_v29 = vpop.permute.xlu0 %2065 }
 0x21f   : > { %2108 = vst.msk [vmem:[#allocation4 + $0x48] sm:$0xf] %vm2089_vm6, %v2066_v29 }
 0x221   : > { %v2068_v30 = vpop.permute.xlu1 %2067 }
 0x222   : > { %2109 = vst.msk [vmem:[#allocation4 + $0x4c] sm:$0xf] %vm2089_vm6, %v2068_v30  ;;  %v2187_v31 = vpop.permute.xlu0 %2186  ;;  %vm8793_vm6 = vmmov %vm8792_vm5 }
 0x223   : > { %2231 = vst.msk [vmem:[#allocation4 + $0x40] sm:$0xf] %vm2214_vm7, %v2187_v31  ;;  %v3389_v31 = vld [vmem:[#allocation3 + $0x20] sm:$0x1] }
 0x225   : > { %v2189_v9 = vpop.permute.xlu1 %2188 }
 0x226   : > { %2232 = vst.msk [vmem:[#allocation4 + $0x44] sm:$0xf] %vm2214_vm7, %v2189_v9  ;;  %v2191_v15 = vpop.permute.xlu0 %2190 }
 0x227   : > { %2233 = vst.msk [vmem:[#allocation4 + $0x48] sm:$0xf] %vm2214_vm7, %v2191_v15 }
 0x229   : > { %v2193_v20 = vpop.permute.xlu1 %2192 }
 0x22a   : > { %2234 = vst.msk [vmem:[#allocation4 + $0x4c] sm:$0xf] %vm2214_vm7, %v2193_v20  ;;  %v2538_v33 = vpop.permute.xlu0 %2537 }
 0x22b   : > { %2582 = vst.msk [vmem:[#allocation4 + $0x40] sm:$0xf] %vm2565_vm8, %v2538_v33 }
 0x22d   : > { %v2540_v34 = vpop.permute.xlu1 %2539 }
 0x22e   : > { %2583 = vst.msk [vmem:[#allocation4 + $0x44] sm:$0xf] %vm2565_vm8, %v2540_v34  ;;  %v2542_v35 = vpop.permute.xlu0 %2541 }
 0x22f   : > { %2584 = vst.msk [vmem:[#allocation4 + $0x48] sm:$0xf] %vm2565_vm8, %v2542_v35 }
 0x231   : > { %v2544_v36 = vpop.permute.xlu1 %2543 }
 0x232   : > { %2585 = vst.msk [vmem:[#allocation4 + $0x4c] sm:$0xf] %vm2565_vm8, %v2544_v36  ;;  %v2749_v37 = vpop.permute.xlu0 %2748 }
 0x233   : > { %2793 = vst.msk [vmem:[#allocation4 + $0x40] sm:$0xf] %vm2776_vm9, %v2749_v37 }
 0x235   : > { %v2751_v38 = vpop.permute.xlu1 %2750 }
 0x236   : > { %2794 = vst.msk [vmem:[#allocation4 + $0x44] sm:$0xf] %vm2776_vm9, %v2751_v38  ;;  %v2753_v39 = vpop.permute.xlu0 %2752 }
 0x237   : > { %2795 = vst.msk [vmem:[#allocation4 + $0x48] sm:$0xf] %vm2776_vm9, %v2753_v39 }
 0x239   : > { %v2755_v40 = vpop.permute.xlu1 %2754 }
 0x23a   : > { %2796 = vst.msk [vmem:[#allocation4 + $0x4c] sm:$0xf] %vm2776_vm9, %v2755_v40 }
 0x23d   : > { %v6248_v41 = vld [vmem:[#allocation4 + $0x40] sm:$0xff]  }
 0x23e   : > { %6127 = vmatprep.mubr.msk.bf16.mxu0 %vm8792_vm5, %v6248_v41 }
 0x241   : > { %v6249_v42 = vld [vmem:[#allocation4 + $0x48] sm:$0xff]  }
 0x242   : > { %6128 = vmatmul.mubr.msk.bf16.gmra.mxu0 %vm8793_vm6, %v6249_v42 }
 0x246   : > { %v6117_v43 = vpop.f32.mrf.mxu0 }
 0x247   : > { %v2988_v44 = vadd.f32 %v6117_v43, %v7691_v23 }
 0x248   : > { %v2979_v45 = vpop.f32.mrf.mxu0 }
 0x249   : > { %vm3048_vm7 = vcmp.ge.f32.partialorder %v2988_v44, 0.0  ;;  %v3068_v46 = vmul.f32 0.01, %v2988_v44  ;;  %v2980_v47 = vadd.f32 %v7691_v23, %v2979_v45 }
 0x24a   : > { %v6118_v48 = vpop.f32.mrf.mxu0 }
 0x24b   : > { %v3088_v49 = vsel %vm3048_vm7, %v2988_v44, %v3068_v46  ;;  %vm3046_vm8 = vcmp.ge.f32.partialorder %v2980_v47, 0.0  ;;  %v3066_v50 = vmul.f32 0.01, %v2980_v47  ;;  %v2991_v51 = vadd.f32 %v6118_v48, %v7691_v23 }
 0x24c   : > { %v6003_v53 = vpack.c.bf16 %v3088_v49, %v3088_v49  ;;  %v2982_v54 = vpop.f32.mrf.mxu0 }
 0x24d   : > { %v3086_v55 = vsel %vm3046_vm8, %v2980_v47, %v3066_v50  ;;  %vm3049_vm9 = vcmp.ge.f32.partialorder %v2991_v51, 0.0  ;;  %v3069_v56 = vmul.f32 0.01, %v2991_v51  ;;  %v2983_v57 = vadd.f32 %v7691_v23, %v2982_v54 }
 0x24e   : > { %v3217_v58 = vshrl.u32 %v6003_v53, 16  ;;  %v6001_v59 = vpack.c.bf16 %v3086_v55, %v3086_v55  ;;  %v3220_v0 = vshll.u32 %v6003_v53, 16 }
 0x24f   : > { %v3089_v60 = vsel %vm3049_vm9, %v2991_v51, %v3069_v56  ;;  %vm3047_vm10 = vcmp.ge.f32.partialorder %v2983_v57, 0.0  ;;  %v3067_v61 = vmul.f32 0.01, %v2983_v57 }
 0x250   : > { %v3219_v62 = vrot.slane %v3217_v58, 7  ;;  %v3200_v1 = vshrl.u32 %v6001_v59, 16  ;;  %v6004_v2 = vpack.c.bf16 %v3089_v60, %v3089_v60  ;;  %v3203_v10 = vshll.u32 %v6001_v59, 16  ;;  %v3406_v58 = vld [vmem:[#allocation3 + $0x3c] sm:$0xf] }
 0x251   : > { %v3087_v6 = vsel %vm3047_vm10, %v2983_v57, %v3067_v61 }
 0x252   : > { %v3222_v7 = vor.u32 %v3220_v0, %v3219_v62  ;;  %v3202_v8 = vrot.slane %v3200_v1, 7  ;;  %v3225_v11 = vshrl.u32 %v6004_v2, 16  ;;  %v6002_v13 = vpack.c.bf16 %v3087_v6, %v3087_v6  ;;  %v3399_v1 = vld [vmem:[#allocation3 + $0x30] sm:$0xf] }
 0x253   : > { %v3228_v18 = vshll.u32 %v6004_v2, 16  ;;  %v3223_v22 = vrot.slane %v3219_v62, 4 }
 0x254   : > { %v3393_v14 = vsel %vm7705_vm3, %v3222_v7, %v3392_v5  ;;  %v3205_v16 = vor.u32 %v3203_v10, %v3202_v8  ;;  %v3227_v17 = vrot.slane %v3225_v11, 7  ;;  %v3208_v21 = vshrl.u32 %v6002_v13, 16  ;;  %v3410_v10 = vld [vmem:[#allocation3 + $0x44] sm:$0x1] }
 0x255   : > { %3394 = vst [vmem:[#allocation3 + $0x24] sm:$0xf] %v3393_v14  ;;  %v3211_v28 = vshll.u32 %v6002_v13, 16  ;;  %v3206_v9 = vrot.slane %v3202_v8, 4 }
 0x256   : > { %v3386_v24 = vsel %vm7705_vm3, %v3205_v16, %v3385_v12  ;;  %v3230_v25 = vor.u32 %v3228_v18, %v3227_v17  ;;  %v3232_v26 = vrot.slane %v3227_v17, 4  ;;  %v3210_v27 = vrot.slane %v3208_v21, 7 }
 0x257   : > { %3387 = vst [vmem:[#allocation3 + $0x18] sm:$0xf] %v3386_v24 }
 0x258   : > { %v3231_v29 = vsel %vm7714_vm14, %v3223_v22, %v3230_v25  ;;  %v3397_v30 = vsel %vm7720_vm4, %v3232_v26, %v3396_v19  ;;  %v3213_v15 = vor.u32 %v3211_v28, %v3210_v27  ;;  %v3215_v20 = vrot.slane %v3210_v27, 4  ;;  %v3403_v22 = vld [vmem:[#allocation3 + $0x38] sm:$0x1] }
 0x259   : > { %3395 = vst.msk [vmem:[#allocation3 + $0x28] sm:$0xf] %vm3365_vm0, %v3231_v29  ;;  %3398 = vst [vmem:[#allocation3 + $0x2c] sm:$0x1] %v3397_v30 }
 0x25a   : > { %v3214_v33 = vsel %vm7714_vm14, %v3206_v9, %v3213_v15  ;;  %v3390_v34 = vsel %vm7720_vm4, %v3215_v20, %v3389_v31 }
 0x25b   : > { %3388 = vst.msk [vmem:[#allocation3 + $0x1c] sm:$0xf] %vm3365_vm0, %v3214_v33  ;;  %3391 = vst [vmem:[#allocation3 + $0x20] sm:$0x1] %v3390_v34 }
 0x286   : > { %v6121_v35 = vpop.f32.mrf.mxu0 }
 0x287   : > { %v3004_v36 = vadd.f32 %v6121_v35, %v7691_v23 }
 0x288   : > { %v2995_v37 = vpop.f32.mrf.mxu0 }
 0x289   : > { %vm3052_vm1 = vcmp.ge.f32.partialorder %v3004_v36, 0.0  ;;  %v3072_v38 = vmul.f32 0.01, %v3004_v36  ;;  %v2996_v39 = vadd.f32 %v7691_v23, %v2995_v37 }
 0x28a   : > { %v6122_v40 = vpop.f32.mrf.mxu0 }
 0x28b   : > { %v3092_v41 = vsel %vm3052_vm1, %v3004_v36, %v3072_v38  ;;  %vm3050_vm2 = vcmp.ge.f32.partialorder %v2996_v39, 0.0  ;;  %v3070_v42 = vmul.f32 0.01, %v2996_v39  ;;  %v3007_v43 = vadd.f32 %v6122_v40, %v7691_v23 }
 0x28c   : > { %v6007_v44 = vpack.c.bf16 %v3092_v41, %v3092_v41  ;;  %v2998_v45 = vpop.f32.mrf.mxu0 }
 0x28d   : > { %v3090_v46 = vsel %vm3050_vm2, %v2996_v39, %v3070_v42  ;;  %vm3053_vm11 = vcmp.ge.f32.partialorder %v3007_v43, 0.0  ;;  %v3073_v47 = vmul.f32 0.01, %v3007_v43  ;;  %v2999_v48 = vadd.f32 %v7691_v23, %v2998_v45 }
 0x28e   : > { %v3251_v49 = vshrl.u32 %v6007_v44, 16  ;;  %v6005_v50 = vpack.c.bf16 %v3090_v46, %v3090_v46  ;;  %v3254_v55 = vshll.u32 %v6007_v44, 16 }
 0x28f   : > { %v3093_v51 = vsel %vm3053_vm11, %v3007_v43, %v3073_v47  ;;  %vm3051_vm12 = vcmp.ge.f32.partialorder %v2999_v48, 0.0  ;;  %v3071_v53 = vmul.f32 0.01, %v2999_v48 }
 0x290   : > { %v3253_v54 = vrot.slane %v3251_v49, 7  ;;  %v3234_v56 = vshrl.u32 %v6005_v50, 16  ;;  %v6008_v57 = vpack.c.bf16 %v3093_v51, %v3093_v51  ;;  %v3237_v62 = vshll.u32 %v6005_v50, 16  ;;  %v3420_v49 = vld [vmem:[#allocation3 + $0x54] sm:$0xf] }
 0x291   : > { %v3091_v59 = vsel %vm3051_vm12, %v2999_v48, %v3071_v53 }
 0x292   : > { %v3256_v60 = vor.u32 %v3254_v55, %v3253_v54  ;;  %v3236_v61 = vrot.slane %v3234_v56, 7  ;;  %v3259_v0 = vshrl.u32 %v6008_v57, 16  ;;  %v6006_v2 = vpack.c.bf16 %v3091_v59, %v3091_v59  ;;  %v3413_v56 = vld [vmem:[#allocation3 + $0x48] sm:$0xf] }
 0x293   : > { %v3262_v8 = vshll.u32 %v6008_v57, 16  ;;  %v3257_v12 = vrot.slane %v3253_v54, 4 }
 0x294   : > { %v3407_v5 = vsel %vm7705_vm3, %v3256_v60, %v3406_v58  ;;  %v3239_v6 = vor.u32 %v3237_v62, %v3236_v61  ;;  %v3261_v7 = vrot.slane %v3259_v0, 7  ;;  %v3242_v11 = vshrl.u32 %v6006_v2, 16  ;;  %v3424_v62 = vld [vmem:[#allocation3 + $0x5c] sm:$0x1] }
 0x295   : > { %3408 = vst [vmem:[#allocation3 + $0x3c] sm:$0xf] %v3407_v5  ;;  %v3245_v18 = vshll.u32 %v6006_v2, 16  ;;  %v3240_v24 = vrot.slane %v3236_v61, 4 }
 0x296   : > { %v3400_v13 = vsel %vm7705_vm3, %v3239_v6, %v3399_v1  ;;  %v3264_v14 = vor.u32 %v3262_v8, %v3261_v7  ;;  %v3266_v16 = vrot.slane %v3261_v7, 4  ;;  %v3244_v17 = vrot.slane %v3242_v11, 7 }
 0x297   : > { %3401 = vst [vmem:[#allocation3 + $0x30] sm:$0xf] %v3400_v13 }
 0x298   : > { %v3265_v19 = vsel %vm7714_vm14, %v3257_v12, %v3264_v14  ;;  %v3411_v21 = vsel %vm7720_vm4, %v3266_v16, %v3410_v10  ;;  %v3247_v25 = vor.u32 %v3245_v18, %v3244_v17  ;;  %v3249_v26 = vrot.slane %v3244_v17, 4  ;;  %v3417_v12 = vld [vmem:[#allocation3 + $0x50] sm:$0x1] }
 0x299   : > { %3409 = vst.msk [vmem:[#allocation3 + $0x40] sm:$0xf] %vm3365_vm0, %v3265_v19  ;;  %3412 = vst [vmem:[#allocation3 + $0x44] sm:$0x1] %v3411_v21 }
 0x29a   : > { %v3248_v27 = vsel %vm7714_vm14, %v3240_v24, %v3247_v25  ;;  %v3404_v28 = vsel %vm7720_vm4, %v3249_v26, %v3403_v22 }
 0x29b   : > { %3402 = vst.msk [vmem:[#allocation3 + $0x34] sm:$0xf] %vm3365_vm0, %v3248_v27  ;;  %3405 = vst [vmem:[#allocation3 + $0x38] sm:$0x1] %v3404_v28 }
 0x2c6   : > { %v6125_v29 = vpop.f32.mrf.mxu0 }
 0x2c7   : > { %v3020_v30 = vadd.f32 %v6125_v29, %v7691_v23 }
 0x2c8   : > { %v3011_v31 = vpop.f32.mrf.mxu0 }
 0x2c9   : > { %vm3056_vm5 = vcmp.ge.f32.partialorder %v3020_v30, 0.0  ;;  %v3076_v9 = vmul.f32 0.01, %v3020_v30  ;;  %v3012_v15 = vadd.f32 %v7691_v23, %v3011_v31 }
 0x2ca   : > { %v6126_v20 = vpop.f32.mrf.mxu0 }
 0x2cb   : > { %v3096_v33 = vsel %vm3056_vm5, %v3020_v30, %v3076_v9  ;;  %vm3054_vm6 = vcmp.ge.f32.partialorder %v3012_v15, 0.0  ;;  %v3074_v34 = vmul.f32 0.01, %v3012_v15  ;;  %v3023_v35 = vadd.f32 %v6126_v20, %v7691_v23 }
 0x2cc   : > { %v6011_v36 = vpack.c.bf16 %v3096_v33, %v3096_v33  ;;  %v3014_v37 = vpop.f32.mrf.mxu0 }
 0x2cd   : > { %v3094_v38 = vsel %vm3054_vm6, %v3012_v15, %v3074_v34  ;;  %vm3057_vm7 = vcmp.ge.f32.partialorder %v3023_v35, 0.0  ;;  %v3077_v39 = vmul.f32 0.01, %v3023_v35  ;;  %v3015_v40 = vadd.f32 %v7691_v23, %v3014_v37 }
 0x2ce   : > { %v3285_v41 = vshrl.u32 %v6011_v36, 16  ;;  %v6009_v42 = vpack.c.bf16 %v3094_v38, %v3094_v38  ;;  %v3288_v46 = vshll.u32 %v6011_v36, 16 }
 0x2cf   : > { %v3097_v43 = vsel %vm3057_vm7, %v3023_v35, %v3077_v39  ;;  %vm3055_vm8 = vcmp.ge.f32.partialorder %v3015_v40, 0.0  ;;  %v3075_v44 = vmul.f32 0.01, %v3015_v40 }
 0x2d0   : > { %v3287_v45 = vrot.slane %v3285_v41, 7  ;;  %v3268_v47 = vshrl.u32 %v6009_v42, 16  ;;  %v6012_v48 = vpack.c.bf16 %v3097_v43, %v3097_v43  ;;  %v3271_v54 = vshll.u32 %v6009_v42, 16  ;;  %v3434_v41 = vld [vmem:[#allocation3 + $0x6c] sm:$0xf] }
 0x2d1   : > { %v3095_v50 = vsel %vm3055_vm8, %v3015_v40, %v3075_v44 }
 0x2d2   : > { %v3290_v51 = vor.u32 %v3288_v46, %v3287_v45  ;;  %v3270_v53 = vrot.slane %v3268_v47, 7  ;;  %v3293_v55 = vshrl.u32 %v6012_v48, 16  ;;  %v6010_v57 = vpack.c.bf16 %v3095_v50, %v3095_v50  ;;  %v3427_v47 = vld [vmem:[#allocation3 + $0x60] sm:$0xf] }
 0x2d3   : > { %v3296_v61 = vshll.u32 %v6012_v48, 16  ;;  %v3291_v1 = vrot.slane %v3287_v45, 4 }
 0x2d4   : > { %v3421_v58 = vsel %vm7705_vm3, %v3290_v51, %v3420_v49  ;;  %v3273_v59 = vor.u32 %v3271_v54, %v3270_v53  ;;  %v3295_v60 = vrot.slane %v3293_v55, 7  ;;  %v3276_v0 = vshrl.u32 %v6010_v57, 16 }
 0x2d5   : > { %3422 = vst [vmem:[#allocation3 + $0x54] sm:$0xf] %v3421_v58  ;;  %v3279_v8 = vshll.u32 %v6010_v57, 16  ;;  %v3274_v13 = vrot.slane %v3270_v53, 4  ;;  %v3438_v53 = vld [vmem:[#allocation3 + $0x74] sm:$0x1] }
 0x2d6   : > { %v3414_v2 = vsel %vm7705_vm3, %v3273_v59, %v3413_v56  ;;  %v3298_v5 = vor.u32 %v3296_v61, %v3295_v60  ;;  %v3300_v6 = vrot.slane %v3295_v60, 4  ;;  %v3278_v7 = vrot.slane %v3276_v0, 7  ;;  %v3431_v0 = vld [vmem:[#allocation3 + $0x68] sm:$0x1] }
 0x2d7   : > { %3415 = vst [vmem:[#allocation3 + $0x48] sm:$0xf] %v3414_v2 }
 0x2d8   : > { %v3299_v10 = vsel %vm7714_vm14, %v3291_v1, %v3298_v5  ;;  %v3425_v11 = vsel %vm7720_vm4, %v3300_v6, %v3424_v62  ;;  %v3281_v14 = vor.u32 %v3279_v8, %v3278_v7  ;;  %v3283_v16 = vrot.slane %v3278_v7, 4 }
 0x2d9   : > { %3423 = vst.msk [vmem:[#allocation3 + $0x58] sm:$0xf] %vm3365_vm0, %v3299_v10  ;;  %3426 = vst [vmem:[#allocation3 + $0x5c] sm:$0x1] %v3425_v11 }
 0x2da   : > { %v3282_v17 = vsel %vm7714_vm14, %v3274_v13, %v3281_v14  ;;  %v3418_v18 = vsel %vm7720_vm4, %v3283_v16, %v3417_v12 }
 0x2db   : > { %3416 = vst.msk [vmem:[#allocation3 + $0x4c] sm:$0xf] %vm3365_vm0, %v3282_v17  ;;  %3419 = vst [vmem:[#allocation3 + $0x50] sm:$0x1] %v3418_v18 }
 0x302   : > { %v6129_v19 = vpop.f32.mrf.mxu0 }
 0x303   : > { %v3036_v21 = vadd.f32 %v6129_v19, %v7691_v23 }
 0x304   : > { %v3027_v22 = vpop.f32.mrf.mxu0 }
 0x305   : > { %vm3060_vm9 = vcmp.ge.f32.partialorder %v3036_v21, 0.0  ;;  %v3080_v24 = vmul.f32 0.01, %v3036_v21  ;;  %v3028_v25 = vadd.f32 %v7691_v23, %v3027_v22 }
 0x306   : > { %v6130_v26 = vpop.f32.mrf.mxu0 }
 0x307   : > { %v3100_v27 = vsel %vm3060_vm9, %v3036_v21, %v3080_v24  ;;  %vm3058_vm10 = vcmp.ge.f32.partialorder %v3028_v25, 0.0  ;;  %v3078_v28 = vmul.f32 0.01, %v3028_v25  ;;  %v3039_v29 = vadd.f32 %v6130_v26, %v7691_v23 }
 0x308   : > { %v6015_v30 = vpack.c.bf16 %v3100_v27, %v3100_v27  ;;  %v3030_v31 = vpop.f32.mrf.mxu0 }
 0x309   : > { %v3098_v9 = vsel %vm3058_vm10, %v3028_v25, %v3078_v28  ;;  %vm3061_vm1 = vcmp.ge.f32.partialorder %v3039_v29, 0.0  ;;  %v3081_v15 = vmul.f32 0.01, %v3039_v29  ;;  %v3031_v20 = vadd.f32 %v7691_v23, %v3030_v31 }
 0x30a   : > { %v3319_v33 = vshrl.u32 %v6015_v30, 16  ;;  %v6013_v34 = vpack.c.bf16 %v3098_v9, %v3098_v9  ;;  %v3322_v38 = vshll.u32 %v6015_v30, 16 }
 0x30b   : > { %v3101_v35 = vsel %vm3061_vm1, %v3039_v29, %v3081_v15  ;;  %vm3059_vm2 = vcmp.ge.f32.partialorder %v3031_v20, 0.0  ;;  %v3079_v36 = vmul.f32 0.01, %v3031_v20 }
 0x30c   : > { %v3321_v37 = vrot.slane %v3319_v33, 7  ;;  %v3302_v39 = vshrl.u32 %v6013_v34, 16  ;;  %v6016_v40 = vpack.c.bf16 %v3101_v35, %v3101_v35  ;;  %v3305_v45 = vshll.u32 %v6013_v34, 16 }
 0x30d   : > { %v3099_v42 = vsel %vm3059_vm2, %v3031_v20, %v3079_v36 }
 0x30e   : > { %v3324_v43 = vor.u32 %v3322_v38, %v3321_v37  ;;  %v3304_v44 = vrot.slane %v3302_v39, 7  ;;  %v3327_v46 = vshrl.u32 %v6016_v40, 16  ;;  %v6014_v48 = vpack.c.bf16 %v3099_v42, %v3099_v42 }
 0x30f   : > { %v3330_v51 = vshll.u32 %v6016_v40, 16  ;;  %v3325_v55 = vrot.slane %v3321_v37, 4 }
 0x310   : > { %v3435_v23 = vsel %vm7705_vm3, %v3324_v43, %v3434_v41  ;;  %v3307_v49 = vor.u32 %v3305_v45, %v3304_v44  ;;  %v3329_v50 = vrot.slane %v3327_v46, 7  ;;  %v3310_v54 = vshrl.u32 %v6014_v48, 16 }
 0x311   : > { %3436 = vst [vmem:[#allocation3 + $0x6c] sm:$0xf] %v3435_v23  ;;  %v3313_v60 = vshll.u32 %v6014_v48, 16  ;;  %v3308_v1 = vrot.slane %v3304_v44, 4 }
 0x312   : > { %v3428_v56 = vsel %vm7705_vm3, %v3307_v49, %v3427_v47  ;;  %v3332_v57 = vor.u32 %v3330_v51, %v3329_v50  ;;  %v3334_v58 = vrot.slane %v3329_v50, 4  ;;  %v3312_v59 = vrot.slane %v3310_v54, 7 }
 0x313   : > { %3429 = vst [vmem:[#allocation3 + $0x60] sm:$0xf] %v3428_v56  ;;  %3443 = sbr.rel (%p5670_p13) target bundleno = 795 (0x31b), region = 48 }
 0x314   : > { %v3333_v61 = vsel %vm7714_vm14, %v3325_v55, %v3332_v57  ;;  %v3439_v62 = vsel %vm7720_vm4, %v3334_v58, %v3438_v53  ;;  %v3315_v2 = vor.u32 %v3313_v60, %v3312_v59  ;;  %v3317_v5 = vrot.slane %v3312_v59, 4 }
 0x315   : > { %3437 = vst.msk [vmem:[#allocation3 + $0x70] sm:$0xf] %vm3365_vm0, %v3333_v61  ;;  %3440 = vst [vmem:[#allocation3 + $0x74] sm:$0x1] %v3439_v62 }
 0x316   : > { %v3316_v6 = vsel %vm7714_vm14, %v3308_v1, %v3315_v2  ;;  %v3432_v7 = vsel %vm7720_vm4, %v3317_v5, %v3431_v0 }
 0x317   : > { %3430 = vst.msk [vmem:[#allocation3 + $0x64] sm:$0xf] %vm3365_vm0, %v3316_v6  ;;  %3433 = vst [vmem:[#allocation3 + $0x68] sm:$0x1] %v3432_v7 }
 0x318   : > { %v3444_v8 = vld [vmem:[#allocation3] sm:$0xf]  ;;  %v3448_v10 = vld [vmem:[#allocation3 + $0x8] sm:$0x1]  ;;  %v6397_v12 = vmov 0  }
 0x319   : > { %v3445_v11 = vsel %vm7705_vm3, 0, %v3444_v8  ;;  %3447 = vst.msk [vmem:[#allocation3 + $0x4] sm:$0xf] %vm3365_vm0, %v6397_v12  ;;  %v3449_v63 = vsel %vm7720_vm4, 0, %v3448_v10 }
 0x31a   : > { %3446 = vst [vmem:[#allocation3] sm:$0xf] %v3445_v11  ;;  %3450 = vst [vmem:[#allocation3 + $0x8] sm:$0x1] %v3449_v63 }
 0x31b PF: > { %p5912_p0 = scmp.ne.s32.totalorder %s6370_s21, 1 }
 0x31d   : > { %3454 = sbr.rel (%p5912_p0) target bundleno = 805 (0x325), region = 52 }
 0x322   : > { %v3456_v13 = vld [vmem:[#allocation3 + $0x6c] sm:$0xf]  ;;  %v3460_v14 = vld [vmem:[#allocation3 + $0x74] sm:$0x1]  ;;  %v6398_v17 = vmov 0  }
 0x323   : > { %v3457_v16 = vsel %vm7705_vm3, 0, %v3456_v13  ;;  %3459 = vst.msk [vmem:[#allocation3 + $0x70] sm:$0xf] %vm3365_vm0, %v6398_v17  ;;  %v3461_v18 = vsel %vm7720_vm4, 0, %v3460_v14 }
 0x324   : > { %3458 = vst [vmem:[#allocation3 + $0x6c] sm:$0xf] %v3457_v16  ;;  %3462 = vst [vmem:[#allocation3 + $0x74] sm:$0x1] %v3461_v18 }
 0x325 PF: > { %v4291_v19 = vld [vmem:[#allocation3 + $0xc] sm:$0xe]  ;;  %v4292_v21 = vld [vmem:[#allocation3 + $0x10] sm:$0xf]  ;;  %v3776_v22 = vld [vmem:[#allocation3] sm:$0xe] }
 0x326   : > { %v5921_v24 = vrot.slane %v4291_v19, 9  ;;  %v4341_v25 = vrot.slane %v4292_v21, 5  ;;  %v3777_v26 = vld [vmem:[#allocation3 + $0x4] sm:$0xf]  ;;  %v5913_v27 = vrot.slane %v3776_v22, 9  ;;  %v6250_v20 = vld [vmem:[%s8763_s3 + $0x78] sm:$0xff]  }
 0x327   : > { %v3826_v28 = vrot.slane %v3777_v26, 5  ;;  %v4293_v29 = vld [vmem:[#allocation3 + $0x14] sm:$0x1]  ;;  %v3495_v52 = vld [vmem:[#allocation3] sm:$0xf]  ;;  %v6251_v38 = vld [vmem:[%s8763_s3 + $0x38] sm:$0xff]   ;;  %6031 = vmatprep.subr.bf16.mxu1 %v6250_v20 }
 0x328   : > { %v4342_v30 = vsel %vm6855_vm13, %v5921_v24, %v4341_v25  ;;  %v4343_v31 = vrot.slane %v4341_v25, 4  ;;  %v4344_v9 = vrot.slane %v4293_v29, 5  ;;  %v3496_v3 = vld [vmem:[#allocation3 + $0x4] sm:$0xf]  ;;  %v3520_v15 = vshrl.u32 %v3495_v52, 16  ;;  %s6399_s12 = smov 64   ;;  %6032 = vmatpush3.bf16.msra.mxu1 %v6251_v38 }
 0x329   : > { %4395 = vrot.lane.b32.xlu1 %v4342_v30, %s6396_s26  ;;  %v3827_v33 = vsel %vm6855_vm13, %v5913_v27, %v3826_v28  ;;  %v3523_v34 = vshll.u32 %v3495_v52, 16  ;;  %v3529_v35 = vshll.u32 %v3496_v3, 16  ;;  %v3533_v36 = vshrl.u32 %v3496_v3, 16  ;;  %v3778_v37 = vld [vmem:[#allocation3 + $0x8] sm:$0x1]  ;;  %v6252_v44 = vld [vmem:[%s8763_s3 + $0x70] sm:$0xff]  }
 0x32a   : > { %3880 = vrot.lane.b32.xlu0 %v3827_v33, %s6399_s12  ;;  %v4345_v39 = vsel %vm6855_vm13, %v4343_v31, %v4344_v9  ;;  %v3522_v40 = vrot.slane %v3520_v15, 4  ;;  %v3828_v41 = vrot.slane %v3826_v28, 4  ;;  %v3829_v42 = vrot.slane %v3778_v37, 5  ;;  %v3497_v43 = vld [vmem:[#allocation3 + $0x8] sm:$0x1]  ;;  %6033 = vmatprep.subr.bf16.mxu1 %v6252_v44  ;;  %v6253_v58 = vld [vmem:[%s8763_s3 + $0x30] sm:$0xff]  }
 0x32b   : > { %v3525_v45 = vrot.slane %v3523_v34, 5  ;;  %v3531_v46 = vrot.slane %v3529_v35, 5  ;;  %v3535_v47 = vrot.slane %v3533_v36, 4  ;;  %v3539_v48 = vshll.u32 %v3497_v43, 16  ;;  %v4557_v50 = vld [vmem:[#allocation3 + $0x1c] sm:$0xf] }
 0x32c   : > { %v4558_v51 = vld [vmem:[#allocation3 + $0x20] sm:$0x1]  ;;  %v3830_v53 = vsel %vm6855_vm13, %v3828_v41, %v3829_v42  ;;  %v4590_v55 = vshll.u32 %v4557_v50, 16  ;;  %v4594_v56 = vshrl.u32 %v4557_v50, 16  ;;  %v4556_v57 = vld [vmem:[#allocation3 + $0x18] sm:$0xf]  ;;  %6034 = vmatpush3.bf16.msra.mxu1 %v6253_v58 }
 0x32d   : > { %4397 = vrot.lane.b32.xlu1 %v4345_v39, %s6396_s26  ;;  %v3526_v23 = vor.u32 %v3525_v45, %v3522_v40  ;;  %v3536_v49 = vor.u32 %v3535_v47, %v3531_v46  ;;  %v3541_v54 = vrot.slane %v3539_v48, 5  ;;  %v4581_v61 = vshrl.u32 %v4556_v57, 16  ;;  %v3499_v0 = vld [vmem:[#allocation3 + $0x10] sm:$0xf]  ;;  %v4461_v7 = vld [vmem:[#allocation3 + $0x1c] sm:$0xf] }
 0x32e   : > { %v4584_v62 = vshll.u32 %v4556_v57, 16  ;;  %v7865_v1 = vrot.slane %v4590_v55, 5  ;;  %v4596_v2 = vrot.slane %v4594_v56, 4  ;;  %v3553_v5 = vshll.u32 %v3499_v0, 16  ;;  %v3498_v10 = vld [vmem:[#allocation3 + $0xc] sm:$0xf] }
 0x32f   : > { %v3527_v59 = vrot.slane %v3526_v23, 4  ;;  %v3537_v60 = vrot.slane %v3536_v49, 4  ;;  %v4600_v8 = vshll.u32 %v4558_v51, 16  ;;  %v3500_v63 = vld [vmem:[#allocation3 + $0x14] sm:$0x1]  ;;  %v3557_v14 = vshrl.u32 %v3499_v0, 16 }
 0x330   : > { %v4597_v12 = vor.u32 %v4596_v2, %v7865_v1  ;;  %v7874_v13 = vrot.slane %v3553_v5, 5  ;;  %v6254_v16 = vld [vmem:[%s8763_s3 + $0x68] sm:$0xff]   ;;  %v4583_v17 = vrot.slane %v4581_v61, 4  ;;  %v4586_v18 = vrot.slane %v4584_v62, 5  ;;  %v3947_v26 = vld [vmem:[#allocation3 + $0x10] sm:$0xf] }
 0x331   : > { %v3532_v6 = vsel %vm6886_vm15, %v3527_v59, %v3531_v46  ;;  %3882 = vrot.lane.b32.xlu1 %v3830_v53, %s6399_s12  ;;  %v3542_v11 = vsel %vm6886_vm15, %v3537_v60, %v3541_v54  ;;  %v3544_v19 = vshrl.u32 %v3498_v10, 16  ;;  %v3547_v21 = vshll.u32 %v3498_v10, 16  ;;  %v6255_v22 = vld [vmem:[%s8763_s3 + $0x28] sm:$0xff]   ;;  %6035 = vmatprep.subr.bf16.mxu1 %v6254_v16  ;;  %v6256_v15 = vld [vmem:[%s8763_s3 + $0x60] sm:$0xff]   ;;  %s6400_s8 = smov 96   ;;  %v6258_v38 = vld [vmem:[%s8763_s3 + $0x58] sm:$0xff]  }
 0x332   : > { %3711 = vrot.lane.b32.xlu0 %v3532_v6, %s6396_s26  ;;  %v3559_v24 = vrot.slane %v3557_v14, 4  ;;  %v4460_v25 = vld [vmem:[#allocation3 + $0x18] sm:$0xf]  ;;  %6036 = vmatpush3.bf16.msra.mxu1 %v6255_v22  ;;  %v4598_v27 = vrot.slane %v4597_v12, 4  ;;  %v4602_v28 = vrot.slane %v4600_v8, 5  ;;  %v3563_v52 = vshll.u32 %v3500_v63, 16 }
 0x333   : > { %v4587_v30 = vor.u32 %v4586_v18, %v4583_v17  ;;  %v3546_v31 = vrot.slane %v3544_v19, 4  ;;  %v3549_v9 = vrot.slane %v3547_v21, 5  ;;  %v4295_v3 = vld [vmem:[#allocation3 + $0x1c] sm:$0xf]  ;;  %v6257_v20 = vld [vmem:[%s8763_s3 + $0x20] sm:$0xff]   ;;  %6037 = vmatprep.subr.bf16.mxu1 %v6256_v15  ;;  %v6259_v43 = vld [vmem:[%s8763_s3 + $0x18] sm:$0xff]  }
 0x334   : > { %v3560_v29 = vor.u32 %v3559_v24, %v7874_v13  ;;  %v4603_v33 = vsel %vm6886_vm15, %v4598_v27, %v4602_v28  ;;  %v3565_v35 = vrot.slane %v3563_v52, 5  ;;  %v4348_v36 = vrot.slane %v4295_v3, 5  ;;  %v3780_v37 = vld [vmem:[#allocation3 + $0x10] sm:$0xf]  ;;  %v3946_v39 = vld [vmem:[#allocation3 + $0xc] sm:$0xf] }
 0x335   : > { %4494 = vrot.lane.b32.xlu1 %v4461_v7, %s6399_s12  ;;  %v4588_v40 = vrot.slane %v4587_v30, 4  ;;  %v3550_v41 = vor.u32 %v3549_v9, %v3546_v31  ;;  %v4296_v42 = vld [vmem:[#allocation3 + $0x20] sm:$0x1]  ;;  %v3833_v44 = vrot.slane %v3780_v37, 5  ;;  %v3781_v48 = vld [vmem:[#allocation3 + $0x14] sm:$0x1] }
 0x336   : > { %3713 = vrot.lane.b32.xlu0 %v3542_v11, %s6396_s26  ;;  %v3561_v34 = vrot.slane %v3560_v29, 4  ;;  %6038 = vmatpush3.bf16.msra.mxu1 %v6257_v20  ;;  %v4350_v46 = vrot.slane %v4348_v36, 4  ;;  %v4351_v47 = vrot.slane %v4296_v42, 5  ;;  %v4560_v50 = vld [vmem:[#allocation3 + $0x28] sm:$0xf]  ;;  %v6260_v51 = vld [vmem:[%s8763_s3 + $0x50] sm:$0xff]  }
 0x337   : > { %6039 = vmatprep.subr.bf16.mxu1 %v6258_v38  ;;  %v4593_v23 = vsel %vm6886_vm15, %v4588_v40, %v7865_v1  ;;  %v3551_v49 = vrot.slane %v3550_v41, 4  ;;  %v4294_v53 = vld [vmem:[#allocation3 + $0x18] sm:$0xe]  ;;  %v3835_v54 = vrot.slane %v3833_v44, 4  ;;  %v3836_v55 = vrot.slane %v3781_v48, 5  ;;  %v6264_v30 = vld [vmem:[%s8763_s3 + $0x40] sm:$0xff]  }
 0x338   : > { %v3566_v45 = vsel %vm6886_vm15, %v3561_v34, %v3565_v35  ;;  %v4352_v56 = vsel %vm6855_vm13, %v4350_v46, %v4351_v47  ;;  %v3779_v57 = vld [vmem:[#allocation3 + $0xc] sm:$0xe]  ;;  %v4614_v58 = vshll.u32 %v4560_v50, 16  ;;  %v4618_v59 = vshrl.u32 %v4560_v50, 16  ;;  %v3502_v62 = vld [vmem:[#allocation3 + $0x1c] sm:$0xf] }
 0x339   : > { %3980 = vrot.lane.b32.xlu1 %v3947_v26, %s6400_s8  ;;  %v3556_v60 = vsel %vm6886_vm15, %v3551_v49, %v7874_v13  ;;  %v5922_v61 = vrot.slane %v4294_v53, 9  ;;  %v4559_v0 = vld [vmem:[#allocation3 + $0x24] sm:$0xf]  ;;  %v3837_v1 = vsel %vm6855_vm13, %v3835_v54, %v3836_v55  ;;  %v5914_v2 = vrot.slane %v3779_v57, 9  ;;  %v4561_v11 = vld [vmem:[#allocation3 + $0x2c] sm:$0x1] }
 0x33a   : > { %4492 = vrot.lane.b32.xlu0 %v4460_v25, %s6399_s12  ;;  %6040 = vmatpush3.bf16.msra.mxu1 %v6259_v43  ;;  %v7922_v5 = vrot.slane %v4614_v58, 5  ;;  %v4620_v6 = vrot.slane %v4618_v59, 4  ;;  %v3577_v7 = vshll.u32 %v3502_v62, 16  ;;  %v3581_v8 = vshrl.u32 %v3502_v62, 16  ;;  %v6261_v13 = vld [vmem:[%s8763_s3 + $0x10] sm:$0xff]   ;;  %v6262_v17 = vld [vmem:[%s8763_s3 + $0x48] sm:$0xff]  }
 0x33b   : > { %6041 = vmatprep.subr.bf16.mxu1 %v6260_v51  ;;  %v4349_v10 = vsel %vm6855_vm13, %v5922_v61, %v4348_v36  ;;  %v4605_v12 = vshrl.u32 %v4559_v0, 16  ;;  %v4608_v63 = vshll.u32 %v4559_v0, 16  ;;  %v3501_v14 = vld [vmem:[#allocation3 + $0x18] sm:$0xf]  ;;  %v3834_v16 = vsel %vm6855_vm13, %v5914_v2, %v3833_v44  ;;  %v4463_v18 = vld [vmem:[#allocation3 + $0x28] sm:$0xf] }
 0x33c   : > { %v4621_v19 = vor.u32 %v4620_v6, %v7922_v5  ;;  %v4624_v21 = vshll.u32 %v4561_v11, 16  ;;  %v7937_v22 = vrot.slane %v3577_v7, 5  ;;  %v3583_v24 = vrot.slane %v3581_v8, 4  ;;  %v6263_v25 = vld [vmem:[%s8763_s3 + $0x8] sm:$0xff]   ;;  %v3503_v28 = vld [vmem:[#allocation3 + $0x20] sm:$0x1] }
 0x33d   : > { %4774 = vrot.lane.b32.xlu1 %v4603_v33, %s6400_s8  ;;  %v4607_v26 = vrot.slane %v4605_v12, 4  ;;  %v4610_v27 = vrot.slane %v4608_v63, 5  ;;  %v3568_v29 = vshrl.u32 %v3501_v14, 16  ;;  %v3571_v52 = vshll.u32 %v3501_v14, 16  ;;  %v4462_v31 = vld [vmem:[#allocation3 + $0x24] sm:$0xf] }
 0x33e   : > { %3978 = vrot.lane.b32.xlu0 %v3946_v39, %s6400_s8  ;;  %6042 = vmatpush3.bf16.msra.mxu1 %v6261_v13  ;;  %v3949_v9 = vld [vmem:[#allocation3 + $0x1c] sm:$0xf]  ;;  %v4622_v3 = vrot.slane %v4621_v19, 4  ;;  %v4626_v15 = vrot.slane %v4624_v21, 5  ;;  %v3584_v20 = vor.u32 %v3583_v24, %v7937_v22  ;;  %v3587_v33 = vshll.u32 %v3503_v28, 16  ;;  %v6266_v39 = vld [vmem:[%s8763_s3] sm:$0xff]  }
 0x33f   : > { %6043 = vmatprep.subr.bf16.mxu1 %v6262_v17  ;;  %v4611_v34 = vor.u32 %v4610_v27, %v4607_v26  ;;  %v3570_v35 = vrot.slane %v3568_v29, 4  ;;  %v3573_v36 = vrot.slane %v3571_v52, 5  ;;  %v7948_v37 = vld [vmem:[#allocation3 + $0x28] sm:$0xf]  ;;  %v6265_v38 = vld [vmem:[%s8763_s3 + $0x88] sm:$0xff]   ;;  %v6270_v59 = vld [vmem:[%s8763_s3 + $0x80] sm:$0xff]  }
 0x340   : > { %6131 = vmatprep.subr.bf16.mxu0 %v6265_v38  ;;  %v4627_v40 = vsel %vm6886_vm15, %v4622_v3, %v4626_v15  ;;  %v3585_v41 = vrot.slane %v3584_v20, 4  ;;  %v3589_v42 = vrot.slane %v3587_v33, 5  ;;  %v4355_v43 = vrot.slane %v7948_v37, 5  ;;  %v7961_v44 = vld [vmem:[#allocation3 + $0x1c] sm:$0xf]  ;;  %s5991_s17 = sshll.u32 %s6374_s22, 5 }
 0x341   : > { %3717 = vrot.lane.b32.xlu1 %v3566_v45, %s6396_s26  ;;  %6132 = vmatpush3.bf16.msra.mxu0 %v6265_v38  ;;  %v3948_v45 = vld [vmem:[#allocation3 + $0x18] sm:$0xf]  ;;  %v4612_v46 = vrot.slane %v4611_v34, 4  ;;  %v3574_v47 = vor.u32 %v3573_v36, %v3570_v35  ;;  %v4299_v48 = vld [vmem:[#allocation3 + $0x2c] sm:$0x1]  ;;  %v3840_v49 = vrot.slane %v7961_v44, 5 }
 0x342   : > { %4772 = vrot.lane.b32.xlu0 %v4593_v23, %s6400_s8  ;;  %6044 = vmatpush3.bf16.msra.mxu1 %v6263_v25  ;;  %v4297_v23 = vld [vmem:[#allocation3 + $0x24] sm:$0xe]  ;;  %v4563_v50 = vld [vmem:[#allocation3 + $0x34] sm:$0xf]  ;;  %v3590_v51 = vsel %vm6886_vm15, %v3585_v41, %v3589_v42  ;;  %v4357_v53 = vrot.slane %v4355_v43, 4  ;;  %v4358_v54 = vrot.slane %v4299_v48, 5 }
 0x343   : > { %6045 = vmatprep.subr.bf16.mxu1 %v6264_v30  ;;  %v3784_v55 = vld [vmem:[#allocation3 + $0x20] sm:$0x1]  ;;  %v4617_v57 = vsel %vm6886_vm15, %v4612_v46, %v7922_v5  ;;  %v3575_v58 = vrot.slane %v3574_v47, 4  ;;  %v4638_v61 = vshll.u32 %v4563_v50, 16  ;;  %v4562_v62 = vld [vmem:[#allocation3 + $0x30] sm:$0xf]  ;;  %6133 = vmatprep.subr.bf16.mxu0 %v6270_v59 }
 0x344   : > { %v3842_v0 = vrot.slane %v3840_v49, 4  ;;  %v4642_v6 = vshrl.u32 %v4563_v50, 16  ;;  %v4359_v5 = vsel %vm6855_vm13, %v4357_v53, %v4358_v54  ;;  %v4564_v7 = vld [vmem:[#allocation3 + $0x38] sm:$0x1]  ;;  %v4043_v8 = vld [vmem:[#allocation3 + $0xc] sm:$0xf] }
 0x345   : > { %4401 = vrot.lane.b32.xlu1 %v4352_v56, %s6396_s26  ;;  %v3782_v56 = vld [vmem:[#allocation3 + $0x18] sm:$0xe]  ;;  %v3580_v11 = vsel %vm6886_vm15, %v3575_v58, %v7937_v22  ;;  %v4629_v12 = vshrl.u32 %v4562_v62, 16  ;;  %v4632_v63 = vshll.u32 %v4562_v62, 16  ;;  %v3505_v13 = vld [vmem:[#allocation3 + $0x28] sm:$0xf]  ;;  %6134 = vmatpush3.bf16.msra.mxu0 %v6270_v59 }
 0x346   : > { %3715 = vrot.lane.b32.xlu0 %v3556_v60, %s6396_s26  ;;  %6046 = vmatpush3.bf16.msra.mxu1 %v6266_v39  ;;  %v5923_v60 = vrot.slane %v4297_v23, 9  ;;  %v5915_v2 = vrot.slane %v3782_v56, 9  ;;  %v4068_v14 = vshrl.u32 %v4043_v8, 16  ;;  %v4071_v17 = vshll.u32 %v4043_v8, 16  ;;  %v3504_v25 = vld [vmem:[#allocation3 + $0x24] sm:$0xf] }
 0x347   : > { %v4644_v24 = vrot.slane %v4642_v6, 4  ;;  %v3601_v22 = vshll.u32 %v3505_v13, 16  ;;  %v3605_v27 = vshrl.u32 %v3505_v13, 16  ;;  %v4648_v30 = vshll.u32 %v4564_v7, 16  ;;  %v3506_v3 = vld [vmem:[#allocation3 + $0x2c] sm:$0x1] }
 0x348   : > { %v4070_v26 = vrot.slane %v4068_v14, 4  ;;  %v4073_v28 = vrot.slane %v4071_v17, 5  ;;  %v4356_v52 = vsel %vm6855_vm13, %v5923_v60, %v4355_v43  ;;  %v3592_v15 = vshrl.u32 %v3504_v25, 16  ;;  %v4045_v34 = vld [vmem:[#allocation3 + $0x14] sm:$0x1]  ;;  %s5575_s30 = sshll.u32 %s6514_s27, 4  ;;  %s8702_s30 = int_to_ptr.vmem [resolvable:$true] %s5575_s30 }
 0x349   : > { %3886 = vrot.lane.b32.xlu1 %v3837_v1, %s6399_s12  ;;  %v3843_v1 = vrot.slane %v3784_v55, 5  ;;  %v3595_v20 = vshll.u32 %v3504_v25, 16  ;;  %v4634_v37 = vrot.slane %v4632_v63, 5  ;;  %v7993_v38 = vld [vmem:[#allocation3 + $0x34] sm:$0xf]  ;;  %v4087_v39 = vshll.u32 %v4045_v34, 16 }
 0x34a   : > { %4399 = vrot.lane.b32.xlu0 %v4349_v10, %s6396_s26  ;;  %v4044_v10 = vld [vmem:[#allocation3 + $0x10] sm:$0xf]  ;;  %v4074_v33 = vor.u32 %v4073_v28, %v4070_v26  ;;  %v3607_v41 = vrot.slane %v3605_v27, 4  ;;  %v3594_v47 = vrot.slane %v3592_v15, 4  ;;  %v3951_v53 = vld [vmem:[#allocation3 + $0x28] sm:$0xf] }
 0x34b   : > { %v4081_v19 = vshrl.u32 %v4044_v10, 16  ;;  %v3844_v21 = vsel %vm6855_vm13, %v3842_v0, %v3843_v1  ;;  %v4089_v46 = vrot.slane %v4087_v39, 5  ;;  %v3597_v48 = vrot.slane %v3595_v20, 5  ;;  %v4302_v58 = vld [vmem:[#allocation3 + $0x38] sm:$0x1]  ;;  %s8794_s14 = sand.u32 1, %s6362_s19  }
 0x34c   : > { %v4075_v42 = vrot.slane %v4074_v33, 4  ;;  %v3611_v55 = vshll.u32 %v3506_v3, 16  ;;  %v4362_v56 = vrot.slane %v7993_v38, 5  ;;  %v4464_v60 = vld [vmem:[#allocation3 + $0x30] sm:$0xf]  ;;  %v4365_v8 = vrot.slane %v4302_v58, 5 }
 0x34d   : > { %4498 = vrot.lane.b32.xlu1 %v4463_v18, %s6399_s12  ;;  %v4077_v18 = vshll.u32 %v4044_v10, 16  ;;  %v4083_v35 = vrot.slane %v4081_v19, 4  ;;  %v3598_v62 = vor.u32 %v3597_v48, %v3594_v47  ;;  %v4300_v0 = vld [vmem:[#allocation3 + $0x30] sm:$0xe]  ;;  %v3787_v1 = vld [vmem:[#allocation3 + $0x2c] sm:$0x1] }
 0x34e   : > { %3884 = vrot.lane.b32.xlu0 %v3834_v16, %s6399_s12  ;;  %v7983_v16 = vrot.slane %v4638_v61, 5  ;;  %v8012_v61 = vld [vmem:[#allocation3 + $0x28] sm:$0xf]  ;;  %v4364_v7 = vrot.slane %v4362_v56, 4  ;;  %v4566_v10 = vld [vmem:[#allocation3 + $0x40] sm:$0xf] }
 0x34f   : > { %v4079_v29 = vrot.slane %v4077_v18, 5  ;;  %v3847_v63 = vrot.slane %v8012_v61, 5  ;;  %v3464_v13 = vld [vmem:[#allocation3 + $0x4] sm:$0xf]  ;;  %v5924_v14 = vrot.slane %v4300_v0, 9  ;;  %v3850_v17 = vrot.slane %v3787_v1, 5 }
 0x350   : > { %v4645_v36 = vor.u32 %v4644_v24, %v7983_v16  ;;  %v4565_v18 = vld [vmem:[#allocation3 + $0x3c] sm:$0xf]  ;;  %3480 = vst.msk [vmem:[#allocation5 + $0xc] sm:$0xf] %vm3365_vm0, %v3464_v13  ;;  %v3599_v19 = vrot.slane %v3598_v62, 4  ;;  %v4666_v28 = vshrl.u32 %v4566_v10, 16  ;;  %v4366_v34 = vsel %vm6855_vm13, %v4364_v7, %v4365_v8 }
 0x351   : > { %3984 = vrot.lane.b32.xlu1 %v3949_v9, %s6400_s8  ;;  %v4465_v9 = vld [vmem:[#allocation3 + $0x34] sm:$0xf]  ;;  %v4084_v43 = vor.u32 %v4083_v35, %v4079_v29  ;;  %v4080_v23 = vsel %vm6886_vm15, %v4075_v42, %v4079_v29  ;;  %v4567_v24 = vld [vmem:[#allocation3 + $0x44] sm:$0x1]  ;;  %v3509_v26 = vld [vmem:[#allocation3 + $0x38] sm:$0x1] }
 0x352   : > { %4496 = vrot.lane.b32.xlu0 %v4462_v31, %s6399_s12  ;;  %v4631_v31 = vrot.slane %v4629_v12, 4  ;;  %4275 = vst.msk [vmem:[#allocation5 + $0x4] sm:$0xf] %vm3365_vm0, %v4080_v23  ;;  %v4646_v44 = vrot.slane %v4645_v36, 4  ;;  %v3508_v25 = vld [vmem:[#allocation3 + $0x34] sm:$0xf] }
 0x353   : > { %v4085_v50 = vrot.slane %v4084_v43, 4  ;;  %v3849_v27 = vrot.slane %v3847_v63, 4  ;;  %v4672_v3 = vshll.u32 %v4567_v24, 16  ;;  %v3507_v15 = vld [vmem:[#allocation3 + $0x30] sm:$0xf]  ;;  %v3625_v20 = vshll.u32 %v3508_v25, 16 }
 0x354   : > { %v4635_v54 = vor.u32 %v4634_v37, %v4631_v31  ;;  %v4656_v31 = vshll.u32 %v4565_v18, 16  ;;  %v3629_v33 = vshrl.u32 %v3508_v25, 16  ;;  %v4668_v35 = vrot.slane %v4666_v28, 4  ;;  %v8038_v37 = vld [vmem:[#allocation3 + $0x40] sm:$0xf]  ;;  %s8708_s15 = scalar_lea.sflag [#allocation7], %s8794_s14 }
 0x355   : > { %4778 = vrot.lane.b32.xlu1 %v4627_v40, %s6400_s8  ;;  %v7996_v40 = vrot.slane %v3601_v22, 5  ;;  %v4090_v59 = vsel %vm6886_vm15, %v4085_v50, %v4089_v46  ;;  %v3635_v36 = vshll.u32 %v3509_v26, 16  ;;  %v3466_v42 = vld [vmem:[#allocation3 + $0x10] sm:$0xf]  ;;  %v8045_v46 = vrot.slane %v4672_v3, 5  ;;  %s6294_s16 = scalar_lea.vmem %s8702_s30, 2048 }
 0x356   : > { %3982 = vrot.lane.b32.xlu0 %v3948_v45, %s6400_s8  ;;  %v3841_v45 = vsel %vm6855_vm13, %v5915_v2, %v3840_v49  ;;  %v4650_v49 = vrot.slane %v4648_v30, 5  ;;  %4276 = vst.msk [vmem:[#allocation5 + $0x10] sm:$0xf] %vm3365_vm0, %v4090_v59  ;;  %v3950_v2 = vld [vmem:[#allocation3 + $0x24] sm:$0xf]  ;;  %v4636_v6 = vrot.slane %v4635_v54, 4  ;;  %v3851_v50 = vsel %vm6855_vm13, %v3849_v27, %v3850_v17  ;;  %p6295_p1 = scmp.ne.s32.totalorder %s8702_s30, %s6294_s16 }
 0x357   : > { %v4653_v30 = vshrl.u32 %v4565_v18, 16  ;;  %3482 = vst.msk [vmem:[#allocation5 + $0x24] sm:$0xf] %vm3365_vm0, %v3466_v42  ;;  %v3619_v47 = vshll.u32 %v3507_v15, 16  ;;  %v8047_v48 = vld [vmem:[#allocation3 + $0x44] sm:$0x1] }
 0x358   : > { %v4641_v29 = vsel %vm6886_vm15, %v4636_v6, %v7983_v16  ;;  %v3604_v16 = vsel %vm6886_vm15, %v3599_v19, %v7996_v40  ;;  %v3465_v23 = vld [vmem:[#allocation3 + $0xc] sm:$0xf]  ;;  %v4048_v38 = vld [vmem:[#allocation3 + $0x20] sm:$0x1]  ;;  %v8076_v13 = vld [vmem:[#allocation3 + $0x34] sm:$0xf]  ;;  %p6296_p2 = pnand %p6295_p1, %p6484_p3 }
 0x359   : > { %3721 = vrot.lane.b32.xlu1 %v3590_v51, %s6396_s26  ;;  %v3463_v51 = vld [vmem:[#allocation3] sm:$0xf]  ;;  %v4655_v39 = vrot.slane %v4653_v30, 4  ;;  %3481 = vst.msk [vmem:[#allocation5 + $0x18] sm:$0xf] %vm3365_vm0, %v3465_v23  ;;  %v4111_v0 = vshll.u32 %v4048_v38, 16 }
 0x35a   : > { %4776 = vrot.lane.b32.xlu0 %v4617_v57, %s6400_s8  ;;  %3479 = vst.msk [vmem:[#allocation5] sm:$0xf] %vm3365_vm0, %v3463_v51  ;;  %v3608_v57 = vor.u32 %v3607_v41, %v7996_v40  ;;  %v4658_v41 = vrot.slane %v4656_v31, 5  ;;  %v4363_v40 = vsel %vm6855_vm13, %v5924_v14, %v4362_v56  ;;  %v8056_v51 = vrot.slane %v3625_v20, 5  ;;  %v4467_v58 = vld [vmem:[#allocation3 + $0x40] sm:$0xf]  ;;  %p6297_p4 = pneg %p6296_p2 }
 0x35b   : > { %v8063_v56 = vld [vmem:[#allocation3 + $0x3c] sm:$0xe]  ;;  %v3621_v1 = vrot.slane %v3619_v47, 5  ;;  %v4569_v6 = vld [vmem:[#allocation3 + $0x4c] sm:$0xf]  ;;  %v4113_v61 = vrot.slane %v4111_v0, 5 }
 0x35c   : > { %v3609_v12 = vrot.slane %v3608_v57, 4  ;;  %v4047_v57 = vld [vmem:[#allocation3 + $0x1c] sm:$0xf]  ;;  %v4568_v14 = vld [vmem:[#allocation3 + $0x48] sm:$0xf]  ;;  %v4686_v26 = vshll.u32 %v4569_v6, 16 }
 0x35d   : > { %4405 = vrot.lane.b32.xlu1 %v4359_v5, %s6396_s26  ;;  %v3613_v5 = vrot.slane %v3611_v55, 5  ;;  %v4659_v55 = vor.u32 %v4658_v41, %v4655_v39  ;;  %v4105_v62 = vshrl.u32 %v4047_v57, 16  ;;  %v3953_v17 = vld [vmem:[#allocation3 + $0x34] sm:$0xf]  ;;  %v4046_v24 = vld [vmem:[#allocation3 + $0x18] sm:$0xf] }
 0x35e   : > { %3719 = vrot.lane.b32.xlu0 %v3580_v11, %s6396_s26  ;;  %v4651_v11 = vsel %vm6886_vm15, %v4646_v44, %v4650_v49  ;;  %v8060_v44 = vrot.slane %v3635_v36, 5  ;;  %v4369_v49 = vrot.slane %v8038_v37, 5  ;;  %v8085_v27 = vld [vmem:[#allocation3 + $0x38] sm:$0x1]  ;;  %v4677_v28 = vshrl.u32 %v4568_v14, 16 }
 0x35f   : > { %v3614_v22 = vsel %vm6886_vm15, %v3609_v12, %v3613_v5  ;;  %v4107_v7 = vrot.slane %v4105_v62, 4  ;;  %v5925_v12 = vrot.slane %v8063_v56, 9  ;;  %v8078_v18 = vrot.slane %v4659_v55, 4  ;;  %v4570_v3 = vld [vmem:[#allocation3 + $0x50] sm:$0x1] }
 0x360   : > { %v4371_v19 = vrot.slane %v4369_v49, 4  ;;  %v4095_v30 = vshll.u32 %v4046_v24, 16  ;;  %v3854_v20 = vrot.slane %v8076_v13, 5  ;;  %v3952_v36 = vld [vmem:[#allocation3 + $0x30] sm:$0xf]  ;;  %v3857_v39 = vrot.slane %v8085_v27, 5 }
 0x361   : > { %3890 = vrot.lane.b32.xlu1 %v3844_v21, %s6399_s12  ;;  %v4662_v21 = vshll.u32 %v4566_v10, 16  ;;  %v8094_v41 = vrot.slane %v4686_v26, 5  ;;  %v4679_v47 = vrot.slane %v4677_v28, 4  ;;  %vm5275_vm3 = vcmask 261120  }
 0x362   : > { %4403 = vrot.lane.b32.xlu0 %v4356_v52, %s6396_s26  ;;  %v3785_v52 = vld [vmem:[#allocation3 + $0x24] sm:$0xe]  ;;  %vm3759_vm14 = vcmask 519424   ;;  %vm3928_vm4 = vcmask 781824   ;;  %vm4026_vm11 = vcmask 1044224  }
 0x363   : > { %v5916_v43 = vrot.slane %v3785_v52, 9  ;;  %v4092_v52 = vshrl.u32 %v4046_v24, 16 }
 0x365   : > { %4502 = vrot.lane.b32.xlu1 %v4465_v9, %s6399_s12  ;;  %v8032_v9 = vrot.slane %v4662_v21, 5  ;;  %v3848_v8 = vsel %vm6855_vm13, %v5916_v43, %v3847_v63  ;;  %v4466_v63 = vld [vmem:[#allocation3 + $0x3c] sm:$0xf] }
 0x366   : > { %3888 = vrot.lane.b32.xlu0 %v3841_v45, %s6399_s12  ;;  %v3616_v45 = vshrl.u32 %v3507_v15, 16  ;;  %v4680_v15 = vshll.u32 %v4568_v14, 16 }
 0x367   : > { %v4669_v54 = vor.u32 %v4668_v35, %v8032_v9  ;;  %v4097_v35 = vrot.slane %v4095_v30, 5 }
 0x368   : > { %v3618_v59 = vrot.slane %v3616_v45, 4  ;;  %v4696_v45 = vshll.u32 %v4570_v3, 16 }
 0x369   : > { %3988 = vrot.lane.b32.xlu1 %v3951_v53, %s6400_s8  ;;  %v3631_v53 = vrot.slane %v3629_v33, 4  ;;  %v4670_v10 = vrot.slane %v4669_v54, 4  ;;  %v4837_v54 = vld [vmem:[#allocation3 + $0x1c] sm:$0xf] }
 0x36a   : > { %4500 = vrot.lane.b32.xlu0 %v4464_v60, %s6399_s12  ;;  %v4101_v60 = vshll.u32 %v4047_v57, 16  ;;  %v3622_v25 = vor.u32 %v3621_v1, %v3618_v59  ;;  %v4665_v57 = vsel %vm6886_vm15, %v8078_v18, %v8032_v9  ;;  %v4838_v59 = vld [vmem:[#allocation3 + $0x20] sm:$0x1]  ;;  %v4840_v9 = vld [vmem:[#allocation3 + $0x28] sm:$0xf]  ;;  %v8131_v26 = vrot.slane %v4696_v45, 5 }
 0x36b   : > { %v4675_v43 = vsel %vm6886_vm15, %v4670_v10, %v8045_v46  ;;  %v8158_v45 = vld [vmem:[#allocation3 + $0x4c] sm:$0xf] }
 0x36c   : > { %v8068_v5 = vrot.slane %v4101_v60, 5  ;;  %v4886_v60 = vrot.slane %v4837_v54, 5  ;;  %v3514_v54 = vld [vmem:[#allocation3 + $0x4c] sm:$0xf] }
 0x36d   : > { %4782 = vrot.lane.b32.xlu1 %v4651_v11, %s6400_s8  ;;  %v3632_v11 = vor.u32 %v3631_v53, %v8056_v51  ;;  %v3512_v53 = vld [vmem:[#allocation3 + $0x44] sm:$0x1] }
 0x36e   : > { %3986 = vrot.lane.b32.xlu0 %v3950_v2, %s6400_s8  ;;  %v4372_v2 = vrot.slane %v8047_v48, 5  ;;  %v4108_v21 = vor.u32 %v4107_v7, %v8068_v5  ;;  %v3511_v48 = vld [vmem:[#allocation3 + $0x40] sm:$0xf]  ;;  %v4839_v7 = vld [vmem:[#allocation3 + $0x24] sm:$0xe]  ;;  %v4888_v14 = vrot.slane %v4886_v60, 4 }
 0x36f   : > { %v3633_v31 = vrot.slane %v3632_v11, 4  ;;  %v3649_v1 = vshll.u32 %v3511_v48, 16  ;;  %v5930_v18 = vrot.slane %v4839_v7, 9  ;;  %v3513_v7 = vld [vmem:[#allocation3 + $0x48] sm:$0xf] }
 0x370   : > { %v4373_v38 = vsel %vm6855_vm13, %v4371_v19, %v4372_v2  ;;  %v8115_v2 = vld [vmem:[#allocation3 + $0x30] sm:$0xe]  ;;  %v4893_v19 = vrot.slane %v4840_v9, 5  ;;  %v4049_v9 = vld [vmem:[#allocation3 + $0x24] sm:$0xf] }
 0x371   : > { %3725 = vrot.lane.b32.xlu1 %v3614_v22, %s6396_s26  ;;  %v4690_v22 = vshrl.u32 %v4569_v6, 16  ;;  %v3638_v62 = vsel %vm6886_vm15, %v3633_v31, %v8060_v44  ;;  %v4889_v6 = vrot.slane %v4838_v59, 5  ;;  %v4841_v44 = vld [vmem:[#allocation3 + $0x2c] sm:$0x1]  ;;  %v3468_v31 = vld [vmem:[#allocation3 + $0x1c] sm:$0xf] }
 0x372   : > { %4780 = vrot.lane.b32.xlu0 %v4641_v29, %s6400_s8  ;;  %v4109_v29 = vrot.slane %v4108_v21, 4  ;;  %v4896_v21 = vrot.slane %v4841_v44, 5  ;;  %v4895_v28 = vrot.slane %v4893_v19, 4  ;;  %3484 = vst.msk [vmem:[#allocation5 + $0x3c] sm:$0xf] %vm3365_vm0, %v3468_v31 }
 0x373   : > { %v4692_v42 = vrot.slane %v4690_v22, 4  ;;  %v4894_v22 = vsel %vm6855_vm13, %v5930_v18, %v4893_v19  ;;  %v4469_v59 = vld [vmem:[#allocation3 + $0x4c] sm:$0xf]  ;;  %v8197_v44 = vld [vmem:[#allocation3 + $0x40] sm:$0xf] }
 0x374   : > { %v4114_v33 = vsel %vm6886_vm15, %v4109_v29, %v4113_v61  ;;  %v3856_v61 = vrot.slane %v3854_v20, 4  ;;  %4958 = vst.msk [vmem:[#allocation5 + $0x20] sm:$0xf] %vm3365_vm0, %v4894_v22  ;;  %v3515_v22 = vld [vmem:[#allocation3 + $0x50] sm:$0x1] }
 0x375   : > { %4409 = vrot.lane.b32.xlu1 %v4366_v34, %s6396_s26  ;;  %v4094_v34 = vrot.slane %v4092_v52, 4  ;;  %4278 = vst.msk [vmem:[#allocation5 + $0x28] sm:$0xf] %vm3365_vm0, %v4114_v33  ;;  %v4693_v0 = vor.u32 %v4692_v42, %v8094_v41  ;;  %v8139_v52 = vrot.slane %v3649_v1, 5 }
 0x376   : > { %3723 = vrot.lane.b32.xlu0 %v3604_v16, %s6396_s26  ;;  %v8091_v16 = vrot.slane %v3622_v25, 4  ;;  %v5917_v25 = vrot.slane %v8115_v2, 9 }
 0x377   : > { %v4098_v23 = vor.u32 %v4097_v35, %v4094_v34  ;;  %v8137_v29 = vrot.slane %v4693_v0, 4  ;;  %v4572_v34 = vld [vmem:[#allocation3 + $0x58] sm:$0xf]  ;;  %v4897_v35 = vsel %vm6855_vm13, %v4895_v28, %v4896_v21  ;;  %v8184_v0 = vld [vmem:[#allocation3 + $0x50] sm:$0x1]  ;;  %v4119_v21 = vshll.u32 %v4049_v9, 16 }
 0x378   : > { %v3628_v3 = vsel %vm6886_vm15, %v8091_v16, %v8056_v51  ;;  %4959 = vst.msk [vmem:[#allocation5 + $0x2c] sm:$0xf] %vm3365_vm0, %v4897_v35  ;;  %v4050_v51 = vld [vmem:[#allocation3 + $0x28] sm:$0xf]  ;;  %v4571_v16 = vld [vmem:[#allocation3 + $0x54] sm:$0xf] }
 0x379   : > { %3894 = vrot.lane.b32.xlu1 %v3851_v50, %s6399_s12  ;;  %v4682_v50 = vrot.slane %v4680_v15, 5  ;;  %v4099_v46 = vrot.slane %v4098_v23, 4  ;;  %v4129_v23 = vshrl.u32 %v4050_v51, 16  ;;  %v4701_v37 = vshrl.u32 %v4571_v16, 16 }
 0x37a   : > { %4407 = vrot.lane.b32.xlu0 %v4363_v40, %s6396_s26  ;;  %v4836_v40 = vld [vmem:[#allocation3 + $0x18] sm:$0xe]  ;;  %v4699_v2 = vsel %vm6886_vm15, %v8137_v29, %v8131_v26  ;;  %v3664_v29 = vshrl.u32 %v3513_v7, 16  ;;  %v4121_v31 = vrot.slane %v4119_v21, 5  ;;  %v4379_v35 = vrot.slane %v8184_v0, 5 }
 0x37b   : > { %v5929_v55 = vrot.slane %v4836_v40, 9  ;;  %v4104_v10 = vsel %vm6886_vm15, %v4099_v46, %v8068_v5  ;;  %v4683_v24 = vor.u32 %v4682_v50, %v4679_v47  ;;  %v4890_v5 = vsel %vm6855_vm13, %v4888_v14, %v4889_v6  ;;  %v4051_v47 = vld [vmem:[#allocation3 + $0x2c] sm:$0x1]  ;;  %v8195_v14 = vld [vmem:[#allocation3 + $0x48] sm:$0xe] }
 0x37c   : > { %4277 = vst.msk [vmem:[#allocation5 + $0x1c] sm:$0xf] %vm3365_vm0, %v4104_v10  ;;  %4957 = vst.msk [vmem:[#allocation5 + $0x14] sm:$0xf] %vm3365_vm0, %v4890_v5  ;;  %v4370_v40 = vsel %vm6855_vm13, %v5925_v12, %v4369_v49  ;;  %v3858_v50 = vsel %vm6855_vm13, %v3856_v61, %v3857_v39  ;;  %v4131_v46 = vrot.slane %v4129_v23, 4  ;;  %v4376_v49 = vrot.slane %v8158_v45, 5 }
 0x37d   : > { %4506 = vrot.lane.b32.xlu1 %v4467_v58, %s6399_s12  ;;  %v8107_v58 = vld [vmem:[#allocation3 + $0x3c] sm:$0xf]  ;;  %v4887_v11 = vsel %vm6855_vm13, %v5929_v55, %v4886_v60  ;;  %v8154_v42 = vrot.slane %v4683_v24, 4  ;;  %v4135_v55 = vshll.u32 %v4051_v47, 16  ;;  %v4704_v60 = vshll.u32 %v4571_v16, 16 }
 0x37e   : > { %3892 = vrot.lane.b32.xlu0 %v3848_v8, %s6399_s12  ;;  %v3653_v8 = vshrl.u32 %v3511_v48, 16  ;;  %4956 = vst.msk [vmem:[#allocation5 + $0x8] sm:$0xf] %vm3365_vm0, %v4887_v11  ;;  %v3643_v33 = vshll.u32 %v8107_v58, 16  ;;  %v4125_v48 = vshll.u32 %v4050_v51, 16  ;;  %v3673_v12 = vshll.u32 %v3514_v54, 16 }
 0x37f   : > { %v4137_v39 = vrot.slane %v4135_v55, 5  ;;  %v3677_v6 = vshrl.u32 %v3514_v54, 16  ;;  %v3955_v11 = vld [vmem:[#allocation3 + $0x40] sm:$0xf]  ;;  %v4703_v18 = vrot.slane %v4701_v37, 4  ;;  %v4706_v19 = vrot.slane %v4704_v60, 5 }
 0x380   : > { %v8141_v30 = vrot.slane %v3653_v8, 4  ;;  %v6272_v8 = vld [vmem:[#allocation5 + $0x20] ss:$12 sps:$4 sm:$0xff]   ;;  %v8201_v24 = vld [vmem:[#allocation3 + $0x44] sm:$0x1]  ;;  %v8203_v5 = vrot.slane %v3673_v12, 5  ;;  %v4689_v21 = vsel %vm6886_vm15, %v8154_v42, %v8094_v41 }
 0x381   : > { %3992 = vrot.lane.b32.xlu1 %v3953_v17, %s6400_s8  ;;  %v3659_v17 = vshll.u32 %v3512_v53, 16  ;;  %v4710_v53 = vshll.u32 %v4572_v34, 16  ;;  %v3679_v28 = vrot.slane %v3677_v6, 4  ;;  %v4707_v47 = vor.u32 %v4706_v19, %v4703_v18  ;;  %v3954_v23 = vld [vmem:[#allocation3 + $0x3c] sm:$0xf] }
 0x382   : > { %4504 = vrot.lane.b32.xlu0 %v4466_v63, %s6399_s12  ;;  %v3640_v63 = vshrl.u32 %v8107_v58, 16  ;;  %v8174_v58 = vrot.slane %v4125_v48, 5  ;;  %v3656_v13 = vor.u32 %v8141_v30, %v8139_v52  ;;  %v3667_v30 = vshll.u32 %v3513_v7, 16  ;;  %v8231_v12 = vld [vmem:[#allocation3 + $0x5c] sm:$0x1] }
 0x383   : > { %v8148_v15 = vrot.slane %v3659_v17, 5  ;;  %v8186_v1 = vrot.slane %v4710_v53, 5  ;;  %v3864_v53 = vrot.slane %v8201_v24, 5  ;;  %v3683_v54 = vshll.u32 %v3515_v22, 16  ;;  %v4054_v18 = vld [vmem:[#allocation3 + $0x38] sm:$0x1] }
 0x384   : > { %v4132_v27 = vor.u32 %v4131_v46, %v8174_v58  ;;  %v3680_v55 = vor.u32 %v3679_v28, %v8203_v5  ;;  %v8224_v46 = vld [vmem:[#allocation3 + $0x58] sm:$0xf]  ;;  %v8238_v0 = vrot.slane %v4707_v47, 4  ;;  %v4159_v41 = vshll.u32 %v4054_v18, 16  ;;  %v4052_v42 = vld [vmem:[#allocation3 + $0x30] sm:$0xf] }
 0x385   : > { %4786 = vrot.lane.b32.xlu1 %v4675_v43, %s6400_s8  ;;  %v8156_v43 = vrot.slane %v3640_v63, 4  ;;  %v6271_v56 = vld [vmem:[#allocation5 + $0x8] ss:$12 sps:$4 sm:$0xff]   ;;  %v8245_v7 = vrot.slane %v3683_v54, 5  ;;  %v4843_v47 = vld [vmem:[#allocation3 + $0x34] sm:$0xf] }
 0x386   : > { %3990 = vrot.lane.b32.xlu0 %v3952_v36, %s6400_s8  ;;  %v3467_v36 = vld [vmem:[#allocation3 + $0x18] sm:$0xf]  ;;  %6135 = vmatprep.mubr.msk.bf16.mxu0 %vm5275_vm3, %v6271_v56  ;;  %v4133_v10 = vrot.slane %v4132_v27, 4  ;;  %v4573_v63 = vld [vmem:[#allocation3 + $0x5c] sm:$0x1] }
 0x387   : > { %3483 = vst.msk [vmem:[#allocation5 + $0x30] sm:$0xf] %vm3365_vm0, %v3467_v36  ;;  %6136 = vmatmul.mubr.msk.bf16.vlgmr.msra.gmra.mxu0 %vm5275_vm3, %v6272_v8  ;;  %v3861_v36 = vrot.slane %v8197_v44, 5  ;;  %v4720_v16 = vshll.u32 %v4573_v63, 16  ;;  %v3470_v27 = vld [vmem:[#allocation3 + $0x28] sm:$0xf] }
 0x388   : > { %3486 = vst.msk [vmem:[#allocation5 + $0x54] sm:$0xf] %vm3365_vm0, %v3470_v27  ;;  %v3469_v8 = vld [vmem:[#allocation3 + $0x24] sm:$0xf]  ;;  %v8265_v63 = vld [vmem:[#allocation3 + $0x50] sm:$0x1] }
 0x389   : > { %3729 = vrot.lane.b32.xlu1 %v3638_v62, %s6396_s26  ;;  %v3855_v62 = vsel %vm6855_vm13, %v5917_v25, %v3854_v20  ;;  %v4116_v20 = vshrl.u32 %v4049_v9, 16  ;;  %v4138_v25 = vsel %vm6886_vm15, %v4133_v10, %v4137_v39  ;;  %v8228_v60 = vrot.slane %v3861_v36, 4  ;;  %3485 = vst.msk [vmem:[#allocation5 + $0x48] sm:$0xf] %vm3365_vm0, %v3469_v8  ;;  %v4845_v8 = vld [vmem:[#allocation3 + $0x3c] sm:$0xe] }
 0x38a   : > { %4784 = vrot.lane.b32.xlu0 %v4665_v57, %s6400_s8  ;;  %v3645_v57 = vrot.slane %v3643_v33, 5  ;;  %4280 = vst.msk [vmem:[#allocation5 + $0x40] sm:$0xf] %vm3365_vm0, %v4138_v25  ;;  %v3657_v33 = vrot.slane %v3656_v13, 4  ;;  %v4383_v9 = vrot.slane %v8224_v46, 5  ;;  %v4900_v27 = vrot.slane %v4843_v47, 5 }
 0x38b   : > { %v4118_v26 = vrot.slane %v4116_v20, 4  ;;  %v8248_v13 = vld [vmem:[#allocation3 + $0x54] sm:$0xe]  ;;  %v8255_v20 = vrot.slane %v3680_v55, 4  ;;  %v4844_v55 = vld [vmem:[#allocation3 + $0x38] sm:$0x1] }
 0x38c   : > { %v3646_v61 = vor.u32 %v3645_v57, %v8156_v43  ;;  %v8214_v43 = vld [vmem:[#allocation3 + $0x3c] sm:$0xe]  ;;  %v3666_v57 = vrot.slane %v3664_v29, 4  ;;  %v5927_v28 = vrot.slane %v8248_v13, 9  ;;  %v8275_v29 = vld [vmem:[#allocation3 + $0x64] sm:$0xf] }
 0x38d   : > { %4413 = vrot.lane.b32.xlu1 %v4373_v38, %s6396_s26  ;;  %v4714_v38 = vshrl.u32 %v4572_v34, 16  ;;  %v4378_v34 = vrot.slane %v4376_v49, 4  ;;  %v4122_v48 = vor.u32 %v4121_v31, %v4118_v26  ;;  %v5918_v56 = vrot.slane %v8214_v43, 9  ;;  %v4847_v18 = vld [vmem:[#allocation3 + $0x44] sm:$0x1] }
 0x38e   : > { %3727 = vrot.lane.b32.xlu0 %v3628_v3, %s6396_s26  ;;  %v4468_v3 = vld [vmem:[#allocation3 + $0x48] sm:$0xf]  ;;  %v3472_v24 = vld [vmem:[#allocation3 + $0x34] sm:$0xf]  ;;  %v4055_v47 = vld [vmem:[#allocation3 + $0x3c] sm:$0xf] }
 0x38f   : > { %v4716_v17 = vrot.slane %v4714_v38, 4  ;;  %v3669_v38 = vrot.slane %v3667_v30, 5  ;;  %v4380_v22 = vsel %vm6855_vm13, %v4378_v34, %v4379_v35  ;;  %v8280_v30 = vrot.slane %v4383_v9, 4  ;;  %3488 = vst.msk [vmem:[#allocation5 + $0x6c] sm:$0xf] %vm3365_vm0, %v3472_v24 }
 0x390   : > { %v3862_v45 = vsel %vm6855_vm13, %v5918_v56, %v3861_v36  ;;  %v4058_v24 = vld [vmem:[#allocation3 + $0x48] sm:$0xf] }
 0x391   : > { %3898 = vrot.lane.b32.xlu1 %v3858_v50, %s6399_s12  ;;  %v4717_v51 = vor.u32 %v4716_v17, %v8186_v1  ;;  %v5926_v50 = vrot.slane %v8195_v14, 9  ;;  %v4053_v17 = vld [vmem:[#allocation3 + $0x34] sm:$0xf] }
 0x392   : > { %4411 = vrot.lane.b32.xlu0 %v4370_v40, %s6396_s26  ;;  %v8218_v40 = vrot.slane %v3646_v61, 4  ;;  %v8263_v61 = vld [vmem:[#allocation3 + $0x4c] sm:$0xf]  ;;  %v4153_v25 = vshrl.u32 %v4053_v17, 16 }
 0x393   : > { %v8234_v39 = vrot.slane %v4717_v51, 4  ;;  %v3868_v35 = vrot.slane %v8263_v61, 5  ;;  %v3871_v51 = vrot.slane %v8265_v63, 5  ;;  %v3959_v61 = vld [vmem:[#allocation3 + $0x58] sm:$0xf] }
 0x394   : > { %v3652_v26 = vsel %vm6886_vm15, %v8218_v40, %v8139_v52  ;;  %v4140_v52 = vshrl.u32 %v4052_v42, 16  ;;  %v4161_v40 = vrot.slane %v4159_v41, 5  ;;  %v3471_v41 = vld [vmem:[#allocation3 + $0x30] sm:$0xf] }
 0x395   : > { %4510 = vrot.lane.b32.xlu1 %v4469_v59, %s6399_s12  ;;  %v4123_v59 = vrot.slane %v4122_v48, 4  ;;  %3487 = vst.msk [vmem:[#allocation5 + $0x60] sm:$0xf] %vm3365_vm0, %v3471_v41  ;;  %v4470_v41 = vld [vmem:[#allocation3 + $0x54] sm:$0xf] }
 0x396   : > { %3896 = vrot.lane.b32.xlu0 %v3855_v62, %s6399_s12  ;;  %v8236_v62 = vrot.slane %v4720_v16, 5  ;;  %v4143_v16 = vshll.u32 %v4052_v42, 16  ;;  %v4142_v54 = vrot.slane %v4140_v52, 4  ;;  %v4057_v52 = vld [vmem:[#allocation3 + $0x44] sm:$0x1] }
 0x397   : > { %v4128_v6 = vsel %vm6886_vm15, %v4123_v59, %v8174_v58  ;;  %v3662_v58 = vsel %vm6886_vm15, %v3657_v33, %v8148_v15  ;;  %v4149_v15 = vshll.u32 %v4053_v17, 16  ;;  %v4842_v33 = vld [vmem:[#allocation3 + $0x30] sm:$0xe]  ;;  %v4734_v59 = vshll.u32 %v8275_v29, 16  ;;  %v4846_v17 = vld [vmem:[#allocation3 + $0x40] sm:$0xf] }
 0x398   : > { %4279 = vst.msk [vmem:[#allocation5 + $0x34] sm:$0xf] %vm3365_vm0, %v4128_v6  ;;  %v4903_v6 = vrot.slane %v4844_v55, 5  ;;  %v4183_v56 = vshll.u32 %v4057_v52, 16 }
 0x399   : > { %3996 = vrot.lane.b32.xlu1 %v3955_v11, %s6400_s8  ;;  %v3670_v11 = vor.u32 %v3669_v38, %v3666_v57  ;;  %v8282_v31 = vrot.slane %v4149_v15, 5  ;;  %v5931_v57 = vrot.slane %v4842_v33, 9 }
 0x39a   : > { %4508 = vrot.lane.b32.xlu0 %v4468_v3, %s6399_s12  ;;  %v4155_v3 = vrot.slane %v4153_v25, 4 }
 0x39b   : > { %v4396_v37 = vpop.permute.xlu1 %4395  ;;  %v8285_v34 = vrot.slane %v3670_v11, 4  ;;  %v4901_v25 = vsel %vm6855_vm13, %v5931_v57, %v4900_v27  ;;  %v4164_v57 = vshrl.u32 %v4055_v47, 16 }
 0x39c   : > { %4443 = vst.msk [vmem:[#allocation5 + $0x4] sm:$0xf] %vm3759_vm14, %v4396_v37  ;;  %v3881_v10 = vpop.permute.xlu0 %3880  ;;  %v4145_v37 = vrot.slane %v4143_v16, 5 }
 0x39d   : > { %4790 = vrot.lane.b32.xlu1 %v4699_v2, %s6400_s8  ;;  %v4386_v2 = vrot.slane %v8231_v12, 5  ;;  %4960 = vst.msk [vmem:[#allocation5 + $0x38] sm:$0xf] %vm3365_vm0, %v4901_v25  ;;  %v4062_v12 = vld [vmem:[#allocation3 + $0x58] sm:$0xf] }
 0x39e   : > { %3994 = vrot.lane.b32.xlu0 %v3954_v23, %s6400_s8  ;;  %v4156_v23 = vor.u32 %v4155_v3, %v8282_v31  ;;  %v4146_v15 = vor.u32 %v4145_v37, %v4142_v54  ;;  %v4056_v3 = vld [vmem:[#allocation3 + $0x40] sm:$0xf]  ;;  %v4059_v37 = vld [vmem:[#allocation3 + $0x4c] sm:$0xf] }
 0x39f   : > { %v4398_v19 = vpop.permute.xlu1 %4397  ;;  %v4173_v16 = vshll.u32 %v4056_v3, 16  ;;  %v4177_v43 = vshrl.u32 %v4056_v3, 16  ;;  %v4201_v25 = vshrl.u32 %v4059_v37, 16 }
 0x3a0   : > { %4444 = vst.msk [vmem:[#allocation5 + $0x10] sm:$0xf] %vm3759_vm14, %v4398_v19  ;;  %v4157_v11 = vrot.slane %v4156_v23, 4  ;;  %v5932_v19 = vrot.slane %v4845_v8, 9  ;;  %v4147_v14 = vrot.slane %v4146_v15, 4  ;;  %v4185_v8 = vrot.slane %v4183_v56, 5 }
 0x3a1   : > { %3733 = vrot.lane.b32.xlu1 %v3662_v58, %s6396_s26  ;;  %v3865_v58 = vsel %vm6855_vm13, %v8228_v60, %v3864_v53  ;;  %v4377_v53 = vsel %vm6855_vm13, %v5926_v50, %v4376_v49  ;;  %v4471_v49 = vld [vmem:[#allocation3 + $0x58] sm:$0xf]  ;;  %v3474_v23 = vld [vmem:[#allocation3 + $0x40] sm:$0xf]  ;;  %v8336_v55 = vrot.slane %v4173_v16, 5  ;;  %v4203_v52 = vrot.slane %v4201_v25, 4 }
 0x3a2   : > { %4788 = vrot.lane.b32.xlu0 %v4689_v21, %s6400_s8  ;;  %v4738_v21 = vshrl.u32 %v8275_v29, 16  ;;  %v4162_v60 = vsel %vm6886_vm15, %v4157_v11, %v4161_v40  ;;  %3490 = vst.msk [vmem:[#allocation5 + $0x84] sm:$0xf] %vm3365_vm0, %v3474_v23  ;;  %v3473_v40 = vld [vmem:[#allocation3 + $0x3c] sm:$0xf]  ;;  %v4152_v54 = vsel %vm6886_vm15, %v4147_v14, %v8282_v31  ;;  %v4197_v11 = vshll.u32 %v4059_v37, 16 }
 0x3a3   : > { %v3883_v48 = vpop.permute.xlu1 %3882  ;;  %4282 = vst.msk [vmem:[#allocation5 + $0x58] sm:$0xf] %vm3365_vm0, %v4162_v60  ;;  %3489 = vst.msk [vmem:[#allocation5 + $0x78] sm:$0xf] %vm3365_vm0, %v3473_v40  ;;  %v4188_v60 = vshrl.u32 %v4058_v24, 16 }
 0x3a4   : > { %v3712_v38 = vpop.permute.xlu0 %3711  ;;  %4281 = vst.msk [vmem:[#allocation5 + $0x4c] sm:$0xf] %vm3365_vm0, %v4152_v54  ;;  %v4849_v14 = vld [vmem:[#allocation3 + $0x4c] sm:$0xf]  ;;  %v3518_v29 = vld [vmem:[#allocation3 + $0x5c] sm:$0x1] }
 0x3a5   : > { %3760 = vst.msk [vmem:[#allocation5] sm:$0xf] %vm3759_vm14, %v3712_v38  ;;  %4417 = vrot.lane.b32.xlu1 %v4380_v22, %s6396_s26  ;;  %v4902_v22 = vrot.slane %v4900_v27, 4  ;;  %v4167_v38 = vshll.u32 %v4055_v47, 16  ;;  %v4190_v47 = vrot.slane %v4188_v60, 4  ;;  %v4914_v54 = vrot.slane %v4849_v14, 5 }
 0x3a6   : > { %3731 = vrot.lane.b32.xlu0 %v3652_v26, %s6396_s26  ;;  %3929 = vst.msk [vmem:[#allocation5] sm:$0xf] %vm3928_vm4, %v3881_v10  ;;  %v4907_v10 = vrot.slane %v4846_v17, 5  ;;  %v4910_v26 = vrot.slane %v4847_v18, 5  ;;  %v3957_v17 = vld [vmem:[#allocation3 + $0x4c] sm:$0xf] }
 0x3a7   : > { %v4495_v42 = vpop.permute.xlu1 %4494  ;;  %v4904_v50 = vsel %vm6855_vm13, %v4902_v22, %v4903_v6  ;;  %v4179_v6 = vrot.slane %v4177_v43, 4  ;;  %v8343_v18 = vld [vmem:[#allocation3 + $0x58] sm:$0xf]  ;;  %v4169_v15 = vrot.slane %v4167_v38, 5  ;;  %v4723_v43 = vsel %vm6886_vm15, %v8234_v39, %v8236_v62 }
 0x3a8   : > { %v3714_v33 = vpop.permute.xlu0 %3713  ;;  %4541 = vst.msk [vmem:[#allocation5 + $0x10] sm:$0xf] %vm3928_vm4, %v4495_v42  ;;  %v4908_v44 = vsel %vm6855_vm13, %v5932_v19, %v4907_v10  ;;  %v4909_v36 = vrot.slane %v4907_v10, 4  ;;  %v4166_v19 = vrot.slane %v4164_v57, 4  ;;  %v4191_v10 = vshll.u32 %v4058_v24, 16 }
 0x3a9   : > { %3761 = vst.msk [vmem:[#allocation5 + $0xc] sm:$0xf] %vm3759_vm14, %v3714_v33  ;;  %3902 = vrot.lane.b32.xlu1 %v3865_v58, %s6399_s12  ;;  %v4060_v58 = vld [vmem:[#allocation3 + $0x50] sm:$0x1]  ;;  %v4180_v42 = vor.u32 %v4179_v6, %v8336_v55  ;;  %v3956_v57 = vld [vmem:[#allocation3 + $0x48] sm:$0xf] }
 0x3aa   : > { %4961 = vst.msk [vmem:[#allocation5 + $0x44] sm:$0xf] %vm3365_vm0, %v4904_v50  ;;  %4415 = vrot.lane.b32.xlu0 %v4377_v53, %s6396_s26  ;;  %4962 = vst.msk [vmem:[#allocation5 + $0x50] sm:$0xf] %vm3365_vm0, %v4908_v44  ;;  %v4207_v22 = vshll.u32 %v4060_v58, 16  ;;  %v8349_v53 = vrot.slane %v4197_v11, 5  ;;  %v4170_v3 = vor.u32 %v4169_v15, %v4166_v19  ;;  %v4713_v19 = vsel %vm6886_vm15, %v8238_v0, %v8186_v1 }
 0x3ab   : > { %3930 = vst.msk [vmem:[#allocation5 + $0xc] sm:$0xf] %vm3928_vm4, %v3883_v48  ;;  %v3981_v27 = vpop.permute.xlu1 %3980  ;;  %v4911_v48 = vsel %vm6855_vm13, %v4909_v36, %v4910_v26  ;;  %v4848_v26 = vld [vmem:[#allocation3 + $0x48] sm:$0xe]  ;;  %v4181_v16 = vrot.slane %v4180_v42, 4  ;;  %v4193_v23 = vrot.slane %v4191_v10, 5  ;;  %v3686_v0 = vsel %vm6886_vm15, %v8255_v20, %v8245_v7 }
 0x3ac   : > { %v4493_v31 = vpop.permute.xlu0 %4492  ;;  %4028 = vst.msk [vmem:[#allocation5 + $0xc] sm:$0xf] %vm4026_vm11, %v3981_v27  ;;  %v4209_v33 = vrot.slane %v4207_v22, 5  ;;  %v4850_v44 = vld [vmem:[#allocation3 + $0x50] sm:$0x1]  ;;  %v4204_v40 = vor.u32 %v4203_v52, %v8349_v53  ;;  %v3697_v38 = vshll.u32 %v8343_v18, 16 }
 0x3ad   : > { %4963 = vst.msk [vmem:[#allocation5 + $0x5c] sm:$0xf] %vm3365_vm0, %v4911_v48  ;;  %4514 = vrot.lane.b32.xlu1 %v4471_v49, %s6399_s12  ;;  %v5933_v49 = vrot.slane %v4848_v26, 9  ;;  %v4186_v37 = vsel %vm6886_vm15, %v4181_v16, %v4185_v8  ;;  %v4194_v27 = vor.u32 %v4193_v23, %v4190_v47  ;;  %v4917_v48 = vrot.slane %v4850_v44, 5  ;;  %v4851_v6 = vld [vmem:[#allocation3 + $0x54] sm:$0xe] }
 0x3ae   : > { %4540 = vst.msk [vmem:[#allocation5 + $0x4] sm:$0xf] %vm3928_vm4, %v4493_v31  ;;  %3900 = vrot.lane.b32.xlu0 %v3862_v45, %s6399_s12  ;;  %v4171_v45 = vrot.slane %v4170_v3, 4  ;;  %v4205_v62 = vrot.slane %v4204_v40, 4  ;;  %v4916_v11 = vrot.slane %v4914_v54, 4  ;;  %v4387_v26 = vsel %vm6855_vm13, %v8280_v30, %v4386_v2 }
 0x3af   : > { %v4775_v50 = vpop.permute.xlu1 %4774  ;;  %4284 = vst.msk [vmem:[#allocation5 + $0x70] sm:$0xf] %vm3365_vm0, %v4186_v37  ;;  %v4915_v58 = vsel %vm6855_vm13, %v5933_v49, %v4914_v54  ;;  %v4852_v31 = vld [vmem:[#allocation3 + $0x58] sm:$0xf]  ;;  %v4853_v8 = vld [vmem:[#allocation3 + $0x5c] sm:$0x1] }
 0x3b0   : > { %v3979_v36 = vpop.permute.xlu0 %3978  ;;  %4821 = vst.msk [vmem:[#allocation5 + $0x10] sm:$0xf] %vm4026_vm11, %v4775_v50  ;;  %v4176_v39 = vsel %vm6886_vm15, %v4171_v45, %v8336_v55  ;;  %v4195_v25 = vrot.slane %v4194_v27, 4  ;;  %v5934_v55 = vrot.slane %v4851_v6, 9  ;;  %v4210_v24 = vsel %vm6886_vm15, %v4205_v62, %v4209_v33  ;;  %v3476_v10 = vld [vmem:[#allocation3 + $0x4c] sm:$0xf] }
 0x3b1   : > { %v6277_v56 = vld [vmem:[#allocation5 + $0x38] ss:$12 sps:$4 sm:$0xff]   ;;  %4027 = vst.msk [vmem:[#allocation5] sm:$0xf] %vm4026_vm11, %v3979_v36  ;;  %4000 = vrot.lane.b32.xlu1 %v3957_v17, %s6400_s8  ;;  %v4921_v42 = vrot.slane %v4852_v31, 5  ;;  %v4924_v60 = vrot.slane %v4853_v8, 5 }
 0x3b2   : > { %4512 = vrot.lane.b32.xlu0 %v4470_v41, %s6399_s12  ;;  %6139 = vmatprep.mubr.msk.bf16.mxu0 %vm5275_vm3, %v6277_v56  ;;  %4283 = vst.msk [vmem:[#allocation5 + $0x64] sm:$0xf] %vm3365_vm0, %v4176_v39  ;;  %4964 = vst.msk [vmem:[#allocation5 + $0x68] sm:$0xf] %vm3365_vm0, %v4915_v58  ;;  %v4918_v41 = vsel %vm6855_vm13, %v4916_v11, %v4917_v48  ;;  %v3475_v1 = vld [vmem:[#allocation3 + $0x48] sm:$0xf]  ;;  %v4200_v52 = vsel %vm6886_vm15, %v4195_v25, %v8349_v53 }
 0x3b3   : > { %v3718_v17 = vpop.permute.xlu1 %3717  ;;  %v8393_v3 = vld [vmem:[#allocation3 + $0x68] sm:$0x1]  ;;  %4286 = vst.msk [vmem:[#allocation5 + $0x88] sm:$0xf] %vm3365_vm0, %v4210_v24  ;;  %4965 = vst.msk [vmem:[#allocation5 + $0x74] sm:$0xf] %vm3365_vm0, %v4918_v41  ;;  %v4922_v30 = vsel %vm6855_vm13, %v5934_v55, %v4921_v42 }
 0x3b4   : > { %v6278_v15 = vld [vmem:[#allocation5 + $0x50] ss:$12 sps:$4 sm:$0xff]   ;;  %v4773_v22 = vpop.permute.xlu0 %4772  ;;  %3763 = vst.msk [vmem:[#allocation5 + $0x24] sm:$0xf] %vm3759_vm14, %v3718_v17  ;;  %v4063_v7 = vld [vmem:[#allocation3 + $0x5c] sm:$0x1] }
 0x3b5   : > { %4820 = vst.msk [vmem:[#allocation5 + $0x4] sm:$0xf] %vm4026_vm11, %v4773_v22  ;;  %4794 = vrot.lane.b32.xlu1 %v4723_v43, %s6400_s8  ;;  %6140 = vmatmul.mubr.msk.bf16.gmra.mxu0 %vm5275_vm3, %v6278_v15  ;;  %v4061_v20 = vld [vmem:[#allocation3 + $0x54] sm:$0xf]  ;;  %v8404_v2 = vld [vmem:[#allocation3 + $0x60] sm:$0xf] }
 0x3b6   : > { %3492 = vst.msk [vmem:[#allocation5 + $0x9c] sm:$0xf] %vm3365_vm0, %v3476_v10  ;;  %3491 = vst.msk [vmem:[#allocation5 + $0x90] sm:$0xf] %vm3365_vm0, %v3475_v1  ;;  %3998 = vrot.lane.b32.xlu0 %v3956_v57, %s6400_s8  ;;  %v4923_v33 = vrot.slane %v4921_v42, 4  ;;  %v4221_v53 = vshll.u32 %v4062_v12, 16 }
 0x3b7   : > { %4285 = vst.msk [vmem:[#allocation5 + $0x7c] sm:$0xf] %vm3365_vm0, %v4200_v52  ;;  %v4225_v14 = vshrl.u32 %v4062_v12, 16  ;;  %v4402_v50 = vpop.permute.xlu1 %4401  ;;  %v3701_v16 = vshrl.u32 %v8343_v18, 16  ;;  %4966 = vst.msk [vmem:[#allocation5 + $0x80] sm:$0xf] %vm3365_vm0, %v4922_v30 }
 0x3b8   : > { %v4231_v47 = vshll.u32 %v4063_v7, 16  ;;  %v4212_v23 = vshrl.u32 %v4061_v20, 16  ;;  %v4215_v44 = vshll.u32 %v4061_v20, 16  ;;  %v3716_v49 = vpop.permute.xlu0 %3715  ;;  %4446 = vst.msk [vmem:[#allocation5 + $0x28] sm:$0xf] %vm3759_vm14, %v4402_v50  ;;  %v3870_v36 = vrot.slane %v3868_v35, 4 }
 0x3b9   : > { %v4925_v43 = vsel %vm6855_vm13, %v4923_v33, %v4924_v60  ;;  %v4223_v56 = vrot.slane %v4221_v53, 5  ;;  %v4227_v45 = vrot.slane %v4225_v14, 4  ;;  %3762 = vst.msk [vmem:[#allocation5 + $0x18] sm:$0xf] %vm3759_vm14, %v3716_v49  ;;  %3737 = vrot.lane.b32.xlu1 %v3686_v0, %s6396_s26  ;;  %v3794_v40 = vld [vmem:[#allocation3 + $0x48] sm:$0xe]  ;;  %v4384_v60 = vsel %vm6855_vm13, %v5927_v28, %v4383_v9 }
 0x3ba   : > { %v8420_v54 = vrot.slane %v4734_v59, 5  ;;  %v4740_v57 = vrot.slane %v4738_v21, 4  ;;  %4967 = vst.msk [vmem:[#allocation5 + $0x8c] sm:$0xf] %vm3365_vm0, %v4925_v43  ;;  %v4214_v37 = vrot.slane %v4212_v23, 4  ;;  %v4217_v27 = vrot.slane %v4215_v44, 5  ;;  %4792 = vrot.lane.b32.xlu0 %v4713_v19, %s6400_s8 }
 0x3bb   : > { %v4744_v48 = vshll.u32 %v8393_v3, 16  ;;  %v4725_v6 = vshrl.u32 %v8404_v2, 16  ;;  %v4228_v39 = vor.u32 %v4227_v45, %v4223_v56  ;;  %v4233_v62 = vrot.slane %v4231_v47, 5  ;;  %v3887_v58 = vpop.permute.xlu1 %3886  ;;  %v3516_v31 = vld [vmem:[#allocation3 + $0x54] sm:$0xf] }
 0x3bc   : > { %v3676_v59 = vsel %vm6886_vm15, %v8285_v34, %v8203_v5  ;;  %v8434_v21 = vrot.slane %v3697_v38, 5  ;;  %v3703_v11 = vrot.slane %v3701_v16, 4  ;;  %v4218_v8 = vor.u32 %v4217_v27, %v4214_v37  ;;  %v4400_v17 = vpop.permute.xlu0 %4399  ;;  %3932 = vst.msk [vmem:[#allocation5 + $0x24] sm:$0xf] %vm3928_vm4, %v3887_v58  ;;  %v6267_v19 = vld [vmem:[#allocation5] ss:$12 sps:$4 sm:$0xff]  }
 0x3bd   : > { %v6269_v15 = vld [vmem:[#allocation5 + $0x4] ss:$12 sps:$4 sm:$0xff]   ;;  %v4229_v25 = vrot.slane %v4228_v39, 4  ;;  %4445 = vst.msk [vmem:[#allocation5 + $0x1c] sm:$0xf] %vm3759_vm14, %v4400_v17  ;;  %4421 = vrot.lane.b32.xlu1 %v4387_v26, %s6396_s26  ;;  %v4741_v5 = vor.u32 %v4740_v57, %v8420_v54  ;;  %v4728_v34 = vshll.u32 %v8404_v2, 16  ;;  %v3872_v55 = vsel %vm6855_vm13, %v3870_v36, %v3871_v51 }
 0x3be   : > { %v6283_v18 = vld [vmem:[#allocation5 + $0x68] ss:$12 sps:$4 sm:$0xff]   ;;  %v4219_v38 = vrot.slane %v4218_v8, 4  ;;  %3735 = vrot.lane.b32.xlu0 %v3676_v59, %s6396_s26  ;;  %5332 = vmatprep.mubr.bf16.mxu1 %v6269_v15  ;;  %v5919_v22 = vrot.slane %v3794_v40, 9  ;;  %v3707_v24 = vshll.u32 %v3518_v29, 16  ;;  %v3704_v1 = vor.u32 %v3703_v11, %v8434_v21 }
 0x3bf   : > { %v4234_v41 = vsel %vm6886_vm15, %v4229_v25, %v4233_v62  ;;  %5333 = vmatmul.mubr.bf16.vlgmr.msra.gmra.mxu1 %v6267_v19  ;;  %v4499_v42 = vpop.permute.xlu1 %4498  ;;  %v8454_v10 = vld [vmem:[#allocation3 + $0x64] sm:$0xf]  ;;  %6143 = vmatprep.mubr.msk.bf16.mxu0 %vm5275_vm3, %v6283_v18  ;;  %v3688_v46 = vshrl.u32 %v3516_v31, 16  ;;  %v3691_v0 = vshll.u32 %v3516_v31, 16  ;;  %v8465_v28 = vrot.slane %v4741_v5, 4 }
 0x3c0   : > { %4288 = vst.msk [vmem:[#allocation5 + $0xa0] sm:$0xf] %vm3365_vm0, %v4234_v41  ;;  %v4224_v63 = vsel %vm6886_vm15, %v4219_v38, %v4223_v56  ;;  %v3885_v51 = vpop.permute.xlu0 %3884  ;;  %v4473_v9 = vld [vmem:[#allocation3 + $0x64] sm:$0xf]  ;;  %v8467_v26 = vrot.slane %v4744_v48, 5  ;;  %v8469_v3 = vrot.slane %v4725_v6, 4  ;;  %v3869_v12 = vsel %vm6855_vm13, %v5919_v22, %v3868_v35 }
 0x3c1   : > { %4543 = vst.msk [vmem:[#allocation5 + $0x28] sm:$0xf] %vm3928_vm4, %v4499_v42  ;;  %v6284_v13 = vld [vmem:[#allocation5 + $0x80] ss:$12 sps:$4 sm:$0xff]   ;;  %3931 = vst.msk [vmem:[#allocation5 + $0x18] sm:$0xf] %vm3928_vm4, %v3885_v51  ;;  %3906 = vrot.lane.b32.xlu1 %v3872_v55, %s6399_s12 }
 0x3c2   : > { %4287 = vst.msk [vmem:[#allocation5 + $0x94] sm:$0xf] %vm3365_vm0, %v4224_v63  ;;  %v8471_v52 = vrot.slane %v4728_v34, 5  ;;  %4419 = vrot.lane.b32.xlu0 %v4384_v60, %s6396_s26  ;;  %v8478_v7 = vrot.slane %v3707_v24, 5  ;;  %v4390_v20 = vrot.slane %v8454_v10, 5  ;;  %6144 = vmatmul.mubr.msk.bf16.gmra.mxu0 %vm5275_vm3, %v6284_v13  ;;  %v8483_v44 = vrot.slane %v3704_v1, 4 }
 0x3c3   : > { %v4065_v2 = vld [vmem:[#allocation3 + $0x64] sm:$0xf]  ;;  %v4064_v30 = vld [vmem:[#allocation3 + $0x60] sm:$0xf]  ;;  %v3985_v33 = vpop.permute.xlu1 %3984  ;;  %v8485_v35 = vrot.slane %v3688_v46, 4  ;;  %v8487_v49 = vrot.slane %v3691_v0, 5  ;;  %v4747_v48 = vsel %vm6886_vm15, %v8465_v28, %v8467_v26 }
 0x3c4   : > { %v4245_v53 = vshll.u32 %v4065_v2, 16  ;;  %v4249_v14 = vshrl.u32 %v4065_v2, 16  ;;  %v4236_v50 = vshrl.u32 %v4064_v30, 16  ;;  %v4239_v16 = vshll.u32 %v4064_v30, 16  ;;  %v4855_v47 = vld [vmem:[#allocation3 + $0x64] sm:$0xf]  ;;  %v4497_v23 = vpop.permute.xlu0 %4496 }
 0x3c5   : > { %4030 = vst.msk [vmem:[#allocation5 + $0x24] sm:$0xf] %vm4026_vm11, %v3985_v33  ;;  %v4928_v36 = vrot.slane %v4855_v47, 5  ;;  %v4858_v43 = vld [vmem:[#allocation3 + $0x70] sm:$0xf]  ;;  %4518 = vrot.lane.b32.xlu1 %v4473_v9, %s6399_s12  ;;  %v4731_v6 = vor.u32 %v8471_v52, %v8469_v3  ;;  %v3694_v9 = vor.u32 %v8487_v49, %v8485_v35  ;;  %v3710_v30 = vsel %vm6886_vm15, %v8483_v44, %v8478_v7 }
 0x3c6   : > { %4542 = vst.msk [vmem:[#allocation5 + $0x1c] sm:$0xf] %vm3928_vm4, %v4497_v23  ;;  %v4472_v56 = vld [vmem:[#allocation3 + $0x60] sm:$0xf]  ;;  %v3478_v45 = vld [vmem:[#allocation3 + $0x58] sm:$0xf]  ;;  %3904 = vrot.lane.b32.xlu0 %v3869_v12, %s6399_s12 }
 0x3c7   : > { %v4247_v40 = vrot.slane %v4245_v53, 5  ;;  %v4251_v57 = vrot.slane %v4249_v14, 4  ;;  %v4238_v37 = vrot.slane %v4236_v50, 4  ;;  %v4241_v27 = vrot.slane %v4239_v16, 5  ;;  %3494 = vst.msk [vmem:[#allocation5 + $0xb4] sm:$0xf] %vm3365_vm0, %v3478_v45  ;;  %v4779_v59 = vpop.permute.xlu1 %4778 }
 0x3c8   : > { %v4066_v39 = vld [vmem:[#allocation3 + $0x68] sm:$0x1]  ;;  %v4854_v62 = vld [vmem:[#allocation3 + $0x60] sm:$0xe]  ;;  %v3477_v29 = vld [vmem:[#allocation3 + $0x54] sm:$0xf]  ;;  %v3983_v15 = vpop.permute.xlu0 %3982 }
 0x3c9   : > { %v4856_v58 = vld [vmem:[#allocation3 + $0x68] sm:$0x1]  ;;  %v4252_v11 = vor.u32 %v4251_v57, %v4247_v40  ;;  %v4255_v31 = vshll.u32 %v4066_v39, 16  ;;  %v4242_v8 = vor.u32 %v4241_v27, %v4238_v37  ;;  %v5935_v17 = vrot.slane %v4854_v62, 9  ;;  %v4857_v19 = vld [vmem:[#allocation3 + $0x6c] sm:$0xe]  ;;  %4004 = vrot.lane.b32.xlu1 %v3959_v61, %s6400_s8 }
 0x3ca   : > { %4823 = vst.msk [vmem:[#allocation5 + $0x28] sm:$0xf] %vm4026_vm11, %v4779_v59  ;;  %v4930_v25 = vrot.slane %v4928_v36, 4  ;;  %v4931_v5 = vrot.slane %v4856_v58, 5  ;;  %v4859_v34 = vld [vmem:[#allocation3 + $0x74] sm:$0x1]  ;;  %4516 = vrot.lane.b32.xlu0 %v4472_v56, %s6399_s12 }
 0x3cb   : > { %3493 = vst.msk [vmem:[#allocation5 + $0xa8] sm:$0xf] %vm3365_vm0, %v3477_v29  ;;  %v5936_v18 = vrot.slane %v4857_v19, 9  ;;  %v4935_v38 = vrot.slane %v4858_v43, 5  ;;  %v4253_v55 = vrot.slane %v4252_v11, 4  ;;  %v4257_v22 = vrot.slane %v4255_v31, 5  ;;  %v3722_v46 = vpop.permute.xlu1 %3721 }
 0x3cc   : > { %4029 = vst.msk [vmem:[#allocation5 + $0x18] sm:$0xf] %vm4026_vm11, %v3983_v15  ;;  %v4243_v24 = vrot.slane %v4242_v8, 4  ;;  %v4929_v41 = vsel %vm6855_vm13, %v5935_v17, %v4928_v36  ;;  %v8506_v42 = vld [vmem:[#allocation3 + $0x58] sm:$0xf]  ;;  %v4932_v60 = vsel %vm6855_vm13, %v4930_v25, %v4931_v5  ;;  %v4938_v1 = vrot.slane %v4859_v34, 5  ;;  %v4777_v52 = vpop.permute.xlu0 %4776 }
 0x3cd   : > { %4968 = vst.msk [vmem:[#allocation5 + $0x98] sm:$0xf] %vm3365_vm0, %v4929_v41  ;;  %v4936_v63 = vsel %vm6855_vm13, %v5936_v18, %v4935_v38  ;;  %v4937_v51 = vrot.slane %v4935_v38, 4  ;;  %v3958_v0 = vld [vmem:[#allocation3 + $0x54] sm:$0xf]  ;;  %v4732_v13 = vrot.slane %v4731_v6, 4  ;;  %v4258_v26 = vsel %vm6886_vm15, %v4253_v55, %v4257_v22  ;;  %4798 = vrot.lane.b32.xlu1 %v4747_v48, %s6400_s8 }
 0x3ce   : > { %v4314_v28 = vld [vmem:[#allocation3 + $0x68] sm:$0x1]  ;;  %v4248_v3 = vsel %vm6886_vm15, %v4243_v24, %v4247_v40  ;;  %4969 = vst.msk [vmem:[#allocation5 + $0xa4] sm:$0xf] %vm3365_vm0, %v4932_v60  ;;  %4970 = vst.msk [vmem:[#allocation5 + $0xb0] sm:$0xf] %vm3365_vm0, %v4936_v63  ;;  %4002 = vrot.lane.b32.xlu0 %v3958_v0, %s6400_s8 }
 0x3cf   : > { %3765 = vst.msk [vmem:[#allocation5 + $0x3c] sm:$0xf] %vm3759_vm14, %v3722_v46  ;;  %v4939_v12 = vsel %vm6855_vm13, %v4937_v51, %v4938_v1  ;;  %v3875_v2 = vrot.slane %v8506_v42, 5  ;;  %v4392_v33 = vrot.slane %v4390_v20, 4  ;;  %v4393_v53 = vrot.slane %v4314_v28, 5  ;;  %v4406_v16 = vpop.permute.xlu1 %4405 }
 0x3d0   : > { %4290 = vst.msk [vmem:[#allocation5 + $0xb8] sm:$0xf] %vm3365_vm0, %v4258_v26  ;;  %4289 = vst.msk [vmem:[#allocation5 + $0xac] sm:$0xf] %vm3365_vm0, %v4248_v3  ;;  %v3799_v14 = vld [vmem:[#allocation3 + $0x5c] sm:$0x1]  ;;  %v4737_v47 = vsel %vm6886_vm15, %v4732_v13, %v8420_v54  ;;  %v3720_v61 = vpop.permute.xlu0 %3719 }
 0x3d1   : > { %4822 = vst.msk [vmem:[#allocation5 + $0x1c] sm:$0xf] %vm4026_vm11, %v4777_v52  ;;  %v4578_v50 = vld [vmem:[#allocation3 + $0x70] sm:$0xf]  ;;  %v3695_v23 = vrot.slane %v3694_v9, 4  ;;  %3741 = vrot.lane.b32.xlu1 %v3710_v30, %s6396_s26  ;;  %v3877_v7 = vrot.slane %v3875_v2, 4  ;;  %v4394_v43 = vsel %vm6855_vm13, %v4392_v33, %v4393_v53 }
 0x3d2   : > { %4971 = vst.msk [vmem:[#allocation5 + $0xbc] sm:$0xf] %vm3365_vm0, %v4939_v12  ;;  %v4312_v35 = vld [vmem:[#allocation3 + $0x60] sm:$0xe]  ;;  %v3878_v44 = vrot.slane %v3799_v14, 5  ;;  %v4758_v49 = vshll.u32 %v4578_v50, 16  ;;  %4796 = vrot.lane.b32.xlu0 %v4737_v47, %s6400_s8 }
 0x3d3   : > { %4448 = vst.msk [vmem:[#allocation5 + $0x40] sm:$0xf] %vm3759_vm14, %v4406_v16  ;;  %3764 = vst.msk [vmem:[#allocation5 + $0x30] sm:$0xf] %vm3759_vm14, %v3720_v61  ;;  %v4762_v36 = vshrl.u32 %v4578_v50, 16  ;;  %v3891_v54 = vpop.permute.xlu1 %3890  ;;  %v3700_v45 = vsel %vm6886_vm15, %v3695_v23, %v8434_v21  ;;  %v4978_v40 = vld [vmem:[#allocation5 + $0x24] sm:$0xff] }
 0x3d4   : > { %v5928_v57 = vrot.slane %v4312_v35, 9  ;;  %v3797_v37 = vld [vmem:[#allocation3 + $0x54] sm:$0xe]  ;;  %v4577_v27 = vld [vmem:[#allocation3 + $0x6c] sm:$0xf]  ;;  %v4404_v48 = vpop.permute.xlu0 %4403  ;;  %v3879_v21 = vsel %vm6855_vm13, %v3877_v7, %v3878_v44  ;;  %v4760_v59 = vrot.slane %v4758_v49, 5 }
 0x3d5   : > { %v6289_v56 = vld [vmem:[#allocation5 + $0x98] ss:$12 sps:$4 sm:$0xff]   ;;  %3934 = vst.msk [vmem:[#allocation5 + $0x3c] sm:$0xf] %vm3928_vm4, %v3891_v54  ;;  %4425 = vrot.lane.b32.xlu1 %v4394_v43, %s6396_s26  ;;  %v4764_v29 = vrot.slane %v4762_v36, 4  ;;  %v5920_v8 = vrot.slane %v3797_v37, 9 }
 0x3d6   : > { %6147 = vmatprep.mubr.msk.bf16.mxu0 %vm5275_vm3, %v6289_v56  ;;  %4447 = vst.msk [vmem:[#allocation5 + $0x34] sm:$0xf] %vm3759_vm14, %v4404_v48  ;;  %3739 = vrot.lane.b32.xlu0 %v3700_v45, %s6396_s26  ;;  %v4391_v31 = vsel %vm6855_vm13, %v5928_v57, %v4390_v20  ;;  %v4579_v17 = vld [vmem:[#allocation3 + $0x74] sm:$0x1]  ;;  %v4749_v19 = vshrl.u32 %v4577_v27, 16  ;;  %v4752_v15 = vshll.u32 %v4577_v27, 16 }
 0x3d7   : > { %v4503_v11 = vpop.permute.xlu1 %4502  ;;  %v4475_v5 = vld [vmem:[#allocation3 + $0x70] sm:$0xf]  ;;  %v4765_v10 = vor.u32 %v4764_v29, %v4760_v59  ;;  %v4768_v34 = vshll.u32 %v4579_v17, 16  ;;  %v3876_v20 = vsel %vm6855_vm13, %v5920_v8, %v3875_v2  ;;  %v3961_v24 = vld [vmem:[#allocation3 + $0x64] sm:$0xf] }
 0x3d8   : > { %v4976_v6 = vld [vmem:[#allocation5 + $0x18] sm:$0xff]  ;;  %v3889_v25 = vpop.permute.xlu0 %3888  ;;  %4545 = vst.msk [vmem:[#allocation5 + $0x40] sm:$0xf] %vm3928_vm4, %v4503_v11  ;;  %v4751_v38 = vrot.slane %v4749_v19, 4  ;;  %v4754_v55 = vrot.slane %v4752_v15, 5 }
 0x3d9   : > { %v6273_v39 = vld [vmem:[#allocation5 + $0x1c] ss:$12 sps:$4 sm:$0xff]   ;;  %v5941_v62 = vcombine.low %v4976_v6, %v4978_v40  ;;  %3933 = vst.msk [vmem:[#allocation5 + $0x30] sm:$0xf] %vm3928_vm4, %v3889_v25  ;;  %3910 = vrot.lane.b32.xlu1 %v3879_v21, %s6399_s12  ;;  %v4766_v41 = vrot.slane %v4765_v10, 4  ;;  %v4770_v42 = vrot.slane %v4768_v34, 5 }
 0x3da   : > { %v6290_v58 = vld [vmem:[#allocation5 + $0xb0] ss:$12 sps:$4 sm:$0xff]   ;;  %5340 = vmatprep.mubr.bf16.mxu1 %v6273_v39  ;;  %4423 = vrot.lane.b32.xlu0 %v4391_v31, %s6396_s26  ;;  %v4474_v63 = vld [vmem:[#allocation3 + $0x6c] sm:$0xf]  ;;  %v4755_v51 = vor.u32 %v4754_v55, %v4751_v38  ;;  %v3960_v0 = vld [vmem:[#allocation3 + $0x60] sm:$0xf] }
 0x3db   : > { %5341 = vmatmul.mubr.bf16.gmra.mxu1 %v5941_v62  ;;  %6148 = vmatmul.mubr.msk.bf16.gmra.mxu0 %vm5275_vm3, %v6290_v58  ;;  %v3989_v18 = vpop.permute.xlu1 %3988  ;;  %v4771_v32 = vsel %vm6886_vm15, %v4766_v41, %v4770_v42  ;;  %s6401_s26 = smov [#allocation6]  }
 0x3dc   : > { %v4501_v22 = vpop.permute.xlu0 %4500  ;;  %4032 = vst.msk [vmem:[#allocation5 + $0x3c] sm:$0xf] %vm4026_vm11, %v3989_v18  ;;  %v4756_v13 = vrot.slane %v4755_v51, 4 }
 0x3dd   : > { %4544 = vst.msk [vmem:[#allocation5 + $0x34] sm:$0xf] %vm3928_vm4, %v4501_v22  ;;  %4522 = vrot.lane.b32.xlu1 %v4475_v5, %s6399_s12 }
 0x3de   : > { %3908 = vrot.lane.b32.xlu0 %v3876_v20, %s6399_s12  ;;  %v4761_v26 = vsel %vm6886_vm15, %v4756_v13, %v4760_v59 }
 0x3df   : > { %v4783_v60 = vpop.permute.xlu1 %4782 }
 0x3e0   : > { %v3987_v1 = vpop.permute.xlu0 %3986  ;;  %4825 = vst.msk [vmem:[#allocation5 + $0x40] sm:$0xf] %vm4026_vm11, %v4783_v60 }
 0x3e1   : > { %4031 = vst.msk [vmem:[#allocation5 + $0x30] sm:$0xf] %vm4026_vm11, %v3987_v1  ;;  %4008 = vrot.lane.b32.xlu1 %v3961_v24, %s6400_s8 }
 0x3e2   : > { %4520 = vrot.lane.b32.xlu0 %v4474_v63, %s6399_s12  ;;  %s6298_s12 = sshll.u32 %s6401_s26, 4  ;;  %s6299_s12 = int_to_ptr.vmem [resolvable:$false] %s6298_s12 }
 0x3e3   : > { %v3726_v46 = vpop.permute.xlu1 %3725  ;;  %p6301_p5 = scmp.lt.s32.totalorder %s8702_s30, %s6299_s12 }
 0x3e4   : > { %v4781_v9 = vpop.permute.xlu0 %4780  ;;  %3767 = vst.msk [vmem:[#allocation5 + $0x54] sm:$0xf] %vm3759_vm14, %v3726_v46 }
 0x3e5   : > { %4824 = vst.msk [vmem:[#allocation5 + $0x34] sm:$0xf] %vm4026_vm11, %v4781_v9  ;;  %4802 = vrot.lane.b32.xlu1 %v4771_v32, %s6400_s8 }
 0x3e6   : > { %4006 = vrot.lane.b32.xlu0 %v3960_v0, %s6400_s8 }
 0x3e7   : > { %v4410_v28 = vpop.permute.xlu1 %4409  ;;  %v4982_v30 = vld [vmem:[#allocation5 + $0x3c] sm:$0xff] }
 0x3e8   : > { %v3724_v3 = vpop.permute.xlu0 %3723  ;;  %4450 = vst.msk [vmem:[#allocation5 + $0x58] sm:$0xf] %vm3759_vm14, %v4410_v28 }
 0x3e9   : > { %3766 = vst.msk [vmem:[#allocation5 + $0x48] sm:$0xf] %vm3759_vm14, %v3724_v3 }
 0x3ea   : > { %4800 = vrot.lane.b32.xlu0 %v4761_v26, %s6400_s8  ;;  %s6017_s8 = sshll.u32 %s6370_s21, 4 }
 0x3eb   : > { %v3895_v52 = vpop.permute.xlu1 %3894  ;;  %s5572_s9 = sadd.s32 %s6017_s8, %s5991_s17  ;;  %s6300_s8 = scalar_lea.vmem %s6299_s12, 4096 }
 0x3ec   : > { %v4408_v12 = vpop.permute.xlu0 %4407  ;;  %3936 = vst.msk [vmem:[#allocation5 + $0x54] sm:$0xf] %vm3928_vm4, %v3895_v52  ;;  %v4980_v2 = vld [vmem:[#allocation5 + $0x30] sm:$0xff]  ;;  %s5992_s13 = sshll.u32 %s5572_s9, 7  ;;  %p6302_p6 = scmp.lt.s32.totalorder %s6300_s8, %s6294_s16 }
 0x3ed   : > { %v6275_v33 = vld [vmem:[#allocation5 + $0x34] ss:$12 sps:$4 sm:$0xff]   ;;  %4449 = vst.msk [vmem:[#allocation5 + $0x4c] sm:$0xf] %vm3759_vm14, %v4408_v12  ;;  %v5944_v53 = vcombine.low %v4980_v2, %v4982_v30  ;;  %s8700_s10 = scalar_lea.hbm %s8765_s5, %s5992_s13 }
 0x3ee   : > { %5348 = vmatprep.mubr.bf16.mxu1 %v6275_v33  ;;  %p6303_p7 = por %p6302_p6, %p6301_p5 }
 0x3ef   : > { %5349 = vmatmul.mubr.bf16.gmra.mxu1 %v5944_v53  ;;  %v4507_v4 = vpop.permute.xlu1 %4506 }
 0x3f0   : > { %v3893_v14 = vpop.permute.xlu0 %3892  ;;  %4547 = vst.msk [vmem:[#allocation5 + $0x58] sm:$0xf] %vm3928_vm4, %v4507_v4  ;;  %p6304_p9 = pnand %p6303_p7, %p6297_p4 }
 0x3f1   : > { %3935 = vst.msk [vmem:[#allocation5 + $0x48] sm:$0xf] %vm3928_vm4, %v3893_v14 }
 0x3f3   : > { %v3993_v50 = vpop.permute.xlu1 %3992 }
 0x3f4   : > { %v4505_v16 = vpop.permute.xlu0 %4504  ;;  %4034 = vst.msk [vmem:[#allocation5 + $0x54] sm:$0xf] %vm4026_vm11, %v3993_v50 }
 0x3f5   : > { %4546 = vst.msk [vmem:[#allocation5 + $0x4c] sm:$0xf] %vm3928_vm4, %v4505_v16 }
 0x3f7   : > { %v4787_v47 = vpop.permute.xlu1 %4786 }
 0x3f8   : > { %v3991_v23 = vpop.permute.xlu0 %3990  ;;  %4827 = vst.msk [vmem:[#allocation5 + $0x58] sm:$0xf] %vm4026_vm11, %v4787_v47 }
 0x3f9   : > { %4033 = vst.msk [vmem:[#allocation5 + $0x48] sm:$0xf] %vm4026_vm11, %v3991_v23 }
 0x3fb   : > { %v3730_v61 = vpop.permute.xlu1 %3729 }
 0x3fc   : > { %v4785_v35 = vpop.permute.xlu0 %4784  ;;  %3769 = vst.msk [vmem:[#allocation5 + $0x6c] sm:$0xf] %vm3759_vm14, %v3730_v61 }
 0x3fd   : > { %4826 = vst.msk [vmem:[#allocation5 + $0x4c] sm:$0xf] %vm4026_vm11, %v4785_v35 }
 0x3ff   : > { %v4414_v7 = vpop.permute.xlu1 %4413  ;;  %v4986_v56 = vld [vmem:[#allocation5 + $0x54] sm:$0xff] }
 0x400   : > { %v3728_v44 = vpop.permute.xlu0 %3727  ;;  %4452 = vst.msk [vmem:[#allocation5 + $0x70] sm:$0xf] %vm3759_vm14, %v4414_v7 }
 0x401   : > { %3768 = vst.msk [vmem:[#allocation5 + $0x60] sm:$0xf] %vm3759_vm14, %v3728_v44 }
 0x403   : > { %v3899_v49 = vpop.permute.xlu1 %3898 }
 0x404   : > { %v4412_v36 = vpop.permute.xlu0 %4411  ;;  %3938 = vst.msk [vmem:[#allocation5 + $0x6c] sm:$0xf] %vm3928_vm4, %v3899_v49  ;;  %v4984_v43 = vld [vmem:[#allocation5 + $0x48] sm:$0xff] }
 0x405   : > { %v6279_v54 = vld [vmem:[#allocation5 + $0x4c] ss:$12 sps:$4 sm:$0xff]   ;;  %4451 = vst.msk [vmem:[#allocation5 + $0x64] sm:$0xf] %vm3759_vm14, %v4412_v36  ;;  %v5947_v45 = vcombine.low %v4984_v43, %v4986_v56  ;;  %v8646_v56 = vld [vmem:[%s8764_s4] ss:$0 sm:$0xff] }
 0x406   : > { %5356 = vmatprep.mubr.bf16.mxu1 %v6279_v54 }
 0x407   : > { %5357 = vmatmul.mubr.bf16.gmra.mxu1 %v5947_v45  ;;  %v4511_v40 = vpop.permute.xlu1 %4510 }
 0x408   : > { %v3897_v57 = vpop.permute.xlu0 %3896  ;;  %4549 = vst.msk [vmem:[#allocation5 + $0x70] sm:$0xf] %vm3928_vm4, %v4511_v40 }
 0x409   : > { %3937 = vst.msk [vmem:[#allocation5 + $0x60] sm:$0xf] %vm3928_vm4, %v3897_v57 }
 0x40b   : > { %v3997_v37 = vpop.permute.xlu1 %3996 }
 0x40c   : > { %v4509_v27 = vpop.permute.xlu0 %4508  ;;  %4036 = vst.msk [vmem:[#allocation5 + $0x6c] sm:$0xf] %vm4026_vm11, %v3997_v37 }
 0x40d   : > { %4548 = vst.msk [vmem:[#allocation5 + $0x64] sm:$0xf] %vm3928_vm4, %v4509_v27 }
 0x40f   : > { %v4791_v48 = vpop.permute.xlu1 %4790 }
 0x410   : > { %v3995_v6 = vpop.permute.xlu0 %3994  ;;  %4829 = vst.msk [vmem:[#allocation5 + $0x70] sm:$0xf] %vm4026_vm11, %v4791_v48 }
 0x411   : > { %4035 = vst.msk [vmem:[#allocation5 + $0x60] sm:$0xf] %vm4026_vm11, %v3995_v6 }
 0x413   : > { %v3734_v39 = vpop.permute.xlu1 %3733 }
 0x414   : > { %v4789_v62 = vpop.permute.xlu0 %4788  ;;  %3771 = vst.msk [vmem:[#allocation5 + $0x84] sm:$0xf] %vm3759_vm14, %v3734_v39 }
 0x415   : > { %4828 = vst.msk [vmem:[#allocation5 + $0x64] sm:$0xf] %vm4026_vm11, %v4789_v62 }
 0x417   : > { %v4418_v58 = vpop.permute.xlu1 %4417  ;;  %v4990_v31 = vld [vmem:[#allocation5 + $0x6c] sm:$0xff] }
 0x418   : > { %v3732_v21 = vpop.permute.xlu0 %3731  ;;  %4454 = vst.msk [vmem:[#allocation5 + $0x88] sm:$0xf] %vm3759_vm14, %v4418_v58 }
 0x419   : > { %3770 = vst.msk [vmem:[#allocation5 + $0x78] sm:$0xf] %vm3759_vm14, %v3732_v21 }
 0x41b   : > { %v3903_v59 = vpop.permute.xlu1 %3902 }
 0x41c   : > { %v4416_v29 = vpop.permute.xlu0 %4415  ;;  %3940 = vst.msk [vmem:[#allocation5 + $0x84] sm:$0xf] %vm3928_vm4, %v3903_v59  ;;  %v4988_v11 = vld [vmem:[#allocation5 + $0x60] sm:$0xff] }
 0x41d   : > { %v6281_v8 = vld [vmem:[#allocation5 + $0x64] ss:$12 sps:$4 sm:$0xff]   ;;  %4453 = vst.msk [vmem:[#allocation5 + $0x7c] sm:$0xf] %vm3759_vm14, %v4416_v29  ;;  %v5950_v17 = vcombine.low %v4988_v11, %v4990_v31 }
 0x41e   : > { %5364 = vmatprep.mubr.bf16.mxu1 %v6281_v8 }
 0x41f   : > { %5365 = vmatmul.mubr.bf16.gmra.mxu1 %v5950_v17  ;;  %v4515_v19 = vpop.permute.xlu1 %4514 }
 0x420   : > { %v3901_v15 = vpop.permute.xlu0 %3900  ;;  %4551 = vst.msk [vmem:[#allocation5 + $0x88] sm:$0xf] %vm3928_vm4, %v4515_v19 }
 0x421   : > { %3939 = vst.msk [vmem:[#allocation5 + $0x78] sm:$0xf] %vm3928_vm4, %v3901_v15 }
 0x423   : > { %v4001_v25 = vpop.permute.xlu1 %4000 }
 0x424   : > { %v4513_v5 = vpop.permute.xlu0 %4512  ;;  %4038 = vst.msk [vmem:[#allocation5 + $0x84] sm:$0xf] %vm4026_vm11, %v4001_v25 }
 0x425   : > { %4550 = vst.msk [vmem:[#allocation5 + $0x7c] sm:$0xf] %vm3928_vm4, %v4513_v5 }
 0x427   : > { %v4795_v10 = vpop.permute.xlu1 %4794 }
 0x428   : > { %v3999_v34 = vpop.permute.xlu0 %3998  ;;  %4831 = vst.msk [vmem:[#allocation5 + $0x88] sm:$0xf] %vm4026_vm11, %v4795_v10 }
 0x429   : > { %4037 = vst.msk [vmem:[#allocation5 + $0x78] sm:$0xf] %vm4026_vm11, %v3999_v34 }
 0x42b   : > { %v3738_v18 = vpop.permute.xlu1 %3737 }
 0x42c   : > { %v4793_v20 = vpop.permute.xlu0 %4792  ;;  %3773 = vst.msk [vmem:[#allocation5 + $0x9c] sm:$0xf] %vm3759_vm14, %v3738_v18 }
 0x42d   : > { %4830 = vst.msk [vmem:[#allocation5 + $0x7c] sm:$0xf] %vm4026_vm11, %v4793_v20 }
 0x42f   : > { %v4422_v38 = vpop.permute.xlu1 %4421  ;;  %v4994_v42 = vld [vmem:[#allocation5 + $0x84] sm:$0xff] }
 0x430   : > { %v3736_v55 = vpop.permute.xlu0 %3735  ;;  %4456 = vst.msk [vmem:[#allocation5 + $0xa0] sm:$0xf] %vm3759_vm14, %v4422_v38 }
 0x431   : > { %3772 = vst.msk [vmem:[#allocation5 + $0x90] sm:$0xf] %vm3759_vm14, %v3736_v55 }
 0x433   : > { %v3907_v22 = vpop.permute.xlu1 %3906 }
 0x434   : > { %v4420_v24 = vpop.permute.xlu0 %4419  ;;  %3942 = vst.msk [vmem:[#allocation5 + $0x9c] sm:$0xf] %vm3928_vm4, %v3907_v22  ;;  %v4992_v41 = vld [vmem:[#allocation5 + $0x78] sm:$0xff] }
 0x435   : > { %v6285_v60 = vld [vmem:[#allocation5 + $0x7c] ss:$12 sps:$4 sm:$0xff]   ;;  %4455 = vst.msk [vmem:[#allocation5 + $0x94] sm:$0xf] %vm3759_vm14, %v4420_v24  ;;  %v5953_v63 = vcombine.low %v4992_v41, %v4994_v42 }
 0x436   : > { %5372 = vmatprep.mubr.bf16.mxu1 %v6285_v60 }
 0x437   : > { %5373 = vmatmul.mubr.bf16.gmra.mxu1 %v5953_v63  ;;  %v4519_v51 = vpop.permute.xlu1 %4518 }
 0x438   : > { %v3905_v1 = vpop.permute.xlu0 %3904  ;;  %4553 = vst.msk [vmem:[#allocation5 + $0xa0] sm:$0xf] %vm3928_vm4, %v4519_v51 }
 0x439   : > { %3941 = vst.msk [vmem:[#allocation5 + $0x90] sm:$0xf] %vm3928_vm4, %v3905_v1 }
 0x43b   : > { %v4005_v32 = vpop.permute.xlu1 %4004 }
 0x43c   : > { %v4517_v46 = vpop.permute.xlu0 %4516  ;;  %4040 = vst.msk [vmem:[#allocation5 + $0x9c] sm:$0xf] %vm4026_vm11, %v4005_v32 }
 0x43d   : > { %4552 = vst.msk [vmem:[#allocation5 + $0x94] sm:$0xf] %vm3928_vm4, %v4517_v46 }
 0x43f   : > { %v4799_v0 = vpop.permute.xlu1 %4798 }
 0x440   : > { %v4003_v13 = vpop.permute.xlu0 %4002  ;;  %4833 = vst.msk [vmem:[#allocation5 + $0xa0] sm:$0xf] %vm4026_vm11, %v4799_v0 }
 0x441   : > { %4039 = vst.msk [vmem:[#allocation5 + $0x90] sm:$0xf] %vm4026_vm11, %v4003_v13 }
 0x443   : > { %v3742_v9 = vpop.permute.xlu1 %3741 }
 0x444   : > { %v4797_v28 = vpop.permute.xlu0 %4796  ;;  %3775 = vst.msk [vmem:[#allocation5 + $0xb4] sm:$0xf] %vm3759_vm14, %v3742_v9 }
 0x445   : > { %4832 = vst.msk [vmem:[#allocation5 + $0x94] sm:$0xf] %vm4026_vm11, %v4797_v28 }
 0x447   : > { %v4426_v26 = vpop.permute.xlu1 %4425  ;;  %v4998_v30 = vld [vmem:[#allocation5 + $0x9c] sm:$0xff]  ;;  %v6137_v44 = vpop.f32.mrf.mxu0 }
 0x448   : > { %v3740_v3 = vpop.permute.xlu0 %3739  ;;  %4458 = vst.msk [vmem:[#allocation5 + $0xb8] sm:$0xf] %vm3759_vm14, %v4426_v26 }
 0x449   : > { %3774 = vst.msk [vmem:[#allocation5 + $0xa8] sm:$0xf] %vm3759_vm14, %v3740_v3  ;;  %v5431_v36 = vpop.f32.mrf.mxu0 }
 0x44b   : > { %v3911_v52 = vpop.permute.xlu1 %3910  ;;  %v6138_v40 = vpop.f32.mrf.mxu0 }
 0x44c   : > { %v4424_v12 = vpop.permute.xlu0 %4423  ;;  %3944 = vst.msk [vmem:[#allocation5 + $0xb4] sm:$0xf] %vm3928_vm4, %v3911_v52  ;;  %v4996_v2 = vld [vmem:[#allocation5 + $0x90] sm:$0xff] }
 0x44d   : > { %v6287_v33 = vld [vmem:[#allocation5 + $0x94] ss:$12 sps:$4 sm:$0xff]   ;;  %4457 = vst.msk [vmem:[#allocation5 + $0xac] sm:$0xf] %vm3759_vm14, %v4424_v12  ;;  %v5956_v53 = vcombine.low %v4996_v2, %v4998_v30  ;;  %v5434_v6 = vpop.f32.mrf.mxu0 }
 0x44e   : > { %5380 = vmatprep.mubr.bf16.mxu1 %v6287_v33 }
 0x44f   : > { %5381 = vmatmul.mubr.bf16.gmra.mxu1 %v5956_v53  ;;  %v4523_v4 = vpop.permute.xlu1 %4522 }
 0x450   : > { %v3909_v14 = vpop.permute.xlu0 %3908  ;;  %4555 = vst.msk [vmem:[#allocation5 + $0xb8] sm:$0xf] %vm3928_vm4, %v4523_v4 }
 0x451   : > { %3943 = vst.msk [vmem:[#allocation5 + $0xa8] sm:$0xf] %vm3928_vm4, %v3909_v14 }
 0x453   : > { %v4009_v50 = vpop.permute.xlu1 %4008 }
 0x454   : > { %v4521_v16 = vpop.permute.xlu0 %4520  ;;  %4042 = vst.msk [vmem:[#allocation5 + $0xb4] sm:$0xf] %vm4026_vm11, %v4009_v50 }
 0x455   : > { %4554 = vst.msk [vmem:[#allocation5 + $0xac] sm:$0xf] %vm3928_vm4, %v4521_v16 }
 0x457   : > { %v4803_v47 = vpop.permute.xlu1 %4802 }
 0x458   : > { %v4007_v23 = vpop.permute.xlu0 %4006  ;;  %4835 = vst.msk [vmem:[#allocation5 + $0xb8] sm:$0xf] %vm4026_vm11, %v4803_v47 }
 0x459   : > { %4041 = vst.msk [vmem:[#allocation5 + $0xa8] sm:$0xf] %vm4026_vm11, %v4007_v23 }
 0x45c   : > { %v4801_v61 = vpop.permute.xlu0 %4800 }
 0x45d   : > { %4834 = vst.msk [vmem:[#allocation5 + $0xac] sm:$0xf] %vm4026_vm11, %v4801_v61 }
 0x460   : > { %v6293_v7 = vld [vmem:[#allocation5 + $0xa8] ss:$12 sps:$4 sm:$0xff]  }
 0x464   : > { %v6291_v35 = vld [vmem:[#allocation5 + $0xac] ss:$12 sps:$4 sm:$0xff]  }
 0x465   : > { %5388 = vmatprep.mubr.bf16.mxu1 %v6291_v35 }
 0x466   : > { %5389 = vmatmul.mubr.bf16.gmra.mxu1 %v6293_v7 }
 0x475   : > { %v6141_v22 = vpop.f32.mrf.mxu0 }
 0x477   : > { %v5447_v41 = vpop.f32.mrf.mxu0 }
 0x479   : > { %v6142_v51 = vpop.f32.mrf.mxu0 }
 0x47b   : > { %v5450_v13 = vpop.f32.mrf.mxu0 }
 0x47f   : > { %v6047_v49 = vpop.f32.mrf.mxu1 }
 0x481   : > { %v6048_v43 = vpop.f32.mrf.mxu1 }
 0x482   : > { %v6049_v54 = vadd.f32 %v6048_v43, %v6047_v49  ;;  %v6145_v49 = vpop.f32.mrf.mxu0 }
 0x483   : > { %v6050_v45 = vpop.f32.mrf.mxu1 }
 0x484   : > { %v5335_v57 = vadd.f32 %v6049_v54, %v8646_v56  ;;  %v5463_v43 = vpop.f32.mrf.mxu0 }
 0x485   : > { %v6051_v37 = vpop.f32.mrf.mxu1 }
 0x486   : > { %v6052_v27 = vadd.f32 %v6051_v37, %v6050_v45  ;;  %v5432_v48 = vadd.f32 %v5431_v36, %v5335_v57  ;;  %v6146_v57 = vpop.f32.mrf.mxu0 }
 0x488   : > { %vm5494_vm13 = vcmp.ge.f32.partialorder %v5432_v48, 0.0  ;;  %v5510_v39 = vmul.f32 0.01, %v5432_v48  ;;  %v5338_v62 = vadd.f32 %v6052_v27, %v8646_v56 }
 0x48a   : > { %v5526_v58 = vsel %vm5494_vm13, %v5432_v48, %v5510_v39  ;;  %v5435_v21 = vadd.f32 %v5434_v6, %v5338_v62  ;;  %v5466_v39 = vpop.f32.mrf.mxu0 }
 0x48b   : > { %5542 = vst.msk [vmem:[%s6514_s27] sm:$0xff] %vm5275_vm3, %v5526_v58 }
 0x48c   : > { %vm5495_vm15 = vcmp.ge.f32.partialorder %v5435_v21, 0.0  ;;  %v5511_v59 = vmul.f32 0.01, %v5435_v21 }
 0x48e   : > { %v5527_v29 = vsel %vm5495_vm15, %v5435_v21, %v5511_v59 }
 0x48f   : > { %5543 = vst.msk [vmem:[%s6514_s27 + $0x8] sm:$0xff] %vm5275_vm3, %v5527_v29 }
 0x49b   : > { %v6053_v11 = vpop.f32.mrf.mxu1 }
 0x49d   : > { %v6054_v31 = vpop.f32.mrf.mxu1 }
 0x49e   : > { %v6055_v8 = vadd.f32 %v6054_v31, %v6053_v11 }
 0x49f   : > { %v6056_v17 = vpop.f32.mrf.mxu1 }
 0x4a0   : > { %v5343_v19 = vadd.f32 %v6055_v8, %v8646_v56 }
 0x4a1   : > { %v6057_v15 = vpop.f32.mrf.mxu1 }
 0x4a2   : > { %v5440_v25 = vadd.f32 %v6137_v44, %v5343_v19  ;;  %v6058_v5 = vadd.f32 %v6057_v15, %v6056_v17 }
 0x4a4   : > { %vm5496_vm0 = vcmp.ge.f32.partialorder %v5440_v25, 0.0  ;;  %v5512_v10 = vmul.f32 0.01, %v5440_v25  ;;  %v5346_v34 = vadd.f32 %v6058_v5, %v8646_v56 }
 0x4a6   : > { %v5528_v18 = vsel %vm5496_vm0, %v5440_v25, %v5512_v10  ;;  %v5443_v20 = vadd.f32 %v6138_v40, %v5346_v34 }
 0x4a7   : > { %5544 = vst.msk [vmem:[%s6514_s27 + $0x10] sm:$0xff] %vm5275_vm3, %v5528_v18 }
 0x4a8   : > { %vm5497_vm12 = vcmp.ge.f32.partialorder %v5443_v20, 0.0  ;;  %v5513_v38 = vmul.f32 0.01, %v5443_v20 }
 0x4aa   : > { %v5529_v55 = vsel %vm5497_vm12, %v5443_v20, %v5513_v38 }
 0x4ab   : > { %5545 = vst.msk [vmem:[%s6514_s27 + $0x18] sm:$0xff] %vm5275_vm3, %v5529_v55 }
 0x4af   : > { %v6059_v24 = vpop.f32.mrf.mxu1 }
 0x4b1   : > { %v6060_v42 = vpop.f32.mrf.mxu1 }
 0x4b2   : > { %v6061_v60 = vadd.f32 %v6060_v42, %v6059_v24  ;;  %v6149_v24 = vpop.f32.mrf.mxu0 }
 0x4b3   : > { %v6062_v63 = vpop.f32.mrf.mxu1 }
 0x4b4   : > { %v5351_v1 = vadd.f32 %v6061_v60, %v8646_v56  ;;  %v5479_v42 = vpop.f32.mrf.mxu0 }
 0x4b5   : > { %v6063_v32 = vpop.f32.mrf.mxu1 }
 0x4b6   : > { %v6064_v46 = vadd.f32 %v6063_v32, %v6062_v63  ;;  %v5448_v0 = vadd.f32 %v5447_v41, %v5351_v1  ;;  %v6150_v1 = vpop.f32.mrf.mxu0 }
 0x4b8   : > { %vm5498_vm5 = vcmp.ge.f32.partialorder %v5448_v0, 0.0  ;;  %v5514_v9 = vmul.f32 0.01, %v5448_v0  ;;  %v5354_v28 = vadd.f32 %v6064_v46, %v8646_v56 }
 0x4ba   : > { %v5530_v26 = vsel %vm5498_vm5, %v5448_v0, %v5514_v9  ;;  %v5451_v3 = vadd.f32 %v5450_v13, %v5354_v28  ;;  %v5482_v9 = vpop.f32.mrf.mxu0 }
 0x4bb   : > { %5546 = vst.msk [vmem:[%s6514_s27 + $0x20] sm:$0xff] %vm5275_vm3, %v5530_v26 }
 0x4bc   : > { %vm5499_vm6 = vcmp.ge.f32.partialorder %v5451_v3, 0.0  ;;  %v5515_v52 = vmul.f32 0.01, %v5451_v3 }
 0x4be   : > { %v5531_v12 = vsel %vm5499_vm6, %v5451_v3, %v5515_v52 }
 0x4bf   : > { %5547 = vst.msk [vmem:[%s6514_s27 + $0x28] sm:$0xff] %vm5275_vm3, %v5531_v12 }
 0x4c7   : > { %v6065_v2 = vpop.f32.mrf.mxu1 }
 0x4c9   : > { %v6066_v30 = vpop.f32.mrf.mxu1 }
 0x4ca   : > { %v6067_v33 = vadd.f32 %v6066_v30, %v6065_v2 }
 0x4cb   : > { %v6068_v53 = vpop.f32.mrf.mxu1 }
 0x4cc   : > { %v5359_v4 = vadd.f32 %v6067_v33, %v8646_v56 }
 0x4cd   : > { %v6069_v14 = vpop.f32.mrf.mxu1 }
 0x4ce   : > { %v5456_v50 = vadd.f32 %v6141_v22, %v5359_v4  ;;  %v6070_v16 = vadd.f32 %v6069_v14, %v6068_v53 }
 0x4d0   : > { %vm5500_vm7 = vcmp.ge.f32.partialorder %v5456_v50, 0.0  ;;  %v5516_v47 = vmul.f32 0.01, %v5456_v50  ;;  %v5362_v23 = vadd.f32 %v6070_v16, %v8646_v56 }
 0x4d2   : > { %v5532_v61 = vsel %vm5500_vm7, %v5456_v50, %v5516_v47  ;;  %v5459_v35 = vadd.f32 %v6142_v51, %v5362_v23 }
 0x4d3   : > { %5548 = vst.msk [vmem:[%s6514_s27 + $0x30] sm:$0xff] %vm5275_vm3, %v5532_v61 }
 0x4d4   : > { %vm5501_vm8 = vcmp.ge.f32.partialorder %v5459_v35, 0.0  ;;  %v5517_v7 = vmul.f32 0.01, %v5459_v35 }
 0x4d6   : > { %v5533_v44 = vsel %vm5501_vm8, %v5459_v35, %v5517_v7 }
 0x4d7   : > { %5549 = vst.msk [vmem:[%s6514_s27 + $0x38] sm:$0xff] %vm5275_vm3, %v5533_v44 }
 0x4df   : > { %v6071_v36 = vpop.f32.mrf.mxu1 }
 0x4e1   : > { %v6072_v54 = vpop.f32.mrf.mxu1 }
 0x4e2   : > { %v6073_v45 = vadd.f32 %v6072_v54, %v6071_v36 }
 0x4e3   : > { %v6074_v40 = vpop.f32.mrf.mxu1 }
 0x4e4   : > { %v5367_v37 = vadd.f32 %v6073_v45, %v8646_v56 }
 0x4e5   : > { %v6075_v27 = vpop.f32.mrf.mxu1 }
 0x4e6   : > { %v6076_v48 = vadd.f32 %v6075_v27, %v6074_v40  ;;  %v5464_v6 = vadd.f32 %v5463_v43, %v5367_v37 }
 0x4e8   : > { %vm5502_vm9 = vcmp.ge.f32.partialorder %v5464_v6, 0.0  ;;  %v5518_v62 = vmul.f32 0.01, %v5464_v6  ;;  %v5370_v58 = vadd.f32 %v6076_v48, %v8646_v56 }
 0x4ea   : > { %v5534_v21 = vsel %vm5502_vm9, %v5464_v6, %v5518_v62  ;;  %v5467_v59 = vadd.f32 %v5466_v39, %v5370_v58 }
 0x4eb   : > { %5550 = vst.msk [vmem:[%s6514_s27 + $0x40] sm:$0xff] %vm5275_vm3, %v5534_v21 }
 0x4ec   : > { %vm5503_vm10 = vcmp.ge.f32.partialorder %v5467_v59, 0.0  ;;  %v5519_v29 = vmul.f32 0.01, %v5467_v59 }
 0x4ee   : > { %v5535_v11 = vsel %vm5503_vm10, %v5467_v59, %v5519_v29 }
 0x4ef   : > { %5551 = vst.msk [vmem:[%s6514_s27 + $0x48] sm:$0xff] %vm5275_vm3, %v5535_v11 }
 0x4f7   : > { %v6077_v31 = vpop.f32.mrf.mxu1 }
 0x4f9   : > { %v6078_v8 = vpop.f32.mrf.mxu1 }
 0x4fa   : > { %v6079_v17 = vadd.f32 %v6078_v8, %v6077_v31 }
 0x4fb   : > { %v6080_v19 = vpop.f32.mrf.mxu1 }
 0x4fc   : > { %v5375_v15 = vadd.f32 %v6079_v17, %v8646_v56 }
 0x4fd   : > { %v6081_v25 = vpop.f32.mrf.mxu1 }
 0x4fe   : > { %v5472_v5 = vadd.f32 %v6145_v49, %v5375_v15  ;;  %v6082_v10 = vadd.f32 %v6081_v25, %v6080_v19 }
 0x500   : > { %vm5504_vm1 = vcmp.ge.f32.partialorder %v5472_v5, 0.0  ;;  %v5520_v34 = vmul.f32 0.01, %v5472_v5  ;;  %v5378_v18 = vadd.f32 %v6082_v10, %v8646_v56 }
 0x502   : > { %v5536_v20 = vsel %vm5504_vm1, %v5472_v5, %v5520_v34  ;;  %v5475_v38 = vadd.f32 %v6146_v57, %v5378_v18 }
 0x503   : > { %5552 = vst.msk [vmem:[%s6514_s27 + $0x50] sm:$0xff] %vm5275_vm3, %v5536_v20 }
 0x504   : > { %vm5505_vm2 = vcmp.ge.f32.partialorder %v5475_v38, 0.0  ;;  %v5521_v55 = vmul.f32 0.01, %v5475_v38 }
 0x506   : > { %v5537_v22 = vsel %vm5505_vm2, %v5475_v38, %v5521_v55 }
 0x507   : > { %5553 = vst.msk [vmem:[%s6514_s27 + $0x58] sm:$0xff] %vm5275_vm3, %v5537_v22 }
 0x50f   : > { %v6083_v41 = vpop.f32.mrf.mxu1 }
 0x511   : > { %v6084_v60 = vpop.f32.mrf.mxu1 }
 0x512   : > { %v6085_v63 = vadd.f32 %v6084_v60, %v6083_v41 }
 0x513   : > { %v6086_v51 = vpop.f32.mrf.mxu1 }
 0x514   : > { %v5383_v32 = vadd.f32 %v6085_v63, %v8646_v56 }
 0x515   : > { %v6087_v46 = vpop.f32.mrf.mxu1 }
 0x516   : > { %v6088_v0 = vadd.f32 %v6087_v46, %v6086_v51  ;;  %v5480_v13 = vadd.f32 %v5479_v42, %v5383_v32 }
 0x518   : > { %vm5506_vm14 = vcmp.ge.f32.partialorder %v5480_v13, 0.0  ;;  %v5522_v28 = vmul.f32 0.01, %v5480_v13  ;;  %v5386_v26 = vadd.f32 %v6088_v0, %v8646_v56 }
 0x51a   : > { %v5538_v3 = vsel %vm5506_vm14, %v5480_v13, %v5522_v28  ;;  %v5483_v52 = vadd.f32 %v5482_v9, %v5386_v26 }
 0x51b   : > { %5554 = vst.msk [vmem:[%s6514_s27 + $0x60] sm:$0xff] %vm5275_vm3, %v5538_v3 }
 0x51c   : > { %vm5507_vm4 = vcmp.ge.f32.partialorder %v5483_v52, 0.0  ;;  %v5523_v12 = vmul.f32 0.01, %v5483_v52 }
 0x51e   : > { %v5539_v2 = vsel %vm5507_vm4, %v5483_v52, %v5523_v12 }
 0x51f   : > { %5555 = vst.msk [vmem:[%s6514_s27 + $0x68] sm:$0xff] %vm5275_vm3, %v5539_v2 }
 0x526   : > { %v6089_v30 = vpop.f32.mrf.mxu1 }
 0x528   : > { %v6090_v33 = vpop.f32.mrf.mxu1 }
 0x529   : > { %v6091_v53 = vadd.f32 %v6090_v33, %v6089_v30 }
 0x52a   : > { %v6092_v4 = vpop.f32.mrf.mxu1 }
 0x52b   : > { %v5391_v14 = vadd.f32 %v6091_v53, %v8646_v56 }
 0x52c   : > { %v6093_v50 = vpop.f32.mrf.mxu1 }
 0x52d   : > { %v5488_v16 = vadd.f32 %v6149_v24, %v5391_v14  ;;  %v6094_v47 = vadd.f32 %v6093_v50, %v6092_v4 }
 0x52f   : > { %vm5508_vm11 = vcmp.ge.f32.partialorder %v5488_v16, 0.0  ;;  %v5524_v23 = vmul.f32 0.01, %v5488_v16  ;;  %v5394_v61 = vadd.f32 %v6094_v47, %v8646_v56 }
 0x531   : > { %v5540_v35 = vsel %vm5508_vm11, %v5488_v16, %v5524_v23  ;;  %v5491_v7 = vadd.f32 %v6150_v1, %v5394_v61 }
 0x532   : > { %5556 = vst.msk [vmem:[%s6514_s27 + $0x70] sm:$0xff] %vm5275_vm3, %v5540_v35 }
 0x533   : > { %vm5509_vm13 = vcmp.ge.f32.partialorder %v5491_v7, 0.0  ;;  %v5525_v44 = vmul.f32 0.01, %v5491_v7 }
 0x535   : > { %v5541_v49 = vsel %vm5509_vm13, %v5491_v7, %v5525_v44 }
 0x536   : > { %5557 = vst.msk [vmem:[%s6514_s27 + $0x78] sm:$0xff] %vm5275_vm3, %v5541_v49 }
 0x537   : > { %6307 = shalt.err (!%p6304_p9)
}
 0x538   : > { %s6308_s27 = scalar_lea.hbm %s8700_s10, 2048  ;;  %s6312_s13 = scalar_lea.hbm %s8765_s5, 8192 }
 0x539   : > { %p6309_p10 = scmp.ne.s32.totalorder %s8700_s10, %s6308_s27  ;;  %p6313_p13 = scmp.lt.s32.totalorder %s8700_s10, %s8765_s5 }
 0x53a   : > { %p6314_p0 = scmp.lt.s32.totalorder %s6312_s13, %s6308_s27 }
 0x53b   : > { %p6310_p11 = pnand %p6309_p10, %p6484_p3 }
 0x53c   : > { %p6315_p1 = por %p6314_p0, %p6313_p13 }
 0x53d   : > { %p6311_p12 = pneg %p6310_p11 }
 0x53f   : > { %p6316_p2 = pnand %p6315_p1, %p6311_p12 }
 0x541   : > { %6319 = shalt.err (!%p6316_p2)
}
 0x542   : > { %s6402_s14 = smov 128   ;;  %s8795_s16 = smov 8  }
 0x543   : > { %6152 = dma.vmem_to_hbm [thread:$0]  (%p6484_p3), %s8702_s30, 2048, %s8700_s10, %s8708_s15, %s6402_s14, %s6402_s14, %s8795_s16  }
 0x544 PF: > { %p6158_p4 = scmp.ge.s32.totalorder %s6386_s25, 2  ;;  %s5590_s26 = sand.u32 1, %s6358_s18  }
 0x545   : > { %s5591_s12 = scalar_lea.sflag [#allocation7], %s5590_s26 }
 0x546   : > { %p6155_p5 = pnand %p6158_p4, %p6493_p8 }
 0x548   : > { %p6156_p6 = pneg %p6155_p5 }
 0x54a   : > { %6353 = dma.done.wait (%p6156_p6), %s5591_s12, 2048  }
 0x54b   : > { %6355 = vsyncadd (%p6156_p6), %s5591_s12, 4294965248  ;;  %s18_s25 = sadd.s32 1, %s6386_s25   ;;  %s8796_s18 = smov %s6362_s19 }
 0x54c   : > { %p15_p7 = scmp.ge.s32.totalorder %s18_s25, 6   ;;  %s8797_s19 = smov %s6366_s20 }
 0x54d   : > { %s8798_s20 = smov %s6502_s11  ;;  %s8799_s21 = smov %s6378_s23 }
 0x54e   : > { %s8800_s22 = smov %s6382_s24  ;;  %s8801_s23 = smov %s8804_s28 }
 0x54f   : > { %s8802_s24 = smov %s8808_s29  ;;  %17 = sbr.rel (!%p15_p7) target bundleno = 5 (0x5), region = 94 }
 0x554   :  { %5596 = vsyncpa [#allocation7], 1 }
 0x555   :  { %5598 = vsyncpa [#allocation7 + $0x1], 1 }

</bundles_post_ra>
